<compile_context>
chip_gen: v7x
topology: tpu7x:2x2x1
jax: 0.10.0
libtpu: 0.0.40
codegen_flags: <defaults>
</compile_context>

<pallas_src>
import functools

import jax
import jax.numpy as jnp
import numpy as np
from jax import lax
from jax.experimental import pallas as pl
from jax.experimental.pallas import tpu as pltpu


def _log_sigmoid(x):
    # Stable log(sigmoid(x)) = min(x, 0) - log(1 + exp(-|x|)); equals
    # torch.log(torch.sigmoid(x)) without underflowing to -inf.
    return jnp.minimum(x, 0.0) - jnp.log(1.0 + jnp.exp(-jnp.abs(x)))


def _decode_step(onehot, dur, hs, cs, w0, wcats, bs, wfc, bfc,
                 cols_o, is_dur, cols_v, want_next=True):
    """One autoregressive decoder step.  Shared (identical op sequence) by the Pallas
    kernel and the numerics-matched pure-JAX reference."""
    cdt = w0.dtype                      # matmul compute dtype (bf16 in the perf path)
    num_layers = len(hs)
    H = hs[0].shape[-1]
    O = wfc.shape[-1]

    new_hs, new_cs = [], []
    inp = None
    for l in range(num_layers):
        if l == 0:
            # Fused: embedding lookup + duration column + layer-0 W_ih and W_hh -> 1 matmul.
            x = jnp.concatenate([onehot, dur, hs[0]], axis=-1).astype(cdt)
            w = w0
        else:
            # Fused W_ih / W_hh for the upper layers.
            x = jnp.concatenate([inp, hs[l]], axis=-1).astype(cdt)
            w = wcats[l - 1]
        gates = jnp.dot(x, w, preferred_element_type=jnp.float32) + bs[l]   # (B, 4H) f32
        # PyTorch gate order i, f, g, o.  Transcendentals on the full 4H vreg (EUP),
        # then lane-sliced.
        sig = jax.nn.sigmoid(gates)
        tnh = jnp.tanh(gates)
        c_new = sig[:, H:2 * H] * cs[l] + sig[:, 0:H] * tnh[:, 2 * H:3 * H]
        h_new = sig[:, 3 * H:4 * H] * jnp.tanh(c_new)
        new_hs.append(h_new)
        new_cs.append(c_new)
        inp = h_new

    logits = jnp.dot(inp.astype(cdt), wfc, preferred_element_type=jnp.float32) + bfc  # (B, O)

    # log_softmax over activity logits, log-sigmoid over the duration logit.
    acts_masked = jnp.where(is_dur, -jnp.inf, logits)
    m = jnp.max(acts_masked, axis=-1, keepdims=True)
    lse = m + jnp.log(jnp.sum(jnp.exp(acts_masked - m), axis=-1, keepdims=True))
    out_t = jnp.where(is_dur, _log_sigmoid(logits), logits - lse)

    if want_next:
        # pack(): greedy top-1 activity (carried as a one-hot for next step's fused
        # matmul) + sigmoid(duration).  Tie-break = first max index, on f32 logits.
        first = jnp.min(jnp.where(acts_masked == m, cols_o, O), axis=-1, keepdims=True)
        onehot_next = (cols_v == first).astype(jnp.float32)
        dur_next = jax.nn.sigmoid(logits[:, O - 1:O])
    else:
        onehot_next, dur_next = onehot, dur               # unused (final step)
    return out_t, onehot_next, dur_next, new_hs, new_cs


def _decoder_kernel(h0_ref, c0_ref, w0_ref, wcat_ref, b_ref, wfc_ref, bfc_ref,
                    out_ref, hN_ref, cN_ref, *, num_layers, max_length, sos):
    L, T = num_layers, max_length
    B = h0_ref.shape[0]
    H = h0_ref.shape[2]
    O = wfc_ref.shape[1]
    V = w0_ref.shape[0] - 1 - H          # activity vocab (input_size)

    # Weights are tiny; load them once for the whole unrolled decode.
    w0 = w0_ref[...]
    wcats = [wcat_ref[l] for l in range(L - 1)]
    bs = [b_ref[l] for l in range(L)]
    wfc = wfc_ref[...]
    bfc = bfc_ref[...]

    # Broadcast iotas hoisted out of the (unrolled) time loop.
    cols_o = lax.broadcasted_iota(jnp.int32, (B, O), 1)
    is_dur = cols_o == O - 1
    cols_v = lax.broadcasted_iota(jnp.int32, (B, V), 1)

    onehot = (cols_v == sos).astype(jnp.float32)          # SOS token, duration = 0
    dur = jnp.zeros((B, 1), jnp.float32)
    hs = [h0_ref[:, l, :] for l in range(L)]
    cs = [c0_ref[:, l, :] for l in range(L)]

    for t in range(T):                                    # fully unrolled: T is static
        out_t, onehot, dur, hs, cs = _decode_step(
            onehot, dur, hs, cs, w0, wcats, bs, wfc, bfc,
            cols_o, is_dur, cols_v, want_next=(t < T - 1))
        out_ref[:, t, :] = out_t                          # batch-first store

    for l in range(L):
        hN_ref[:, l, :] = hs[l]
        cN_ref[:, l, :] = cs[l]


def prepare_params(raw, compute_dtype=jnp.bfloat16):
    """Fuse/cast the module weights for the kernel.

    raw (float32, matching the torch module):
      emb : (input_size, H-1)  CustomDurationEmbeddingConcat embedding weight
      wih : (L, H, 4H)         lstm.weight_ih_l{l}.T
      whh : (L, H, 4H)         lstm.weight_hh_l{l}.T
      b   : (L, 1, 4H)         bias_ih + bias_hh
      wfc : (H, O), bfc: (1,O) fc.weight.T, fc.bias
    """
    emb, wih, whh, b = raw["emb"], raw["wih"], raw["whh"], raw["b"]
    L, H, H4 = wih.shape
    V = emb.shape[0]
    emb_pad = jnp.concatenate([emb, jnp.zeros((V, 1), jnp.float32)], axis=-1)   # (V, H)
    w_emb = emb_pad @ wih[0]                  # (V, 4H): embedding folded into layer-0 W_ih
    w_dur = wih[0][H - 1:H, :]                # (1, 4H): duration row of layer-0 W_ih
    w0 = jnp.concatenate([w_emb, w_dur, whh[0]], axis=0)                        # (V+1+H, 4H)
    if L > 1:
        wcat = jnp.stack([jnp.concatenate([wih[l], whh[l]], axis=0) for l in range(1, L)])
    else:
        wcat = jnp.zeros((1, 2 * H, H4), jnp.float32)     # unused placeholder
    return dict(w0=w0.astype(compute_dtype),
                wcat=wcat.astype(compute_dtype),
                b=b,
                wfc=raw["wfc"].astype(compute_dtype),
                bfc=raw["bfc"])


def _default_batch_shards(batch):
    # v7x has 2 TensorCores per chip: shard the (independent) batch across them.
    # On single-core chips (v5e/v6e) a >1 grid would only add per-iteration overhead.
    try:
        kind = jax.devices()[0].device_kind.lower()
    except Exception:
        return 1
    if ("v7" in kind or "tpu7" in kind) and batch % 2 == 0:
        return 2
    return 1


def schedule_decoder_forward(h0, c0, params, *, max_length, sos=0, batch_shards=None):
    """ScheduleDecoder.forward(batch_size, (h0, c0), target=None) with topk sampling.

    h0, c0: (num_layers, B, H) (torch layout).  Returns (log_prob_outputs (B, T, O),
    (hN, cN)) with hN/cN in (num_layers, B, H).
    """
    L, B, H = h0.shape
    O = params["wfc"].shape[1]
    T = max_length
    if batch_shards is None:
        batch_shards = _default_batch_shards(B)
    S = batch_shards
    assert B % S == 0, "batch_shards must divide the batch size"
    Bs = B // S

    # Batch-leading state layout inside the kernel so the (optional) batch grid only
    # blocks the leading dim (last-two block dims stay equal to the full array dims).
    h0_b = jnp.transpose(h0, (1, 0, 2))
    c0_b = jnp.transpose(c0, (1, 0, 2))

    kernel = functools.partial(_decoder_kernel, num_layers=L, max_length=T, sos=sos)

    batch_state_spec = pl.BlockSpec((Bs, L, H), lambda i: (i, 0, 0))

    def full_spec(shape):
        nd = len(shape)
        return pl.BlockSpec(shape, lambda i: (0,) * nd)

    out, hN_b, cN_b = pl.pallas_call(
        kernel,
        grid=(S,),
        in_specs=[
            batch_state_spec,                     # h0
            batch_state_spec,                     # c0
            full_spec(params["w0"].shape),
            full_spec(params["wcat"].shape),
            full_spec(params["b"].shape),
            full_spec(params["wfc"].shape),
            full_spec(params["bfc"].shape),
        ],
        out_specs=(
            pl.BlockSpec((Bs, T, O), lambda i: (i, 0, 0)),
            batch_state_spec,
            batch_state_spec,
        ),
        out_shape=(
            jax.ShapeDtypeStruct((B, T, O), jnp.float32),
            jax.ShapeDtypeStruct((B, L, H), jnp.float32),
            jax.ShapeDtypeStruct((B, L, H), jnp.float32),
        ),
        compiler_params=pltpu.CompilerParams(dimension_semantics=("parallel",)),
    )(h0_b, c0_b, params["w0"], params["wcat"], params["b"],
      params["wfc"], params["bfc"])

    hN = jnp.transpose(hN_b, (1, 0, 2))
    cN = jnp.transpose(cN_b, (1, 0, 2))
    return out, (hN, cN)


# ----------------------------- references (verification) -----------------------------

def reference_module_forward(h0, c0, raw, *, max_length, sos=0):
    """Faithful float32 re-implementation of the torch module (unfused weights)."""
    L, B, H = h0.shape
    emb, wih, whh, b = raw["emb"], raw["wih"], raw["whh"], raw["b"]
    wfc, bfc = raw["wfc"], raw["bfc"]
    O = wfc.shape[1]
    act = jnp.full((B,), sos, jnp.int32)
    dur = jnp.zeros((B, 1), jnp.float32)
    hs = [h0[l] for l in range(L)]
    cs = [c0[l] for l in range(L)]
    outs = []
    for _ in range(max_length):
        inp = jnp.concatenate([emb[act], dur], axis=-1)   # CustomDurationEmbeddingConcat
        for l in range(L):
            gates = inp @ wih[l] + hs[l] @ whh[l] + b[l]
            i_g = jax.nn.sigmoid(gates[:, 0 * H:1 * H])
            f_g = jax.nn.sigmoid(gates[:, 1 * H:2 * H])
            g_g = jnp.tanh(gates[:, 2 * H:3 * H])
            o_g = jax.nn.sigmoid(gates[:, 3 * H:4 * H])
            cs[l] = f_g * cs[l] + i_g * g_g
            hs[l] = o_g * jnp.tanh(cs[l])
            inp = hs[l]
        logits = inp @ wfc + bfc
        acts, d = logits[:, :O - 1], logits[:, O - 1:]
        outs.append(jnp.concatenate(
            [jax.nn.log_softmax(acts, axis=-1), _log_sigmoid(d)], axis=-1))
        act = jnp.argmax(acts, axis=-1).astype(jnp.int32)  # topk(1)
        dur = jax.nn.sigmoid(d)
    return jnp.stack(outs, axis=1), (jnp.stack(hs), jnp.stack(cs))


def reference_matched_forward(h0, c0, params, *, max_length, sos=0):
    """Pure-JAX mirror of the kernel's fused/bf16 math (shares _decode_step)."""
    L, B, H = h0.shape
    w0, wcat, b = params["w0"], params["wcat"], params["b"]
    wfc, bfc = params["wfc"], params["bfc"]
    O = wfc.shape[1]
    V = w0.shape[0] - 1 - H
    wcats = [wcat[l] for l in range(L - 1)]
    bs = [b[l] for l in range(L)]
    cols_o = lax.broadcasted_iota(jnp.int32, (B, O), 1)
    is_dur = cols_o == O - 1
    cols_v = lax.broadcasted_iota(jnp.int32, (B, V), 1)
    onehot = (cols_v == sos).astype(jnp.float32)
    dur = jnp.zeros((B, 1), jnp.float32)
    hs = [h0[l] for l in range(L)]
    cs = [c0[l] for l in range(L)]
    outs = []
    for _ in range(max_length):
        out_t, onehot, dur, hs, cs = _decode_step(
            onehot, dur, hs, cs, w0, wcats, bs, wfc, bfc, cols_o, is_dur, cols_v)
        outs.append(out_t)
    return jnp.stack(outs, axis=1), (jnp.stack(hs), jnp.stack(cs))


def init_raw_params(key, input_size, hidden_size, output_size, num_layers):
    """Deterministic synthetic parameters (shapes match the torch module)."""
    H = hidden_size
    ks = jax.random.split(key, 6)
    s = 0.2
    return dict(
        emb=jax.random.normal(ks[0], (input_size, H - 1), jnp.float32) * s,
        wih=jax.random.normal(ks[1], (num_layers, H, 4 * H), jnp.float32) * s,
        whh=jax.random.normal(ks[2], (num_layers, H, 4 * H), jnp.float32) * s,
        b=jax.random.normal(ks[3], (num_layers, 1, 4 * H), jnp.float32) * s,
        wfc=jax.random.normal(ks[4], (H, output_size), jnp.float32) * s,
        bfc=jax.random.normal(ks[5], (1, output_size), jnp.float32) * s,
    )


if __name__ == "__main__":
    input_size = 7        # number of activity classes (embedding vocab)
    hidden_size = 32
    output_size = 8       # 7 activity logits + 1 duration
    num_layers = 2
    max_length = 8
    batch = 2
    sos = 0

    key = jax.random.PRNGKey(0)
    kp, kh, kc = jax.random.split(key, 3)
    raw = init_raw_params(kp, input_size, hidden_size, output_size, num_layers)
    h0 = jax.random.normal(kh, (num_layers, batch, hidden_size), jnp.float32) * 0.5
    c0 = jax.random.normal(kc, (num_layers, batch, hidden_size), jnp.float32) * 0.5

    # --- semantic check: f32 kernel (same fused structure) vs faithful module reference.
    params_f32 = prepare_params(raw, compute_dtype=jnp.float32)
    out32, (h32, c32) = schedule_decoder_forward(
        h0, c0, params_f32, max_length=max_length, sos=sos)
    jax.block_until_ready((out32, h32, c32))
    ref_out, (ref_h, ref_c) = reference_module_forward(
        h0, c0, raw, max_length=max_length, sos=sos)
    np.testing.assert_allclose(np.asarray(out32), np.asarray(ref_out), atol=1e-2, rtol=1e-2)
    np.testing.assert_allclose(np.asarray(h32), np.asarray(ref_h), atol=1e-2, rtol=1e-2)
    np.testing.assert_allclose(np.asarray(c32), np.asarray(ref_c), atol=1e-2, rtol=1e-2)

    # --- perf path: bf16 MXU operands; checked against the numerics-matched reference.
    params_bf16 = prepare_params(raw, compute_dtype=jnp.bfloat16)
    log_probs, (hN, cN) = schedule_decoder_forward(
        h0, c0, params_bf16, max_length=max_length, sos=sos)
    jax.block_until_ready((log_probs, hN, cN))
    ref_m_out, (ref_m_h, ref_m_c) = reference_matched_forward(
        h0, c0, params_bf16, max_length=max_length, sos=sos)
    np.testing.assert_allclose(np.asarray(log_probs), np.asarray(ref_m_out), atol=2e-2, rtol=2e-2)
    np.testing.assert_allclose(np.asarray(hN), np.asarray(ref_m_h), atol=2e-2, rtol=2e-2)
    np.testing.assert_allclose(np.asarray(cN), np.asarray(ref_m_c), atol=2e-2, rtol=2e-2)

    # TODO(synk): teacher-forcing (target != None) and multinomial sampling paths are not implemented; kernel covers the default target=None / topk generation path (dropout=0, eval mode).
    print("KERNEL_OK")
</pallas_src>

<mosaic_0001>
module attributes {stable_mosaic.version = 11 : i64} {
  func.func @_decoder_kernel(%arg0: i32, %arg1: memref<2x2x32xf32, #tpu.memory_space<vmem>>, %arg2: memref<2x2x32xf32, #tpu.memory_space<vmem>>, %arg3: memref<40x128xf32, #tpu.memory_space<vmem>>, %arg4: memref<1x64x128xf32, #tpu.memory_space<vmem>>, %arg5: memref<2x1x128xf32, #tpu.memory_space<vmem>>, %arg6: memref<32x8xf32, #tpu.memory_space<vmem>>, %arg7: memref<1x8xf32, #tpu.memory_space<vmem>>, %arg8: memref<2x8x8xf32, #tpu.memory_space<vmem>>, %arg9: memref<2x2x32xf32, #tpu.memory_space<vmem>>, %arg10: memref<2x2x32xf32, #tpu.memory_space<vmem>>) attributes {dimension_semantics = [#tpu.dimension_semantics<parallel>], iteration_bounds = array<i64: 1>, scalar_prefetch = 0 : i64, scratch_operands = 0 : i64, tpu.core_type = #tpu.core_type<tc>, window_params = [{transform_indices = @transform_0, window_bounds = array<i64: 2, 2, 32>}, {transform_indices = @transform_1, window_bounds = array<i64: 2, 2, 32>}, {pipeline_mode = #tpu.pipeline_mode<synchronous>, transform_indices = @transform_2, window_bounds = array<i64: 40, 128>}, {pipeline_mode = #tpu.pipeline_mode<synchronous>, transform_indices = @transform_3, window_bounds = array<i64: 1, 64, 128>}, {pipeline_mode = #tpu.pipeline_mode<synchronous>, transform_indices = @transform_4, window_bounds = array<i64: 2, 1, 128>}, {pipeline_mode = #tpu.pipeline_mode<synchronous>, transform_indices = @transform_5, window_bounds = array<i64: 32, 8>}, {pipeline_mode = #tpu.pipeline_mode<synchronous>, transform_indices = @transform_6, window_bounds = array<i64: 1, 8>}, {transform_indices = @transform_7, window_bounds = array<i64: 2, 8, 8>}, {transform_indices = @transform_8, window_bounds = array<i64: 2, 2, 32>}, {transform_indices = @transform_9, window_bounds = array<i64: 2, 2, 32>}]} {
    %c0 = arith.constant 0 : index
    %c0_0 = arith.constant 0 : index
    %0 = vector.load %arg3[%c0, %c0_0] : memref<40x128xf32, #tpu.memory_space<vmem>>, vector<40x128xf32>
    %c0_1 = arith.constant 0 : index
    %c0_2 = arith.constant 0 : index
    %c0_3 = arith.constant 0 : index
    %1 = vector.load %arg4[%c0_1, %c0_2, %c0_3] : memref<1x64x128xf32, #tpu.memory_space<vmem>>, vector<1x64x128xf32>
    %2 = vector.shape_cast %1 : vector<1x64x128xf32> to vector<64x128xf32>
    %c0_4 = arith.constant 0 : index
    %c0_5 = arith.constant 0 : index
    %c0_6 = arith.constant 0 : index
    %3 = vector.load %arg5[%c0_4, %c0_5, %c0_6] : memref<2x1x128xf32, #tpu.memory_space<vmem>>, vector<1x1x128xf32>
    %4 = vector.shape_cast %3 : vector<1x1x128xf32> to vector<1x128xf32>
    %c1 = arith.constant 1 : index
    %c0_7 = arith.constant 0 : index
    %c0_8 = arith.constant 0 : index
    %5 = vector.load %arg5[%c1, %c0_7, %c0_8] : memref<2x1x128xf32, #tpu.memory_space<vmem>>, vector<1x1x128xf32>
    %6 = vector.shape_cast %5 : vector<1x1x128xf32> to vector<1x128xf32>
    %c0_9 = arith.constant 0 : index
    %c0_10 = arith.constant 0 : index
    %7 = vector.load %arg6[%c0_9, %c0_10] : memref<32x8xf32, #tpu.memory_space<vmem>>, vector<32x8xf32>
    %c0_11 = arith.constant 0 : index
    %c0_12 = arith.constant 0 : index
    %8 = vector.load %arg7[%c0_11, %c0_12] : memref<1x8xf32, #tpu.memory_space<vmem>>, vector<1x8xf32>
    %9 = tpu.iota {dimensions = array<i32: 1>} : vector<2x8xi32>
    %c7_i32 = arith.constant 7 : i32
    %10 = vector.broadcast %c7_i32 : i32 to vector<2x8xi32>
    %11 = arith.cmpi eq, %9, %10 : vector<2x8xi32>
    %12 = tpu.iota {dimensions = array<i32: 1>} : vector<2x7xi32>
    %c0_i32 = arith.constant 0 : i32
    %13 = vector.broadcast %c0_i32 : i32 to vector<2x7xi32>
    %14 = arith.cmpi eq, %12, %13 : vector<2x7xi32>
    %15 = arith.extui %14 : vector<2x7xi1> to vector<2x7xi32>
    %16 = arith.sitofp %15 : vector<2x7xi32> to vector<2x7xf32>
    %cst = arith.constant 0.000000e+00 : f32
    %17 = vector.broadcast %cst : f32 to vector<2x1xf32>
    %c0_13 = arith.constant 0 : index
    %c0_14 = arith.constant 0 : index
    %c0_15 = arith.constant 0 : index
    %18 = vector.load %arg1[%c0_13, %c0_14, %c0_15] : memref<2x2x32xf32, #tpu.memory_space<vmem>>, vector<2x1x32xf32>
    %19 = vector.shape_cast %18 : vector<2x1x32xf32> to vector<2x32xf32>
    %c0_16 = arith.constant 0 : index
    %c1_17 = arith.constant 1 : index
    %c0_18 = arith.constant 0 : index
    %20 = vector.load %arg1[%c0_16, %c1_17, %c0_18] : memref<2x2x32xf32, #tpu.memory_space<vmem>>, vector<2x1x32xf32>
    %21 = vector.shape_cast %20 : vector<2x1x32xf32> to vector<2x32xf32>
    %c0_19 = arith.constant 0 : index
    %c0_20 = arith.constant 0 : index
    %c0_21 = arith.constant 0 : index
    %22 = vector.load %arg2[%c0_19, %c0_20, %c0_21] : memref<2x2x32xf32, #tpu.memory_space<vmem>>, vector<2x1x32xf32>
    %23 = vector.shape_cast %22 : vector<2x1x32xf32> to vector<2x32xf32>
    %c0_22 = arith.constant 0 : index
    %c1_23 = arith.constant 1 : index
    %c0_24 = arith.constant 0 : index
    %24 = vector.load %arg2[%c0_22, %c1_23, %c0_24] : memref<2x2x32xf32, #tpu.memory_space<vmem>>, vector<2x1x32xf32>
    %25 = vector.shape_cast %24 : vector<2x1x32xf32> to vector<2x32xf32>
    %26 = tpu.concatenate %16, %17, %19 in 1 : vector<2x7xf32>, vector<2x1xf32>, vector<2x32xf32> -> vector<2x40xf32>
    %cst_25 = arith.constant dense<0.000000e+00> : vector<2x128xf32>
    %27 = tpu.matmul %26, %0, %cst_25 {dimension_numbers = #tpu.dot_dimension_numbers<[1], [0], [0], [1], [0, 0, 1, 1], [], []>} : vector<2x40xf32>, vector<40x128xf32>, vector<2x128xf32> -> vector<2x128xf32>
    %28 = vector.broadcast %4 : vector<1x128xf32> to vector<2x128xf32>
    %29 = arith.addf %27, %28 : vector<2x128xf32>
    %30 = arith.negf %29 : vector<2x128xf32>
    %31 = math.exp %30 : vector<2x128xf32>
    %cst_26 = arith.constant 1.000000e+00 : f32
    %32 = vector.broadcast %cst_26 : f32 to vector<2x128xf32>
    %33 = arith.addf %32, %31 : vector<2x128xf32>
    %34 = arith.divf %32, %33 : vector<2x128xf32>
    %35 = math.tanh %29 : vector<2x128xf32>
    %36 = vector.extract_strided_slice %34 {offsets = [0, 32], sizes = [2, 32], strides = [1, 1]} : vector<2x128xf32> to vector<2x32xf32>
    %37 = arith.mulf %36, %23 : vector<2x32xf32>
    %38 = vector.extract_strided_slice %34 {offsets = [0, 0], sizes = [2, 32], strides = [1, 1]} : vector<2x128xf32> to vector<2x32xf32>
    %39 = vector.extract_strided_slice %35 {offsets = [0, 64], sizes = [2, 32], strides = [1, 1]} : vector<2x128xf32> to vector<2x32xf32>
    %40 = arith.mulf %38, %39 : vector<2x32xf32>
    %41 = arith.addf %37, %40 : vector<2x32xf32>
    %42 = vector.extract_strided_slice %34 {offsets = [0, 96], sizes = [2, 32], strides = [1, 1]} : vector<2x128xf32> to vector<2x32xf32>
    %43 = math.tanh %41 : vector<2x32xf32>
    %44 = arith.mulf %42, %43 : vector<2x32xf32>
    %45 = tpu.concatenate %44, %21 in 1 : vector<2x32xf32>, vector<2x32xf32> -> vector<2x64xf32>
    %cst_27 = arith.constant dense<0.000000e+00> : vector<2x128xf32>
    %46 = tpu.matmul %45, %2, %cst_27 {dimension_numbers = #tpu.dot_dimension_numbers<[1], [0], [0], [1], [0, 0, 1, 1], [], []>} : vector<2x64xf32>, vector<64x128xf32>, vector<2x128xf32> -> vector<2x128xf32>
    %47 = vector.broadcast %6 : vector<1x128xf32> to vector<2x128xf32>
    %48 = arith.addf %46, %47 : vector<2x128xf32>
    %49 = arith.negf %48 : vector<2x128xf32>
    %50 = math.exp %49 : vector<2x128xf32>
    %cst_28 = arith.constant 1.000000e+00 : f32
    %51 = vector.broadcast %cst_28 : f32 to vector<2x128xf32>
    %52 = arith.addf %51, %50 : vector<2x128xf32>
    %53 = arith.divf %51, %52 : vector<2x128xf32>
    %54 = math.tanh %48 : vector<2x128xf32>
    %55 = vector.extract_strided_slice %53 {offsets = [0, 32], sizes = [2, 32], strides = [1, 1]} : vector<2x128xf32> to vector<2x32xf32>
    %56 = arith.mulf %55, %25 : vector<2x32xf32>
    %57 = vector.extract_strided_slice %53 {offsets = [0, 0], sizes = [2, 32], strides = [1, 1]} : vector<2x128xf32> to vector<2x32xf32>
    %58 = vector.extract_strided_slice %54 {offsets = [0, 64], sizes = [2, 32], strides = [1, 1]} : vector<2x128xf32> to vector<2x32xf32>
    %59 = arith.mulf %57, %58 : vector<2x32xf32>
    %60 = arith.addf %56, %59 : vector<2x32xf32>
    %61 = vector.extract_strided_slice %53 {offsets = [0, 96], sizes = [2, 32], strides = [1, 1]} : vector<2x128xf32> to vector<2x32xf32>
    %62 = math.tanh %60 : vector<2x32xf32>
    %63 = arith.mulf %61, %62 : vector<2x32xf32>
    %cst_29 = arith.constant dense<0.000000e+00> : vector<2x8xf32>
    %64 = tpu.matmul %63, %7, %cst_29 {dimension_numbers = #tpu.dot_dimension_numbers<[1], [0], [0], [1], [0, 0, 1, 1], [], []>} : vector<2x32xf32>, vector<32x8xf32>, vector<2x8xf32> -> vector<2x8xf32>
    %65 = vector.broadcast %8 : vector<1x8xf32> to vector<2x8xf32>
    %66 = arith.addf %64, %65 : vector<2x8xf32>
    %cst_30 = arith.constant 0xFF800000 : f32
    %67 = vector.broadcast %cst_30 : f32 to vector<2x8xf32>
    %68 = arith.select %11, %67, %66 : vector<2x8xi1>, vector<2x8xf32>
    %cst_31 = arith.constant dense<0xFF800000> : vector<2xf32>
    %69 = vector.multi_reduction <maximumf>, %68, %cst_31 [1] : vector<2x8xf32> to vector<2xf32>
    %70 = vector.shape_cast %69 : vector<2xf32> to vector<2x1xf32>
    %71 = vector.broadcast %70 : vector<2x1xf32> to vector<2x8xf32>
    %72 = arith.subf %68, %71 : vector<2x8xf32>
    %73 = math.exp %72 : vector<2x8xf32>
    %cst_32 = arith.constant dense<0.000000e+00> : vector<2xf32>
    %74 = vector.multi_reduction <add>, %73, %cst_32 [1] : vector<2x8xf32> to vector<2xf32>
    %75 = vector.shape_cast %74 : vector<2xf32> to vector<2x1xf32>
    %76 = math.log %75 : vector<2x1xf32>
    %77 = arith.addf %70, %76 : vector<2x1xf32>
    %cst_33 = arith.constant 0.000000e+00 : f32
    %78 = vector.broadcast %cst_33 : f32 to vector<2x8xf32>
    %79 = arith.minimumf %66, %78 : vector<2x8xf32>
    %80 = math.absf %66 : vector<2x8xf32>
    %cst_34 = arith.constant 0.000000e+00 : f32
    %81 = vector.broadcast %cst_34 : f32 to vector<2x8xf32>
    %82 = arith.subf %81, %80 : vector<2x8xf32>
    %83 = math.exp %82 : vector<2x8xf32>
    %cst_35 = arith.constant 1.000000e+00 : f32
    %84 = vector.broadcast %cst_35 : f32 to vector<2x8xf32>
    %85 = arith.addf %84, %83 : vector<2x8xf32>
    %86 = math.log %85 : vector<2x8xf32>
    %87 = arith.subf %79, %86 : vector<2x8xf32>
    %88 = vector.broadcast %77 : vector<2x1xf32> to vector<2x8xf32>
    %89 = arith.subf %66, %88 : vector<2x8xf32>
    %90 = arith.select %11, %87, %89 : vector<2x8xi1>, vector<2x8xf32>
    %91 = vector.broadcast %70 : vector<2x1xf32> to vector<2x8xf32>
    %92 = arith.cmpf oeq, %68, %91 : vector<2x8xf32>
    %c8_i32 = arith.constant 8 : i32
    %93 = vector.broadcast %c8_i32 : i32 to vector<2x8xi32>
    %94 = arith.select %92, %9, %93 : vector<2x8xi1>, vector<2x8xi32>
    %cst_36 = arith.constant dense<2147483647> : vector<2xi32>
    %95 = vector.multi_reduction <minsi>, %94, %cst_36 [1] : vector<2x8xi32> to vector<2xi32>
    %96 = vector.shape_cast %95 : vector<2xi32> to vector<2x1xi32>
    %97 = vector.broadcast %96 : vector<2x1xi32> to vector<2x7xi32>
    %98 = arith.cmpi eq, %12, %97 : vector<2x7xi32>
    %99 = arith.extui %98 : vector<2x7xi1> to vector<2x7xi32>
    %100 = arith.sitofp %99 : vector<2x7xi32> to vector<2x7xf32>
    %101 = vector.extract_strided_slice %66 {offsets = [0, 7], sizes = [2, 1], strides = [1, 1]} : vector<2x8xf32> to vector<2x1xf32>
    %102 = arith.negf %101 : vector<2x1xf32>
    %103 = math.exp %102 : vector<2x1xf32>
    %cst_37 = arith.constant 1.000000e+00 : f32
    %104 = vector.broadcast %cst_37 : f32 to vector<2x1xf32>
    %105 = arith.addf %104, %103 : vector<2x1xf32>
    %106 = arith.divf %104, %105 : vector<2x1xf32>
    %c0_38 = arith.constant 0 : index
    %c0_39 = arith.constant 0 : index
    %c0_40 = arith.constant 0 : index
    %107 = vector.load %arg8[%c0_38, %c0_39, %c0_40] : memref<2x8x8xf32, #tpu.memory_space<vmem>>, vector<2x1x8xf32>
    %108 = vector.shape_cast %107 : vector<2x1x8xf32> to vector<2x8xf32>
    %109 = vector.shape_cast %90 : vector<2x8xf32> to vector<2x1x8xf32>
    tpu.vector_store %arg8[%c0_38, %c0_39, %c0_40], %109 {strides = array<i32>} : memref<2x8x8xf32, #tpu.memory_space<vmem>>, vector<2x1x8xf32>,
    %110 = tpu.concatenate %100, %106, %44 in 1 : vector<2x7xf32>, vector<2x1xf32>, vector<2x32xf32> -> vector<2x40xf32>
    %cst_41 = arith.constant dense<0.000000e+00> : vector<2x128xf32>
    %111 = tpu.matmul %110, %0, %cst_41 {dimension_numbers = #tpu.dot_dimension_numbers<[1], [0], [0], [1], [0, 0, 1, 1], [], []>} : vector<2x40xf32>, vector<40x128xf32>, vector<2x128xf32> -> vector<2x128xf32>
    %112 = vector.broadcast %4 : vector<1x128xf32> to vector<2x128xf32>
    %113 = arith.addf %111, %112 : vector<2x128xf32>
    %114 = arith.negf %113 : vector<2x128xf32>
    %115 = math.exp %114 : vector<2x128xf32>
    %cst_42 = arith.constant 1.000000e+00 : f32
    %116 = vector.broadcast %cst_42 : f32 to vector<2x128xf32>
    %117 = arith.addf %116, %115 : vector<2x128xf32>
    %118 = arith.divf %116, %117 : vector<2x128xf32>
    %119 = math.tanh %113 : vector<2x128xf32>
    %120 = vector.extract_strided_slice %118 {offsets = [0, 32], sizes = [2, 32], strides = [1, 1]} : vector<2x128xf32> to vector<2x32xf32>
    %121 = arith.mulf %120, %41 : vector<2x32xf32>
    %122 = vector.extract_strided_slice %118 {offsets = [0, 0], sizes = [2, 32], strides = [1, 1]} : vector<2x128xf32> to vector<2x32xf32>
    %123 = vector.extract_strided_slice %119 {offsets = [0, 64], sizes = [2, 32], strides = [1, 1]} : vector<2x128xf32> to vector<2x32xf32>
    %124 = arith.mulf %122, %123 : vector<2x32xf32>
    %125 = arith.addf %121, %124 : vector<2x32xf32>
    %126 = vector.extract_strided_slice %118 {offsets = [0, 96], sizes = [2, 32], strides = [1, 1]} : vector<2x128xf32> to vector<2x32xf32>
    %127 = math.tanh %125 : vector<2x32xf32>
    %128 = arith.mulf %126, %127 : vector<2x32xf32>
    %129 = tpu.concatenate %128, %63 in 1 : vector<2x32xf32>, vector<2x32xf32> -> vector<2x64xf32>
    %cst_43 = arith.constant dense<0.000000e+00> : vector<2x128xf32>
    %130 = tpu.matmul %129, %2, %cst_43 {dimension_numbers = #tpu.dot_dimension_numbers<[1], [0], [0], [1], [0, 0, 1, 1], [], []>} : vector<2x64xf32>, vector<64x128xf32>, vector<2x128xf32> -> vector<2x128xf32>
    %131 = vector.broadcast %6 : vector<1x128xf32> to vector<2x128xf32>
    %132 = arith.addf %130, %131 : vector<2x128xf32>
    %133 = arith.negf %132 : vector<2x128xf32>
    %134 = math.exp %133 : vector<2x128xf32>
    %cst_44 = arith.constant 1.000000e+00 : f32
    %135 = vector.broadcast %cst_44 : f32 to vector<2x128xf32>
    %136 = arith.addf %135, %134 : vector<2x128xf32>
    %137 = arith.divf %135, %136 : vector<2x128xf32>
    %138 = math.tanh %132 : vector<2x128xf32>
    %139 = vector.extract_strided_slice %137 {offsets = [0, 32], sizes = [2, 32], strides = [1, 1]} : vector<2x128xf32> to vector<2x32xf32>
    %140 = arith.mulf %139, %60 : vector<2x32xf32>
    %141 = vector.extract_strided_slice %137 {offsets = [0, 0], sizes = [2, 32], strides = [1, 1]} : vector<2x128xf32> to vector<2x32xf32>
    %142 = vector.extract_strided_slice %138 {offsets = [0, 64], sizes = [2, 32], strides = [1, 1]} : vector<2x128xf32> to vector<2x32xf32>
    %143 = arith.mulf %141, %142 : vector<2x32xf32>
    %144 = arith.addf %140, %143 : vector<2x32xf32>
    %145 = vector.extract_strided_slice %137 {offsets = [0, 96], sizes = [2, 32], strides = [1, 1]} : vector<2x128xf32> to vector<2x32xf32>
    %146 = math.tanh %144 : vector<2x32xf32>
    %147 = arith.mulf %145, %146 : vector<2x32xf32>
    %cst_45 = arith.constant dense<0.000000e+00> : vector<2x8xf32>
    %148 = tpu.matmul %147, %7, %cst_45 {dimension_numbers = #tpu.dot_dimension_numbers<[1], [0], [0], [1], [0, 0, 1, 1], [], []>} : vector<2x32xf32>, vector<32x8xf32>, vector<2x8xf32> -> vector<2x8xf32>
    %149 = vector.broadcast %8 : vector<1x8xf32> to vector<2x8xf32>
    %150 = arith.addf %148, %149 : vector<2x8xf32>
    %cst_46 = arith.constant 0xFF800000 : f32
    %151 = vector.broadcast %cst_46 : f32 to vector<2x8xf32>
    %152 = arith.select %11, %151, %150 : vector<2x8xi1>, vector<2x8xf32>
    %cst_47 = arith.constant dense<0xFF800000> : vector<2xf32>
    %153 = vector.multi_reduction <maximumf>, %152, %cst_47 [1] : vector<2x8xf32> to vector<2xf32>
    %154 = vector.shape_cast %153 : vector<2xf32> to vector<2x1xf32>
    %155 = vector.broadcast %154 : vector<2x1xf32> to vector<2x8xf32>
    %156 = arith.subf %152, %155 : vector<2x8xf32>
    %157 = math.exp %156 : vector<2x8xf32>
    %cst_48 = arith.constant dense<0.000000e+00> : vector<2xf32>
    %158 = vector.multi_reduction <add>, %157, %cst_48 [1] : vector<2x8xf32> to vector<2xf32>
    %159 = vector.shape_cast %158 : vector<2xf32> to vector<2x1xf32>
    %160 = math.log %159 : vector<2x1xf32>
    %161 = arith.addf %154, %160 : vector<2x1xf32>
    %cst_49 = arith.constant 0.000000e+00 : f32
    %162 = vector.broadcast %cst_49 : f32 to vector<2x8xf32>
    %163 = arith.minimumf %150, %162 : vector<2x8xf32>
    %164 = math.absf %150 : vector<2x8xf32>
    %cst_50 = arith.constant 0.000000e+00 : f32
    %165 = vector.broadcast %cst_50 : f32 to vector<2x8xf32>
    %166 = arith.subf %165, %164 : vector<2x8xf32>
    %167 = math.exp %166 : vector<2x8xf32>
    %cst_51 = arith.constant 1.000000e+00 : f32
    %168 = vector.broadcast %cst_51 : f32 to vector<2x8xf32>
    %169 = arith.addf %168, %167 : vector<2x8xf32>
    %170 = math.log %169 : vector<2x8xf32>
    %171 = arith.subf %163, %170 : vector<2x8xf32>
    %172 = vector.broadcast %161 : vector<2x1xf32> to vector<2x8xf32>
    %173 = arith.subf %150, %172 : vector<2x8xf32>
    %174 = arith.select %11, %171, %173 : vector<2x8xi1>, vector<2x8xf32>
    %175 = vector.broadcast %154 : vector<2x1xf32> to vector<2x8xf32>
    %176 = arith.cmpf oeq, %152, %175 : vector<2x8xf32>
    %c8_i32_52 = arith.constant 8 : i32
    %177 = vector.broadcast %c8_i32_52 : i32 to vector<2x8xi32>
    %178 = arith.select %176, %9, %177 : vector<2x8xi1>, vector<2x8xi32>
    %cst_53 = arith.constant dense<2147483647> : vector<2xi32>
    %179 = vector.multi_reduction <minsi>, %178, %cst_53 [1] : vector<2x8xi32> to vector<2xi32>
    %180 = vector.shape_cast %179 : vector<2xi32> to vector<2x1xi32>
    %181 = vector.broadcast %180 : vector<2x1xi32> to vector<2x7xi32>
    %182 = arith.cmpi eq, %12, %181 : vector<2x7xi32>
    %183 = arith.extui %182 : vector<2x7xi1> to vector<2x7xi32>
    %184 = arith.sitofp %183 : vector<2x7xi32> to vector<2x7xf32>
    %185 = vector.extract_strided_slice %150 {offsets = [0, 7], sizes = [2, 1], strides = [1, 1]} : vector<2x8xf32> to vector<2x1xf32>
    %186 = arith.negf %185 : vector<2x1xf32>
    %187 = math.exp %186 : vector<2x1xf32>
    %cst_54 = arith.constant 1.000000e+00 : f32
    %188 = vector.broadcast %cst_54 : f32 to vector<2x1xf32>
    %189 = arith.addf %188, %187 : vector<2x1xf32>
    %190 = arith.divf %188, %189 : vector<2x1xf32>
    %c0_55 = arith.constant 0 : index
    %c1_56 = arith.constant 1 : index
    %c0_57 = arith.constant 0 : index
    %191 = vector.load %arg8[%c0_55, %c1_56, %c0_57] : memref<2x8x8xf32, #tpu.memory_space<vmem>>, vector<2x1x8xf32>
    %192 = vector.shape_cast %191 : vector<2x1x8xf32> to vector<2x8xf32>
    %193 = vector.shape_cast %174 : vector<2x8xf32> to vector<2x1x8xf32>
    tpu.vector_store %arg8[%c0_55, %c1_56, %c0_57], %193 {strides = array<i32>} : memref<2x8x8xf32, #tpu.memory_space<vmem>>, vector<2x1x8xf32>,
    %194 = tpu.concatenate %184, %190, %128 in 1 : vector<2x7xf32>, vector<2x1xf32>, vector<2x32xf32> -> vector<2x40xf32>
    %cst_58 = arith.constant dense<0.000000e+00> : vector<2x128xf32>
    %195 = tpu.matmul %194, %0, %cst_58 {dimension_numbers = #tpu.dot_dimension_numbers<[1], [0], [0], [1], [0, 0, 1, 1], [], []>} : vector<2x40xf32>, vector<40x128xf32>, vector<2x128xf32> -> vector<2x128xf32>
    %196 = vector.broadcast %4 : vector<1x128xf32> to vector<2x128xf32>
    %197 = arith.addf %195, %196 : vector<2x128xf32>
    %198 = arith.negf %197 : vector<2x128xf32>
    %199 = math.exp %198 : vector<2x128xf32>
    %cst_59 = arith.constant 1.000000e+00 : f32
    %200 = vector.broadcast %cst_59 : f32 to vector<2x128xf32>
    %201 = arith.addf %200, %199 : vector<2x128xf32>
    %202 = arith.divf %200, %201 : vector<2x128xf32>
    %203 = math.tanh %197 : vector<2x128xf32>
    %204 = vector.extract_strided_slice %202 {offsets = [0, 32], sizes = [2, 32], strides = [1, 1]} : vector<2x128xf32> to vector<2x32xf32>
    %205 = arith.mulf %204, %125 : vector<2x32xf32>
    %206 = vector.extract_strided_slice %202 {offsets = [0, 0], sizes = [2, 32], strides = [1, 1]} : vector<2x128xf32> to vector<2x32xf32>
    %207 = vector.extract_strided_slice %203 {offsets = [0, 64], sizes = [2, 32], strides = [1, 1]} : vector<2x128xf32> to vector<2x32xf32>
    %208 = arith.mulf %206, %207 : vector<2x32xf32>
    %209 = arith.addf %205, %208 : vector<2x32xf32>
    %210 = vector.extract_strided_slice %202 {offsets = [0, 96], sizes = [2, 32], strides = [1, 1]} : vector<2x128xf32> to vector<2x32xf32>
    %211 = math.tanh %209 : vector<2x32xf32>
    %212 = arith.mulf %210, %211 : vector<2x32xf32>
    %213 = tpu.concatenate %212, %147 in 1 : vector<2x32xf32>, vector<2x32xf32> -> vector<2x64xf32>
    %cst_60 = arith.constant dense<0.000000e+00> : vector<2x128xf32>
    %214 = tpu.matmul %213, %2, %cst_60 {dimension_numbers = #tpu.dot_dimension_numbers<[1], [0], [0], [1], [0, 0, 1, 1], [], []>} : vector<2x64xf32>, vector<64x128xf32>, vector<2x128xf32> -> vector<2x128xf32>
    %215 = vector.broadcast %6 : vector<1x128xf32> to vector<2x128xf32>
    %216 = arith.addf %214, %215 : vector<2x128xf32>
    %217 = arith.negf %216 : vector<2x128xf32>
    %218 = math.exp %217 : vector<2x128xf32>
    %cst_61 = arith.constant 1.000000e+00 : f32
    %219 = vector.broadcast %cst_61 : f32 to vector<2x128xf32>
    %220 = arith.addf %219, %218 : vector<2x128xf32>
    %221 = arith.divf %219, %220 : vector<2x128xf32>
    %222 = math.tanh %216 : vector<2x128xf32>
    %223 = vector.extract_strided_slice %221 {offsets = [0, 32], sizes = [2, 32], strides = [1, 1]} : vector<2x128xf32> to vector<2x32xf32>
    %224 = arith.mulf %223, %144 : vector<2x32xf32>
    %225 = vector.extract_strided_slice %221 {offsets = [0, 0], sizes = [2, 32], strides = [1, 1]} : vector<2x128xf32> to vector<2x32xf32>
    %226 = vector.extract_strided_slice %222 {offsets = [0, 64], sizes = [2, 32], strides = [1, 1]} : vector<2x128xf32> to vector<2x32xf32>
    %227 = arith.mulf %225, %226 : vector<2x32xf32>
    %228 = arith.addf %224, %227 : vector<2x32xf32>
    %229 = vector.extract_strided_slice %221 {offsets = [0, 96], sizes = [2, 32], strides = [1, 1]} : vector<2x128xf32> to vector<2x32xf32>
    %230 = math.tanh %228 : vector<2x32xf32>
    %231 = arith.mulf %229, %230 : vector<2x32xf32>
    %cst_62 = arith.constant dense<0.000000e+00> : vector<2x8xf32>
    %232 = tpu.matmul %231, %7, %cst_62 {dimension_numbers = #tpu.dot_dimension_numbers<[1], [0], [0], [1], [0, 0, 1, 1], [], []>} : vector<2x32xf32>, vector<32x8xf32>, vector<2x8xf32> -> vector<2x8xf32>
    %233 = vector.broadcast %8 : vector<1x8xf32> to vector<2x8xf32>
    %234 = arith.addf %232, %233 : vector<2x8xf32>
    %cst_63 = arith.constant 0xFF800000 : f32
    %235 = vector.broadcast %cst_63 : f32 to vector<2x8xf32>
    %236 = arith.select %11, %235, %234 : vector<2x8xi1>, vector<2x8xf32>
    %cst_64 = arith.constant dense<0xFF800000> : vector<2xf32>
    %237 = vector.multi_reduction <maximumf>, %236, %cst_64 [1] : vector<2x8xf32> to vector<2xf32>
    %238 = vector.shape_cast %237 : vector<2xf32> to vector<2x1xf32>
    %239 = vector.broadcast %238 : vector<2x1xf32> to vector<2x8xf32>
    %240 = arith.subf %236, %239 : vector<2x8xf32>
    %241 = math.exp %240 : vector<2x8xf32>
    %cst_65 = arith.constant dense<0.000000e+00> : vector<2xf32>
    %242 = vector.multi_reduction <add>, %241, %cst_65 [1] : vector<2x8xf32> to vector<2xf32>
    %243 = vector.shape_cast %242 : vector<2xf32> to vector<2x1xf32>
    %244 = math.log %243 : vector<2x1xf32>
    %245 = arith.addf %238, %244 : vector<2x1xf32>
    %cst_66 = arith.constant 0.000000e+00 : f32
    %246 = vector.broadcast %cst_66 : f32 to vector<2x8xf32>
    %247 = arith.minimumf %234, %246 : vector<2x8xf32>
    %248 = math.absf %234 : vector<2x8xf32>
    %cst_67 = arith.constant 0.000000e+00 : f32
    %249 = vector.broadcast %cst_67 : f32 to vector<2x8xf32>
    %250 = arith.subf %249, %248 : vector<2x8xf32>
    %251 = math.exp %250 : vector<2x8xf32>
    %cst_68 = arith.constant 1.000000e+00 : f32
    %252 = vector.broadcast %cst_68 : f32 to vector<2x8xf32>
    %253 = arith.addf %252, %251 : vector<2x8xf32>
    %254 = math.log %253 : vector<2x8xf32>
    %255 = arith.subf %247, %254 : vector<2x8xf32>
    %256 = vector.broadcast %245 : vector<2x1xf32> to vector<2x8xf32>
    %257 = arith.subf %234, %256 : vector<2x8xf32>
    %258 = arith.select %11, %255, %257 : vector<2x8xi1>, vector<2x8xf32>
    %259 = vector.broadcast %238 : vector<2x1xf32> to vector<2x8xf32>
    %260 = arith.cmpf oeq, %236, %259 : vector<2x8xf32>
    %c8_i32_69 = arith.constant 8 : i32
    %261 = vector.broadcast %c8_i32_69 : i32 to vector<2x8xi32>
    %262 = arith.select %260, %9, %261 : vector<2x8xi1>, vector<2x8xi32>
    %cst_70 = arith.constant dense<2147483647> : vector<2xi32>
    %263 = vector.multi_reduction <minsi>, %262, %cst_70 [1] : vector<2x8xi32> to vector<2xi32>
    %264 = vector.shape_cast %263 : vector<2xi32> to vector<2x1xi32>
    %265 = vector.broadcast %264 : vector<2x1xi32> to vector<2x7xi32>
    %266 = arith.cmpi eq, %12, %265 : vector<2x7xi32>
    %267 = arith.extui %266 : vector<2x7xi1> to vector<2x7xi32>
    %268 = arith.sitofp %267 : vector<2x7xi32> to vector<2x7xf32>
    %269 = vector.extract_strided_slice %234 {offsets = [0, 7], sizes = [2, 1], strides = [1, 1]} : vector<2x8xf32> to vector<2x1xf32>
    %270 = arith.negf %269 : vector<2x1xf32>
    %271 = math.exp %270 : vector<2x1xf32>
    %cst_71 = arith.constant 1.000000e+00 : f32
    %272 = vector.broadcast %cst_71 : f32 to vector<2x1xf32>
    %273 = arith.addf %272, %271 : vector<2x1xf32>
    %274 = arith.divf %272, %273 : vector<2x1xf32>
    %c0_72 = arith.constant 0 : index
    %c2 = arith.constant 2 : index
    %c0_73 = arith.constant 0 : index
    %275 = vector.load %arg8[%c0_72, %c2, %c0_73] : memref<2x8x8xf32, #tpu.memory_space<vmem>>, vector<2x1x8xf32>
    %276 = vector.shape_cast %275 : vector<2x1x8xf32> to vector<2x8xf32>
    %277 = vector.shape_cast %258 : vector<2x8xf32> to vector<2x1x8xf32>
    tpu.vector_store %arg8[%c0_72, %c2, %c0_73], %277 {strides = array<i32>} : memref<2x8x8xf32, #tpu.memory_space<vmem>>, vector<2x1x8xf32>,
    %278 = tpu.concatenate %268, %274, %212 in 1 : vector<2x7xf32>, vector<2x1xf32>, vector<2x32xf32> -> vector<2x40xf32>
    %cst_74 = arith.constant dense<0.000000e+00> : vector<2x128xf32>
    %279 = tpu.matmul %278, %0, %cst_74 {dimension_numbers = #tpu.dot_dimension_numbers<[1], [0], [0], [1], [0, 0, 1, 1], [], []>} : vector<2x40xf32>, vector<40x128xf32>, vector<2x128xf32> -> vector<2x128xf32>
    %280 = vector.broadcast %4 : vector<1x128xf32> to vector<2x128xf32>
    %281 = arith.addf %279, %280 : vector<2x128xf32>
    %282 = arith.negf %281 : vector<2x128xf32>
    %283 = math.exp %282 : vector<2x128xf32>
    %cst_75 = arith.constant 1.000000e+00 : f32
    %284 = vector.broadcast %cst_75 : f32 to vector<2x128xf32>
    %285 = arith.addf %284, %283 : vector<2x128xf32>
    %286 = arith.divf %284, %285 : vector<2x128xf32>
    %287 = math.tanh %281 : vector<2x128xf32>
    %288 = vector.extract_strided_slice %286 {offsets = [0, 32], sizes = [2, 32], strides = [1, 1]} : vector<2x128xf32> to vector<2x32xf32>
    %289 = arith.mulf %288, %209 : vector<2x32xf32>
    %290 = vector.extract_strided_slice %286 {offsets = [0, 0], sizes = [2, 32], strides = [1, 1]} : vector<2x128xf32> to vector<2x32xf32>
    %291 = vector.extract_strided_slice %287 {offsets = [0, 64], sizes = [2, 32], strides = [1, 1]} : vector<2x128xf32> to vector<2x32xf32>
    %292 = arith.mulf %290, %291 : vector<2x32xf32>
    %293 = arith.addf %289, %292 : vector<2x32xf32>
    %294 = vector.extract_strided_slice %286 {offsets = [0, 96], sizes = [2, 32], strides = [1, 1]} : vector<2x128xf32> to vector<2x32xf32>
    %295 = math.tanh %293 : vector<2x32xf32>
    %296 = arith.mulf %294, %295 : vector<2x32xf32>
    %297 = tpu.concatenate %296, %231 in 1 : vector<2x32xf32>, vector<2x32xf32> -> vector<2x64xf32>
    %cst_76 = arith.constant dense<0.000000e+00> : vector<2x128xf32>
    %298 = tpu.matmul %297, %2, %cst_76 {dimension_numbers = #tpu.dot_dimension_numbers<[1], [0], [0], [1], [0, 0, 1, 1], [], []>} : vector<2x64xf32>, vector<64x128xf32>, vector<2x128xf32> -> vector<2x128xf32>
    %299 = vector.broadcast %6 : vector<1x128xf32> to vector<2x128xf32>
    %300 = arith.addf %298, %299 : vector<2x128xf32>
    %301 = arith.negf %300 : vector<2x128xf32>
    %302 = math.exp %301 : vector<2x128xf32>
    %cst_77 = arith.constant 1.000000e+00 : f32
    %303 = vector.broadcast %cst_77 : f32 to vector<2x128xf32>
    %304 = arith.addf %303, %302 : vector<2x128xf32>
    %305 = arith.divf %303, %304 : vector<2x128xf32>
    %306 = math.tanh %300 : vector<2x128xf32>
    %307 = vector.extract_strided_slice %305 {offsets = [0, 32], sizes = [2, 32], strides = [1, 1]} : vector<2x128xf32> to vector<2x32xf32>
    %308 = arith.mulf %307, %228 : vector<2x32xf32>
    %309 = vector.extract_strided_slice %305 {offsets = [0, 0], sizes = [2, 32], strides = [1, 1]} : vector<2x128xf32> to vector<2x32xf32>
    %310 = vector.extract_strided_slice %306 {offsets = [0, 64], sizes = [2, 32], strides = [1, 1]} : vector<2x128xf32> to vector<2x32xf32>
    %311 = arith.mulf %309, %310 : vector<2x32xf32>
    %312 = arith.addf %308, %311 : vector<2x32xf32>
    %313 = vector.extract_strided_slice %305 {offsets = [0, 96], sizes = [2, 32], strides = [1, 1]} : vector<2x128xf32> to vector<2x32xf32>
    %314 = math.tanh %312 : vector<2x32xf32>
    %315 = arith.mulf %313, %314 : vector<2x32xf32>
    %cst_78 = arith.constant dense<0.000000e+00> : vector<2x8xf32>
    %316 = tpu.matmul %315, %7, %cst_78 {dimension_numbers = #tpu.dot_dimension_numbers<[1], [0], [0], [1], [0, 0, 1, 1], [], []>} : vector<2x32xf32>, vector<32x8xf32>, vector<2x8xf32> -> vector<2x8xf32>
    %317 = vector.broadcast %8 : vector<1x8xf32> to vector<2x8xf32>
    %318 = arith.addf %316, %317 : vector<2x8xf32>
    %cst_79 = arith.constant 0xFF800000 : f32
    %319 = vector.broadcast %cst_79 : f32 to vector<2x8xf32>
    %320 = arith.select %11, %319, %318 : vector<2x8xi1>, vector<2x8xf32>
    %cst_80 = arith.constant dense<0xFF800000> : vector<2xf32>
    %321 = vector.multi_reduction <maximumf>, %320, %cst_80 [1] : vector<2x8xf32> to vector<2xf32>
    %322 = vector.shape_cast %321 : vector<2xf32> to vector<2x1xf32>
    %323 = vector.broadcast %322 : vector<2x1xf32> to vector<2x8xf32>
    %324 = arith.subf %320, %323 : vector<2x8xf32>
    %325 = math.exp %324 : vector<2x8xf32>
    %cst_81 = arith.constant dense<0.000000e+00> : vector<2xf32>
    %326 = vector.multi_reduction <add>, %325, %cst_81 [1] : vector<2x8xf32> to vector<2xf32>
    %327 = vector.shape_cast %326 : vector<2xf32> to vector<2x1xf32>
    %328 = math.log %327 : vector<2x1xf32>
    %329 = arith.addf %322, %328 : vector<2x1xf32>
    %cst_82 = arith.constant 0.000000e+00 : f32
    %330 = vector.broadcast %cst_82 : f32 to vector<2x8xf32>
    %331 = arith.minimumf %318, %330 : vector<2x8xf32>
    %332 = math.absf %318 : vector<2x8xf32>
    %cst_83 = arith.constant 0.000000e+00 : f32
    %333 = vector.broadcast %cst_83 : f32 to vector<2x8xf32>
    %334 = arith.subf %333, %332 : vector<2x8xf32>
    %335 = math.exp %334 : vector<2x8xf32>
    %cst_84 = arith.constant 1.000000e+00 : f32
    %336 = vector.broadcast %cst_84 : f32 to vector<2x8xf32>
    %337 = arith.addf %336, %335 : vector<2x8xf32>
    %338 = math.log %337 : vector<2x8xf32>
    %339 = arith.subf %331, %338 : vector<2x8xf32>
    %340 = vector.broadcast %329 : vector<2x1xf32> to vector<2x8xf32>
    %341 = arith.subf %318, %340 : vector<2x8xf32>
    %342 = arith.select %11, %339, %341 : vector<2x8xi1>, vector<2x8xf32>
    %343 = vector.broadcast %322 : vector<2x1xf32> to vector<2x8xf32>
    %344 = arith.cmpf oeq, %320, %343 : vector<2x8xf32>
    %c8_i32_85 = arith.constant 8 : i32
    %345 = vector.broadcast %c8_i32_85 : i32 to vector<2x8xi32>
    %346 = arith.select %344, %9, %345 : vector<2x8xi1>, vector<2x8xi32>
    %cst_86 = arith.constant dense<2147483647> : vector<2xi32>
    %347 = vector.multi_reduction <minsi>, %346, %cst_86 [1] : vector<2x8xi32> to vector<2xi32>
    %348 = vector.shape_cast %347 : vector<2xi32> to vector<2x1xi32>
    %349 = vector.broadcast %348 : vector<2x1xi32> to vector<2x7xi32>
    %350 = arith.cmpi eq, %12, %349 : vector<2x7xi32>
    %351 = arith.extui %350 : vector<2x7xi1> to vector<2x7xi32>
    %352 = arith.sitofp %351 : vector<2x7xi32> to vector<2x7xf32>
    %353 = vector.extract_strided_slice %318 {offsets = [0, 7], sizes = [2, 1], strides = [1, 1]} : vector<2x8xf32> to vector<2x1xf32>
    %354 = arith.negf %353 : vector<2x1xf32>
    %355 = math.exp %354 : vector<2x1xf32>
    %cst_87 = arith.constant 1.000000e+00 : f32
    %356 = vector.broadcast %cst_87 : f32 to vector<2x1xf32>
    %357 = arith.addf %356, %355 : vector<2x1xf32>
    %358 = arith.divf %356, %357 : vector<2x1xf32>
    %c0_88 = arith.constant 0 : index
    %c3 = arith.constant 3 : index
    %c0_89 = arith.constant 0 : index
    %359 = vector.load %arg8[%c0_88, %c3, %c0_89] : memref<2x8x8xf32, #tpu.memory_space<vmem>>, vector<2x1x8xf32>
    %360 = vector.shape_cast %359 : vector<2x1x8xf32> to vector<2x8xf32>
    %361 = vector.shape_cast %342 : vector<2x8xf32> to vector<2x1x8xf32>
    tpu.vector_store %arg8[%c0_88, %c3, %c0_89], %361 {strides = array<i32>} : memref<2x8x8xf32, #tpu.memory_space<vmem>>, vector<2x1x8xf32>,
    %362 = tpu.concatenate %352, %358, %296 in 1 : vector<2x7xf32>, vector<2x1xf32>, vector<2x32xf32> -> vector<2x40xf32>
    %cst_90 = arith.constant dense<0.000000e+00> : vector<2x128xf32>
    %363 = tpu.matmul %362, %0, %cst_90 {dimension_numbers = #tpu.dot_dimension_numbers<[1], [0], [0], [1], [0, 0, 1, 1], [], []>} : vector<2x40xf32>, vector<40x128xf32>, vector<2x128xf32> -> vector<2x128xf32>
    %364 = vector.broadcast %4 : vector<1x128xf32> to vector<2x128xf32>
    %365 = arith.addf %363, %364 : vector<2x128xf32>
    %366 = arith.negf %365 : vector<2x128xf32>
    %367 = math.exp %366 : vector<2x128xf32>
    %cst_91 = arith.constant 1.000000e+00 : f32
    %368 = vector.broadcast %cst_91 : f32 to vector<2x128xf32>
    %369 = arith.addf %368, %367 : vector<2x128xf32>
    %370 = arith.divf %368, %369 : vector<2x128xf32>
    %371 = math.tanh %365 : vector<2x128xf32>
    %372 = vector.extract_strided_slice %370 {offsets = [0, 32], sizes = [2, 32], strides = [1, 1]} : vector<2x128xf32> to vector<2x32xf32>
    %373 = arith.mulf %372, %293 : vector<2x32xf32>
    %374 = vector.extract_strided_slice %370 {offsets = [0, 0], sizes = [2, 32], strides = [1, 1]} : vector<2x128xf32> to vector<2x32xf32>
    %375 = vector.extract_strided_slice %371 {offsets = [0, 64], sizes = [2, 32], strides = [1, 1]} : vector<2x128xf32> to vector<2x32xf32>
    %376 = arith.mulf %374, %375 : vector<2x32xf32>
    %377 = arith.addf %373, %376 : vector<2x32xf32>
    %378 = vector.extract_strided_slice %370 {offsets = [0, 96], sizes = [2, 32], strides = [1, 1]} : vector<2x128xf32> to vector<2x32xf32>
    %379 = math.tanh %377 : vector<2x32xf32>
    %380 = arith.mulf %378, %379 : vector<2x32xf32>
    %381 = tpu.concatenate %380, %315 in 1 : vector<2x32xf32>, vector<2x32xf32> -> vector<2x64xf32>
    %cst_92 = arith.constant dense<0.000000e+00> : vector<2x128xf32>
    %382 = tpu.matmul %381, %2, %cst_92 {dimension_numbers = #tpu.dot_dimension_numbers<[1], [0], [0], [1], [0, 0, 1, 1], [], []>} : vector<2x64xf32>, vector<64x128xf32>, vector<2x128xf32> -> vector<2x128xf32>
    %383 = vector.broadcast %6 : vector<1x128xf32> to vector<2x128xf32>
    %384 = arith.addf %382, %383 : vector<2x128xf32>
    %385 = arith.negf %384 : vector<2x128xf32>
    %386 = math.exp %385 : vector<2x128xf32>
    %cst_93 = arith.constant 1.000000e+00 : f32
    %387 = vector.broadcast %cst_93 : f32 to vector<2x128xf32>
    %388 = arith.addf %387, %386 : vector<2x128xf32>
    %389 = arith.divf %387, %388 : vector<2x128xf32>
    %390 = math.tanh %384 : vector<2x128xf32>
    %391 = vector.extract_strided_slice %389 {offsets = [0, 32], sizes = [2, 32], strides = [1, 1]} : vector<2x128xf32> to vector<2x32xf32>
    %392 = arith.mulf %391, %312 : vector<2x32xf32>
    %393 = vector.extract_strided_slice %389 {offsets = [0, 0], sizes = [2, 32], strides = [1, 1]} : vector<2x128xf32> to vector<2x32xf32>
    %394 = vector.extract_strided_slice %390 {offsets = [0, 64], sizes = [2, 32], strides = [1, 1]} : vector<2x128xf32> to vector<2x32xf32>
    %395 = arith.mulf %393, %394 : vector<2x32xf32>
    %396 = arith.addf %392, %395 : vector<2x32xf32>
    %397 = vector.extract_strided_slice %389 {offsets = [0, 96], sizes = [2, 32], strides = [1, 1]} : vector<2x128xf32> to vector<2x32xf32>
    %398 = math.tanh %396 : vector<2x32xf32>
    %399 = arith.mulf %397, %398 : vector<2x32xf32>
    %cst_94 = arith.constant dense<0.000000e+00> : vector<2x8xf32>
    %400 = tpu.matmul %399, %7, %cst_94 {dimension_numbers = #tpu.dot_dimension_numbers<[1], [0], [0], [1], [0, 0, 1, 1], [], []>} : vector<2x32xf32>, vector<32x8xf32>, vector<2x8xf32> -> vector<2x8xf32>
    %401 = vector.broadcast %8 : vector<1x8xf32> to vector<2x8xf32>
    %402 = arith.addf %400, %401 : vector<2x8xf32>
    %cst_95 = arith.constant 0xFF800000 : f32
    %403 = vector.broadcast %cst_95 : f32 to vector<2x8xf32>
    %404 = arith.select %11, %403, %402 : vector<2x8xi1>, vector<2x8xf32>
    %cst_96 = arith.constant dense<0xFF800000> : vector<2xf32>
    %405 = vector.multi_reduction <maximumf>, %404, %cst_96 [1] : vector<2x8xf32> to vector<2xf32>
    %406 = vector.shape_cast %405 : vector<2xf32> to vector<2x1xf32>
    %407 = vector.broadcast %406 : vector<2x1xf32> to vector<2x8xf32>
    %408 = arith.subf %404, %407 : vector<2x8xf32>
    %409 = math.exp %408 : vector<2x8xf32>
    %cst_97 = arith.constant dense<0.000000e+00> : vector<2xf32>
    %410 = vector.multi_reduction <add>, %409, %cst_97 [1] : vector<2x8xf32> to vector<2xf32>
    %411 = vector.shape_cast %410 : vector<2xf32> to vector<2x1xf32>
    %412 = math.log %411 : vector<2x1xf32>
    %413 = arith.addf %406, %412 : vector<2x1xf32>
    %cst_98 = arith.constant 0.000000e+00 : f32
    %414 = vector.broadcast %cst_98 : f32 to vector<2x8xf32>
    %415 = arith.minimumf %402, %414 : vector<2x8xf32>
    %416 = math.absf %402 : vector<2x8xf32>
    %cst_99 = arith.constant 0.000000e+00 : f32
    %417 = vector.broadcast %cst_99 : f32 to vector<2x8xf32>
    %418 = arith.subf %417, %416 : vector<2x8xf32>
    %419 = math.exp %418 : vector<2x8xf32>
    %cst_100 = arith.constant 1.000000e+00 : f32
    %420 = vector.broadcast %cst_100 : f32 to vector<2x8xf32>
    %421 = arith.addf %420, %419 : vector<2x8xf32>
    %422 = math.log %421 : vector<2x8xf32>
    %423 = arith.subf %415, %422 : vector<2x8xf32>
    %424 = vector.broadcast %413 : vector<2x1xf32> to vector<2x8xf32>
    %425 = arith.subf %402, %424 : vector<2x8xf32>
    %426 = arith.select %11, %423, %425 : vector<2x8xi1>, vector<2x8xf32>
    %427 = vector.broadcast %406 : vector<2x1xf32> to vector<2x8xf32>
    %428 = arith.cmpf oeq, %404, %427 : vector<2x8xf32>
    %c8_i32_101 = arith.constant 8 : i32
    %429 = vector.broadcast %c8_i32_101 : i32 to vector<2x8xi32>
    %430 = arith.select %428, %9, %429 : vector<2x8xi1>, vector<2x8xi32>
    %cst_102 = arith.constant dense<2147483647> : vector<2xi32>
    %431 = vector.multi_reduction <minsi>, %430, %cst_102 [1] : vector<2x8xi32> to vector<2xi32>
    %432 = vector.shape_cast %431 : vector<2xi32> to vector<2x1xi32>
    %433 = vector.broadcast %432 : vector<2x1xi32> to vector<2x7xi32>
    %434 = arith.cmpi eq, %12, %433 : vector<2x7xi32>
    %435 = arith.extui %434 : vector<2x7xi1> to vector<2x7xi32>
    %436 = arith.sitofp %435 : vector<2x7xi32> to vector<2x7xf32>
    %437 = vector.extract_strided_slice %402 {offsets = [0, 7], sizes = [2, 1], strides = [1, 1]} : vector<2x8xf32> to vector<2x1xf32>
    %438 = arith.negf %437 : vector<2x1xf32>
    %439 = math.exp %438 : vector<2x1xf32>
    %cst_103 = arith.constant 1.000000e+00 : f32
    %440 = vector.broadcast %cst_103 : f32 to vector<2x1xf32>
    %441 = arith.addf %440, %439 : vector<2x1xf32>
    %442 = arith.divf %440, %441 : vector<2x1xf32>
    %c0_104 = arith.constant 0 : index
    %c4 = arith.constant 4 : index
    %c0_105 = arith.constant 0 : index
    %443 = vector.load %arg8[%c0_104, %c4, %c0_105] : memref<2x8x8xf32, #tpu.memory_space<vmem>>, vector<2x1x8xf32>
    %444 = vector.shape_cast %443 : vector<2x1x8xf32> to vector<2x8xf32>
    %445 = vector.shape_cast %426 : vector<2x8xf32> to vector<2x1x8xf32>
    tpu.vector_store %arg8[%c0_104, %c4, %c0_105], %445 {strides = array<i32>} : memref<2x8x8xf32, #tpu.memory_space<vmem>>, vector<2x1x8xf32>,
    %446 = tpu.concatenate %436, %442, %380 in 1 : vector<2x7xf32>, vector<2x1xf32>, vector<2x32xf32> -> vector<2x40xf32>
    %cst_106 = arith.constant dense<0.000000e+00> : vector<2x128xf32>
    %447 = tpu.matmul %446, %0, %cst_106 {dimension_numbers = #tpu.dot_dimension_numbers<[1], [0], [0], [1], [0, 0, 1, 1], [], []>} : vector<2x40xf32>, vector<40x128xf32>, vector<2x128xf32> -> vector<2x128xf32>
    %448 = vector.broadcast %4 : vector<1x128xf32> to vector<2x128xf32>
    %449 = arith.addf %447, %448 : vector<2x128xf32>
    %450 = arith.negf %449 : vector<2x128xf32>
    %451 = math.exp %450 : vector<2x128xf32>
    %cst_107 = arith.constant 1.000000e+00 : f32
    %452 = vector.broadcast %cst_107 : f32 to vector<2x128xf32>
    %453 = arith.addf %452, %451 : vector<2x128xf32>
    %454 = arith.divf %452, %453 : vector<2x128xf32>
    %455 = math.tanh %449 : vector<2x128xf32>
    %456 = vector.extract_strided_slice %454 {offsets = [0, 32], sizes = [2, 32], strides = [1, 1]} : vector<2x128xf32> to vector<2x32xf32>
    %457 = arith.mulf %456, %377 : vector<2x32xf32>
    %458 = vector.extract_strided_slice %454 {offsets = [0, 0], sizes = [2, 32], strides = [1, 1]} : vector<2x128xf32> to vector<2x32xf32>
    %459 = vector.extract_strided_slice %455 {offsets = [0, 64], sizes = [2, 32], strides = [1, 1]} : vector<2x128xf32> to vector<2x32xf32>
    %460 = arith.mulf %458, %459 : vector<2x32xf32>
    %461 = arith.addf %457, %460 : vector<2x32xf32>
    %462 = vector.extract_strided_slice %454 {offsets = [0, 96], sizes = [2, 32], strides = [1, 1]} : vector<2x128xf32> to vector<2x32xf32>
    %463 = math.tanh %461 : vector<2x32xf32>
    %464 = arith.mulf %462, %463 : vector<2x32xf32>
    %465 = tpu.concatenate %464, %399 in 1 : vector<2x32xf32>, vector<2x32xf32> -> vector<2x64xf32>
    %cst_108 = arith.constant dense<0.000000e+00> : vector<2x128xf32>
    %466 = tpu.matmul %465, %2, %cst_108 {dimension_numbers = #tpu.dot_dimension_numbers<[1], [0], [0], [1], [0, 0, 1, 1], [], []>} : vector<2x64xf32>, vector<64x128xf32>, vector<2x128xf32> -> vector<2x128xf32>
    %467 = vector.broadcast %6 : vector<1x128xf32> to vector<2x128xf32>
    %468 = arith.addf %466, %467 : vector<2x128xf32>
    %469 = arith.negf %468 : vector<2x128xf32>
    %470 = math.exp %469 : vector<2x128xf32>
    %cst_109 = arith.constant 1.000000e+00 : f32
    %471 = vector.broadcast %cst_109 : f32 to vector<2x128xf32>
    %472 = arith.addf %471, %470 : vector<2x128xf32>
    %473 = arith.divf %471, %472 : vector<2x128xf32>
    %474 = math.tanh %468 : vector<2x128xf32>
    %475 = vector.extract_strided_slice %473 {offsets = [0, 32], sizes = [2, 32], strides = [1, 1]} : vector<2x128xf32> to vector<2x32xf32>
    %476 = arith.mulf %475, %396 : vector<2x32xf32>
    %477 = vector.extract_strided_slice %473 {offsets = [0, 0], sizes = [2, 32], strides = [1, 1]} : vector<2x128xf32> to vector<2x32xf32>
    %478 = vector.extract_strided_slice %474 {offsets = [0, 64], sizes = [2, 32], strides = [1, 1]} : vector<2x128xf32> to vector<2x32xf32>
    %479 = arith.mulf %477, %478 : vector<2x32xf32>
    %480 = arith.addf %476, %479 : vector<2x32xf32>
    %481 = vector.extract_strided_slice %473 {offsets = [0, 96], sizes = [2, 32], strides = [1, 1]} : vector<2x128xf32> to vector<2x32xf32>
    %482 = math.tanh %480 : vector<2x32xf32>
    %483 = arith.mulf %481, %482 : vector<2x32xf32>
    %cst_110 = arith.constant dense<0.000000e+00> : vector<2x8xf32>
    %484 = tpu.matmul %483, %7, %cst_110 {dimension_numbers = #tpu.dot_dimension_numbers<[1], [0], [0], [1], [0, 0, 1, 1], [], []>} : vector<2x32xf32>, vector<32x8xf32>, vector<2x8xf32> -> vector<2x8xf32>
    %485 = vector.broadcast %8 : vector<1x8xf32> to vector<2x8xf32>
    %486 = arith.addf %484, %485 : vector<2x8xf32>
    %cst_111 = arith.constant 0xFF800000 : f32
    %487 = vector.broadcast %cst_111 : f32 to vector<2x8xf32>
    %488 = arith.select %11, %487, %486 : vector<2x8xi1>, vector<2x8xf32>
    %cst_112 = arith.constant dense<0xFF800000> : vector<2xf32>
    %489 = vector.multi_reduction <maximumf>, %488, %cst_112 [1] : vector<2x8xf32> to vector<2xf32>
    %490 = vector.shape_cast %489 : vector<2xf32> to vector<2x1xf32>
    %491 = vector.broadcast %490 : vector<2x1xf32> to vector<2x8xf32>
    %492 = arith.subf %488, %491 : vector<2x8xf32>
    %493 = math.exp %492 : vector<2x8xf32>
    %cst_113 = arith.constant dense<0.000000e+00> : vector<2xf32>
    %494 = vector.multi_reduction <add>, %493, %cst_113 [1] : vector<2x8xf32> to vector<2xf32>
    %495 = vector.shape_cast %494 : vector<2xf32> to vector<2x1xf32>
    %496 = math.log %495 : vector<2x1xf32>
    %497 = arith.addf %490, %496 : vector<2x1xf32>
    %cst_114 = arith.constant 0.000000e+00 : f32
    %498 = vector.broadcast %cst_114 : f32 to vector<2x8xf32>
    %499 = arith.minimumf %486, %498 : vector<2x8xf32>
    %500 = math.absf %486 : vector<2x8xf32>
    %cst_115 = arith.constant 0.000000e+00 : f32
    %501 = vector.broadcast %cst_115 : f32 to vector<2x8xf32>
    %502 = arith.subf %501, %500 : vector<2x8xf32>
    %503 = math.exp %502 : vector<2x8xf32>
    %cst_116 = arith.constant 1.000000e+00 : f32
    %504 = vector.broadcast %cst_116 : f32 to vector<2x8xf32>
    %505 = arith.addf %504, %503 : vector<2x8xf32>
    %506 = math.log %505 : vector<2x8xf32>
    %507 = arith.subf %499, %506 : vector<2x8xf32>
    %508 = vector.broadcast %497 : vector<2x1xf32> to vector<2x8xf32>
    %509 = arith.subf %486, %508 : vector<2x8xf32>
    %510 = arith.select %11, %507, %509 : vector<2x8xi1>, vector<2x8xf32>
    %511 = vector.broadcast %490 : vector<2x1xf32> to vector<2x8xf32>
    %512 = arith.cmpf oeq, %488, %511 : vector<2x8xf32>
    %c8_i32_117 = arith.constant 8 : i32
    %513 = vector.broadcast %c8_i32_117 : i32 to vector<2x8xi32>
    %514 = arith.select %512, %9, %513 : vector<2x8xi1>, vector<2x8xi32>
    %cst_118 = arith.constant dense<2147483647> : vector<2xi32>
    %515 = vector.multi_reduction <minsi>, %514, %cst_118 [1] : vector<2x8xi32> to vector<2xi32>
    %516 = vector.shape_cast %515 : vector<2xi32> to vector<2x1xi32>
    %517 = vector.broadcast %516 : vector<2x1xi32> to vector<2x7xi32>
    %518 = arith.cmpi eq, %12, %517 : vector<2x7xi32>
    %519 = arith.extui %518 : vector<2x7xi1> to vector<2x7xi32>
    %520 = arith.sitofp %519 : vector<2x7xi32> to vector<2x7xf32>
    %521 = vector.extract_strided_slice %486 {offsets = [0, 7], sizes = [2, 1], strides = [1, 1]} : vector<2x8xf32> to vector<2x1xf32>
    %522 = arith.negf %521 : vector<2x1xf32>
    %523 = math.exp %522 : vector<2x1xf32>
    %cst_119 = arith.constant 1.000000e+00 : f32
    %524 = vector.broadcast %cst_119 : f32 to vector<2x1xf32>
    %525 = arith.addf %524, %523 : vector<2x1xf32>
    %526 = arith.divf %524, %525 : vector<2x1xf32>
    %c0_120 = arith.constant 0 : index
    %c5 = arith.constant 5 : index
    %c0_121 = arith.constant 0 : index
    %527 = vector.load %arg8[%c0_120, %c5, %c0_121] : memref<2x8x8xf32, #tpu.memory_space<vmem>>, vector<2x1x8xf32>
    %528 = vector.shape_cast %527 : vector<2x1x8xf32> to vector<2x8xf32>
    %529 = vector.shape_cast %510 : vector<2x8xf32> to vector<2x1x8xf32>
    tpu.vector_store %arg8[%c0_120, %c5, %c0_121], %529 {strides = array<i32>} : memref<2x8x8xf32, #tpu.memory_space<vmem>>, vector<2x1x8xf32>,
    %530 = tpu.concatenate %520, %526, %464 in 1 : vector<2x7xf32>, vector<2x1xf32>, vector<2x32xf32> -> vector<2x40xf32>
    %cst_122 = arith.constant dense<0.000000e+00> : vector<2x128xf32>
    %531 = tpu.matmul %530, %0, %cst_122 {dimension_numbers = #tpu.dot_dimension_numbers<[1], [0], [0], [1], [0, 0, 1, 1], [], []>} : vector<2x40xf32>, vector<40x128xf32>, vector<2x128xf32> -> vector<2x128xf32>
    %532 = vector.broadcast %4 : vector<1x128xf32> to vector<2x128xf32>
    %533 = arith.addf %531, %532 : vector<2x128xf32>
    %534 = arith.negf %533 : vector<2x128xf32>
    %535 = math.exp %534 : vector<2x128xf32>
    %cst_123 = arith.constant 1.000000e+00 : f32
    %536 = vector.broadcast %cst_123 : f32 to vector<2x128xf32>
    %537 = arith.addf %536, %535 : vector<2x128xf32>
    %538 = arith.divf %536, %537 : vector<2x128xf32>
    %539 = math.tanh %533 : vector<2x128xf32>
    %540 = vector.extract_strided_slice %538 {offsets = [0, 32], sizes = [2, 32], strides = [1, 1]} : vector<2x128xf32> to vector<2x32xf32>
    %541 = arith.mulf %540, %461 : vector<2x32xf32>
    %542 = vector.extract_strided_slice %538 {offsets = [0, 0], sizes = [2, 32], strides = [1, 1]} : vector<2x128xf32> to vector<2x32xf32>
    %543 = vector.extract_strided_slice %539 {offsets = [0, 64], sizes = [2, 32], strides = [1, 1]} : vector<2x128xf32> to vector<2x32xf32>
    %544 = arith.mulf %542, %543 : vector<2x32xf32>
    %545 = arith.addf %541, %544 : vector<2x32xf32>
    %546 = vector.extract_strided_slice %538 {offsets = [0, 96], sizes = [2, 32], strides = [1, 1]} : vector<2x128xf32> to vector<2x32xf32>
    %547 = math.tanh %545 : vector<2x32xf32>
    %548 = arith.mulf %546, %547 : vector<2x32xf32>
    %549 = tpu.concatenate %548, %483 in 1 : vector<2x32xf32>, vector<2x32xf32> -> vector<2x64xf32>
    %cst_124 = arith.constant dense<0.000000e+00> : vector<2x128xf32>
    %550 = tpu.matmul %549, %2, %cst_124 {dimension_numbers = #tpu.dot_dimension_numbers<[1], [0], [0], [1], [0, 0, 1, 1], [], []>} : vector<2x64xf32>, vector<64x128xf32>, vector<2x128xf32> -> vector<2x128xf32>
    %551 = vector.broadcast %6 : vector<1x128xf32> to vector<2x128xf32>
    %552 = arith.addf %550, %551 : vector<2x128xf32>
    %553 = arith.negf %552 : vector<2x128xf32>
    %554 = math.exp %553 : vector<2x128xf32>
    %cst_125 = arith.constant 1.000000e+00 : f32
    %555 = vector.broadcast %cst_125 : f32 to vector<2x128xf32>
    %556 = arith.addf %555, %554 : vector<2x128xf32>
    %557 = arith.divf %555, %556 : vector<2x128xf32>
    %558 = math.tanh %552 : vector<2x128xf32>
    %559 = vector.extract_strided_slice %557 {offsets = [0, 32], sizes = [2, 32], strides = [1, 1]} : vector<2x128xf32> to vector<2x32xf32>
    %560 = arith.mulf %559, %480 : vector<2x32xf32>
    %561 = vector.extract_strided_slice %557 {offsets = [0, 0], sizes = [2, 32], strides = [1, 1]} : vector<2x128xf32> to vector<2x32xf32>
    %562 = vector.extract_strided_slice %558 {offsets = [0, 64], sizes = [2, 32], strides = [1, 1]} : vector<2x128xf32> to vector<2x32xf32>
    %563 = arith.mulf %561, %562 : vector<2x32xf32>
    %564 = arith.addf %560, %563 : vector<2x32xf32>
    %565 = vector.extract_strided_slice %557 {offsets = [0, 96], sizes = [2, 32], strides = [1, 1]} : vector<2x128xf32> to vector<2x32xf32>
    %566 = math.tanh %564 : vector<2x32xf32>
    %567 = arith.mulf %565, %566 : vector<2x32xf32>
    %cst_126 = arith.constant dense<0.000000e+00> : vector<2x8xf32>
    %568 = tpu.matmul %567, %7, %cst_126 {dimension_numbers = #tpu.dot_dimension_numbers<[1], [0], [0], [1], [0, 0, 1, 1], [], []>} : vector<2x32xf32>, vector<32x8xf32>, vector<2x8xf32> -> vector<2x8xf32>
    %569 = vector.broadcast %8 : vector<1x8xf32> to vector<2x8xf32>
    %570 = arith.addf %568, %569 : vector<2x8xf32>
    %cst_127 = arith.constant 0xFF800000 : f32
    %571 = vector.broadcast %cst_127 : f32 to vector<2x8xf32>
    %572 = arith.select %11, %571, %570 : vector<2x8xi1>, vector<2x8xf32>
    %cst_128 = arith.constant dense<0xFF800000> : vector<2xf32>
    %573 = vector.multi_reduction <maximumf>, %572, %cst_128 [1] : vector<2x8xf32> to vector<2xf32>
    %574 = vector.shape_cast %573 : vector<2xf32> to vector<2x1xf32>
    %575 = vector.broadcast %574 : vector<2x1xf32> to vector<2x8xf32>
    %576 = arith.subf %572, %575 : vector<2x8xf32>
    %577 = math.exp %576 : vector<2x8xf32>
    %cst_129 = arith.constant dense<0.000000e+00> : vector<2xf32>
    %578 = vector.multi_reduction <add>, %577, %cst_129 [1] : vector<2x8xf32> to vector<2xf32>
    %579 = vector.shape_cast %578 : vector<2xf32> to vector<2x1xf32>
    %580 = math.log %579 : vector<2x1xf32>
    %581 = arith.addf %574, %580 : vector<2x1xf32>
    %cst_130 = arith.constant 0.000000e+00 : f32
    %582 = vector.broadcast %cst_130 : f32 to vector<2x8xf32>
    %583 = arith.minimumf %570, %582 : vector<2x8xf32>
    %584 = math.absf %570 : vector<2x8xf32>
    %cst_131 = arith.constant 0.000000e+00 : f32
    %585 = vector.broadcast %cst_131 : f32 to vector<2x8xf32>
    %586 = arith.subf %585, %584 : vector<2x8xf32>
    %587 = math.exp %586 : vector<2x8xf32>
    %cst_132 = arith.constant 1.000000e+00 : f32
    %588 = vector.broadcast %cst_132 : f32 to vector<2x8xf32>
    %589 = arith.addf %588, %587 : vector<2x8xf32>
    %590 = math.log %589 : vector<2x8xf32>
    %591 = arith.subf %583, %590 : vector<2x8xf32>
    %592 = vector.broadcast %581 : vector<2x1xf32> to vector<2x8xf32>
    %593 = arith.subf %570, %592 : vector<2x8xf32>
    %594 = arith.select %11, %591, %593 : vector<2x8xi1>, vector<2x8xf32>
    %595 = vector.broadcast %574 : vector<2x1xf32> to vector<2x8xf32>
    %596 = arith.cmpf oeq, %572, %595 : vector<2x8xf32>
    %c8_i32_133 = arith.constant 8 : i32
    %597 = vector.broadcast %c8_i32_133 : i32 to vector<2x8xi32>
    %598 = arith.select %596, %9, %597 : vector<2x8xi1>, vector<2x8xi32>
    %cst_134 = arith.constant dense<2147483647> : vector<2xi32>
    %599 = vector.multi_reduction <minsi>, %598, %cst_134 [1] : vector<2x8xi32> to vector<2xi32>
    %600 = vector.shape_cast %599 : vector<2xi32> to vector<2x1xi32>
    %601 = vector.broadcast %600 : vector<2x1xi32> to vector<2x7xi32>
    %602 = arith.cmpi eq, %12, %601 : vector<2x7xi32>
    %603 = arith.extui %602 : vector<2x7xi1> to vector<2x7xi32>
    %604 = arith.sitofp %603 : vector<2x7xi32> to vector<2x7xf32>
    %605 = vector.extract_strided_slice %570 {offsets = [0, 7], sizes = [2, 1], strides = [1, 1]} : vector<2x8xf32> to vector<2x1xf32>
    %606 = arith.negf %605 : vector<2x1xf32>
    %607 = math.exp %606 : vector<2x1xf32>
    %cst_135 = arith.constant 1.000000e+00 : f32
    %608 = vector.broadcast %cst_135 : f32 to vector<2x1xf32>
    %609 = arith.addf %608, %607 : vector<2x1xf32>
    %610 = arith.divf %608, %609 : vector<2x1xf32>
    %c0_136 = arith.constant 0 : index
    %c6 = arith.constant 6 : index
    %c0_137 = arith.constant 0 : index
    %611 = vector.load %arg8[%c0_136, %c6, %c0_137] : memref<2x8x8xf32, #tpu.memory_space<vmem>>, vector<2x1x8xf32>
    %612 = vector.shape_cast %611 : vector<2x1x8xf32> to vector<2x8xf32>
    %613 = vector.shape_cast %594 : vector<2x8xf32> to vector<2x1x8xf32>
    tpu.vector_store %arg8[%c0_136, %c6, %c0_137], %613 {strides = array<i32>} : memref<2x8x8xf32, #tpu.memory_space<vmem>>, vector<2x1x8xf32>,
    %614 = tpu.concatenate %604, %610, %548 in 1 : vector<2x7xf32>, vector<2x1xf32>, vector<2x32xf32> -> vector<2x40xf32>
    %cst_138 = arith.constant dense<0.000000e+00> : vector<2x128xf32>
    %615 = tpu.matmul %614, %0, %cst_138 {dimension_numbers = #tpu.dot_dimension_numbers<[1], [0], [0], [1], [0, 0, 1, 1], [], []>} : vector<2x40xf32>, vector<40x128xf32>, vector<2x128xf32> -> vector<2x128xf32>
    %616 = vector.broadcast %4 : vector<1x128xf32> to vector<2x128xf32>
    %617 = arith.addf %615, %616 : vector<2x128xf32>
    %618 = arith.negf %617 : vector<2x128xf32>
    %619 = math.exp %618 : vector<2x128xf32>
    %cst_139 = arith.constant 1.000000e+00 : f32
    %620 = vector.broadcast %cst_139 : f32 to vector<2x128xf32>
    %621 = arith.addf %620, %619 : vector<2x128xf32>
    %622 = arith.divf %620, %621 : vector<2x128xf32>
    %623 = math.tanh %617 : vector<2x128xf32>
    %624 = vector.extract_strided_slice %622 {offsets = [0, 32], sizes = [2, 32], strides = [1, 1]} : vector<2x128xf32> to vector<2x32xf32>
    %625 = arith.mulf %624, %545 : vector<2x32xf32>
    %626 = vector.extract_strided_slice %622 {offsets = [0, 0], sizes = [2, 32], strides = [1, 1]} : vector<2x128xf32> to vector<2x32xf32>
    %627 = vector.extract_strided_slice %623 {offsets = [0, 64], sizes = [2, 32], strides = [1, 1]} : vector<2x128xf32> to vector<2x32xf32>
    %628 = arith.mulf %626, %627 : vector<2x32xf32>
    %629 = arith.addf %625, %628 : vector<2x32xf32>
    %630 = vector.extract_strided_slice %622 {offsets = [0, 96], sizes = [2, 32], strides = [1, 1]} : vector<2x128xf32> to vector<2x32xf32>
    %631 = math.tanh %629 : vector<2x32xf32>
    %632 = arith.mulf %630, %631 : vector<2x32xf32>
    %633 = tpu.concatenate %632, %567 in 1 : vector<2x32xf32>, vector<2x32xf32> -> vector<2x64xf32>
    %cst_140 = arith.constant dense<0.000000e+00> : vector<2x128xf32>
    %634 = tpu.matmul %633, %2, %cst_140 {dimension_numbers = #tpu.dot_dimension_numbers<[1], [0], [0], [1], [0, 0, 1, 1], [], []>} : vector<2x64xf32>, vector<64x128xf32>, vector<2x128xf32> -> vector<2x128xf32>
    %635 = vector.broadcast %6 : vector<1x128xf32> to vector<2x128xf32>
    %636 = arith.addf %634, %635 : vector<2x128xf32>
    %637 = arith.negf %636 : vector<2x128xf32>
    %638 = math.exp %637 : vector<2x128xf32>
    %cst_141 = arith.constant 1.000000e+00 : f32
    %639 = vector.broadcast %cst_141 : f32 to vector<2x128xf32>
    %640 = arith.addf %639, %638 : vector<2x128xf32>
    %641 = arith.divf %639, %640 : vector<2x128xf32>
    %642 = math.tanh %636 : vector<2x128xf32>
    %643 = vector.extract_strided_slice %641 {offsets = [0, 32], sizes = [2, 32], strides = [1, 1]} : vector<2x128xf32> to vector<2x32xf32>
    %644 = arith.mulf %643, %564 : vector<2x32xf32>
    %645 = vector.extract_strided_slice %641 {offsets = [0, 0], sizes = [2, 32], strides = [1, 1]} : vector<2x128xf32> to vector<2x32xf32>
    %646 = vector.extract_strided_slice %642 {offsets = [0, 64], sizes = [2, 32], strides = [1, 1]} : vector<2x128xf32> to vector<2x32xf32>
    %647 = arith.mulf %645, %646 : vector<2x32xf32>
    %648 = arith.addf %644, %647 : vector<2x32xf32>
    %649 = vector.extract_strided_slice %641 {offsets = [0, 96], sizes = [2, 32], strides = [1, 1]} : vector<2x128xf32> to vector<2x32xf32>
    %650 = math.tanh %648 : vector<2x32xf32>
    %651 = arith.mulf %649, %650 : vector<2x32xf32>
    %cst_142 = arith.constant dense<0.000000e+00> : vector<2x8xf32>
    %652 = tpu.matmul %651, %7, %cst_142 {dimension_numbers = #tpu.dot_dimension_numbers<[1], [0], [0], [1], [0, 0, 1, 1], [], []>} : vector<2x32xf32>, vector<32x8xf32>, vector<2x8xf32> -> vector<2x8xf32>
    %653 = vector.broadcast %8 : vector<1x8xf32> to vector<2x8xf32>
    %654 = arith.addf %652, %653 : vector<2x8xf32>
    %cst_143 = arith.constant 0xFF800000 : f32
    %655 = vector.broadcast %cst_143 : f32 to vector<2x8xf32>
    %656 = arith.select %11, %655, %654 : vector<2x8xi1>, vector<2x8xf32>
    %cst_144 = arith.constant dense<0xFF800000> : vector<2xf32>
    %657 = vector.multi_reduction <maximumf>, %656, %cst_144 [1] : vector<2x8xf32> to vector<2xf32>
    %658 = vector.shape_cast %657 : vector<2xf32> to vector<2x1xf32>
    %659 = vector.broadcast %658 : vector<2x1xf32> to vector<2x8xf32>
    %660 = arith.subf %656, %659 : vector<2x8xf32>
    %661 = math.exp %660 : vector<2x8xf32>
    %cst_145 = arith.constant dense<0.000000e+00> : vector<2xf32>
    %662 = vector.multi_reduction <add>, %661, %cst_145 [1] : vector<2x8xf32> to vector<2xf32>
    %663 = vector.shape_cast %662 : vector<2xf32> to vector<2x1xf32>
    %664 = math.log %663 : vector<2x1xf32>
    %665 = arith.addf %658, %664 : vector<2x1xf32>
    %cst_146 = arith.constant 0.000000e+00 : f32
    %666 = vector.broadcast %cst_146 : f32 to vector<2x8xf32>
    %667 = arith.minimumf %654, %666 : vector<2x8xf32>
    %668 = math.absf %654 : vector<2x8xf32>
    %cst_147 = arith.constant 0.000000e+00 : f32
    %669 = vector.broadcast %cst_147 : f32 to vector<2x8xf32>
    %670 = arith.subf %669, %668 : vector<2x8xf32>
    %671 = math.exp %670 : vector<2x8xf32>
    %cst_148 = arith.constant 1.000000e+00 : f32
    %672 = vector.broadcast %cst_148 : f32 to vector<2x8xf32>
    %673 = arith.addf %672, %671 : vector<2x8xf32>
    %674 = math.log %673 : vector<2x8xf32>
    %675 = arith.subf %667, %674 : vector<2x8xf32>
    %676 = vector.broadcast %665 : vector<2x1xf32> to vector<2x8xf32>
    %677 = arith.subf %654, %676 : vector<2x8xf32>
    %678 = arith.select %11, %675, %677 : vector<2x8xi1>, vector<2x8xf32>
    %c0_149 = arith.constant 0 : index
    %c7 = arith.constant 7 : index
    %c0_150 = arith.constant 0 : index
    %679 = vector.load %arg8[%c0_149, %c7, %c0_150] : memref<2x8x8xf32, #tpu.memory_space<vmem>>, vector<2x1x8xf32>
    %680 = vector.shape_cast %679 : vector<2x1x8xf32> to vector<2x8xf32>
    %681 = vector.shape_cast %678 : vector<2x8xf32> to vector<2x1x8xf32>
    tpu.vector_store %arg8[%c0_149, %c7, %c0_150], %681 {strides = array<i32>} : memref<2x8x8xf32, #tpu.memory_space<vmem>>, vector<2x1x8xf32>,
    %c0_151 = arith.constant 0 : index
    %c0_152 = arith.constant 0 : index
    %c0_153 = arith.constant 0 : index
    %682 = vector.load %arg9[%c0_151, %c0_152, %c0_153] : memref<2x2x32xf32, #tpu.memory_space<vmem>>, vector<2x1x32xf32>
    %683 = vector.shape_cast %682 : vector<2x1x32xf32> to vector<2x32xf32>
    %684 = vector.shape_cast %632 : vector<2x32xf32> to vector<2x1x32xf32>
    tpu.vector_store %arg9[%c0_151, %c0_152, %c0_153], %684 {strides = array<i32>} : memref<2x2x32xf32, #tpu.memory_space<vmem>>, vector<2x1x32xf32>,
    %c0_154 = arith.constant 0 : index
    %c0_155 = arith.constant 0 : index
    %c0_156 = arith.constant 0 : index
    %685 = vector.load %arg10[%c0_154, %c0_155, %c0_156] : memref<2x2x32xf32, #tpu.memory_space<vmem>>, vector<2x1x32xf32>
    %686 = vector.shape_cast %685 : vector<2x1x32xf32> to vector<2x32xf32>
    %687 = vector.shape_cast %629 : vector<2x32xf32> to vector<2x1x32xf32>
    tpu.vector_store %arg10[%c0_154, %c0_155, %c0_156], %687 {strides = array<i32>} : memref<2x2x32xf32, #tpu.memory_space<vmem>>, vector<2x1x32xf32>,
    %c0_157 = arith.constant 0 : index
    %c1_158 = arith.constant 1 : index
    %c0_159 = arith.constant 0 : index
    %688 = vector.load %arg9[%c0_157, %c1_158, %c0_159] : memref<2x2x32xf32, #tpu.memory_space<vmem>>, vector<2x1x32xf32>
    %689 = vector.shape_cast %688 : vector<2x1x32xf32> to vector<2x32xf32>
    %690 = vector.shape_cast %651 : vector<2x32xf32> to vector<2x1x32xf32>
    tpu.vector_store %arg9[%c0_157, %c1_158, %c0_159], %690 {strides = array<i32>} : memref<2x2x32xf32, #tpu.memory_space<vmem>>, vector<2x1x32xf32>,
    %c0_160 = arith.constant 0 : index
    %c1_161 = arith.constant 1 : index
    %c0_162 = arith.constant 0 : index
    %691 = vector.load %arg10[%c0_160, %c1_161, %c0_162] : memref<2x2x32xf32, #tpu.memory_space<vmem>>, vector<2x1x32xf32>
    %692 = vector.shape_cast %691 : vector<2x1x32xf32> to vector<2x32xf32>
    %693 = vector.shape_cast %648 : vector<2x32xf32> to vector<2x1x32xf32>
    tpu.vector_store %arg10[%c0_160, %c1_161, %c0_162], %693 {strides = array<i32>} : memref<2x2x32xf32, #tpu.memory_space<vmem>>, vector<2x1x32xf32>,
    return
  }
  func.func @transform_0(%arg0: i32) -> (i32, i32, i32) {
    %c0_i32 = arith.constant 0 : i32
    %c0_i32_0 = arith.constant 0 : i32
    %c0_i32_1 = arith.constant 0 : i32
    return %arg0, %c0_i32, %c0_i32_0 : i32, i32, i32
  }
  func.func @transform_1(%arg0: i32) -> (i32, i32, i32) {
    %c0_i32 = arith.constant 0 : i32
    %c0_i32_0 = arith.constant 0 : i32
    %c0_i32_1 = arith.constant 0 : i32
    return %arg0, %c0_i32, %c0_i32_0 : i32, i32, i32
  }
  func.func @transform_2(%arg0: i32) -> (i32, i32) {
    %c0_i32 = arith.constant 0 : i32
    %c0_i32_0 = arith.constant 0 : i32
    %c0_i32_1 = arith.constant 0 : i32
    return %c0_i32, %c0_i32_0 : i32, i32
  }
  func.func @transform_3(%arg0: i32) -> (i32, i32, i32) {
    %c0_i32 = arith.constant 0 : i32
    %c0_i32_0 = arith.constant 0 : i32
    %c0_i32_1 = arith.constant 0 : i32
    %c0_i32_2 = arith.constant 0 : i32
    return %c0_i32, %c0_i32_0, %c0_i32_1 : i32, i32, i32
  }
  func.func @transform_4(%arg0: i32) -> (i32, i32, i32) {
    %c0_i32 = arith.constant 0 : i32
    %c0_i32_0 = arith.constant 0 : i32
    %c0_i32_1 = arith.constant 0 : i32
    %c0_i32_2 = arith.constant 0 : i32
    return %c0_i32, %c0_i32_0, %c0_i32_1 : i32, i32, i32
  }
  func.func @transform_5(%arg0: i32) -> (i32, i32) {
    %c0_i32 = arith.constant 0 : i32
    %c0_i32_0 = arith.constant 0 : i32
    %c0_i32_1 = arith.constant 0 : i32
    return %c0_i32, %c0_i32_0 : i32, i32
  }
  func.func @transform_6(%arg0: i32) -> (i32, i32) {
    %c0_i32 = arith.constant 0 : i32
    %c0_i32_0 = arith.constant 0 : i32
    %c0_i32_1 = arith.constant 0 : i32
    return %c0_i32, %c0_i32_0 : i32, i32
  }
  func.func @transform_7(%arg0: i32) -> (i32, i32, i32) {
    %c0_i32 = arith.constant 0 : i32
    %c0_i32_0 = arith.constant 0 : i32
    %c0_i32_1 = arith.constant 0 : i32
    return %arg0, %c0_i32, %c0_i32_0 : i32, i32, i32
  }
  func.func @transform_8(%arg0: i32) -> (i32, i32, i32) {
    %c0_i32 = arith.constant 0 : i32
    %c0_i32_0 = arith.constant 0 : i32
    %c0_i32_1 = arith.constant 0 : i32
    return %arg0, %c0_i32, %c0_i32_0 : i32, i32, i32
  }
  func.func @transform_9(%arg0: i32) -> (i32, i32, i32) {
    %c0_i32 = arith.constant 0 : i32
    %c0_i32_0 = arith.constant 0 : i32
    %c0_i32_1 = arith.constant 0 : i32
    return %arg0, %c0_i32, %c0_i32_0 : i32, i32, i32
  }
}

</mosaic_0001>

<bundles_post_ra>
// kernel: tpu_custom_call.1
= control target key start
LH: loop header
LB: loop body
LE: loop exit
PB: predicated region body
PF: predicated region fallthrough
CT: control target
= control target key end

     0   :  { %15 = vsyncpa [#allocation3], 0  ;;  %s5315_s0 = inlined_call_operand.vmem [shape: f32[2,2,32], index: 0, kind: input, shape index: {}]   ;;  %s5316_s1 = inlined_call_operand.hbm [shape: f32[2,2,32], index: 1, kind: input, shape index: {}]   ;;  %s5317_s2 = inlined_call_operand.vmem [shape: f32[40,128], index: 2, kind: input, shape index: {}]   ;;  %s5318_s3 = inlined_call_operand.hbm [shape: f32[1,64,128], index: 3, kind: input, shape index: {}]   ;;  %s5319_s4 = inlined_call_operand.vmem [shape: f32[2,1,128], index: 4, kind: input, shape index: {}]   ;;  %s5320_s5 = inlined_call_operand.vmem [shape: f32[32,8], index: 5, kind: input, shape index: {}]   ;;  %s5321_s6 = inlined_call_operand.vmem [shape: f32[1,8], index: 6, kind: input, shape index: {}]   ;;  %s5322_s7 = inlined_call_operand.hbm [shape: f32[2,8,8], index: 7, kind: output, shape index: {0}]   ;;  %s5323_s8 = inlined_call_operand.hbm [shape: f32[2,2,32], index: 8, kind: output, shape index: {1}]   ;;  %s5324_s9 = inlined_call_operand.hbm [shape: f32[2,2,32], index: 9, kind: output, shape index: {2}]  }
   0x1   :  { %16 = vsyncpa [#allocation6], 0 }
   0x2   :  { %17 = vsyncpa [#allocation4], 0 }
   0x3   :  { %18 = vsyncpa [#allocation9], 0  ;;  %s4305_s30 = smov [#allocation2]   ;;  %s4187_s13 = scalar_lea.hbm %s5316_s1, 64 }
   0x4   :  { %s26_s10 = sshll.u32 %s4305_s30, 4  ;;  %p4188_p0 = scmp.ne.s32.totalorder %s5316_s1, %s4187_s13  ;;  %s27_s10 = int_to_ptr.vmem [resolvable:$true] %s26_s10 }
   0x5   :  { %p4191_p1 = scmp.lt.u32.totalorder %s4187_s13, %s5316_s1 }
   0x7   :  { %p4193_p2 = pnand %p4191_p1, %p4188_p0 }
   0x9   :  { %4196 = shalt.err (!%p4193_p2)
}
   0xa   :  { %s4197_s18 = scalar_lea.vmem %s27_s10, 64  ;;  %p4202_p4 = scmp.lt.s32.totalorder %s27_s10, %s27_s10 }
   0xb   :  { %p4198_p3 = scmp.ne.s32.totalorder %s27_s10, %s4197_s18  ;;  %p4203_p5 = scmp.lt.s32.totalorder %s4197_s18, %s4197_s18 }
   0xd   :  { %p4204_p6 = por %p4203_p5, %p4202_p4 }
   0xf   :  { %p4205_p7 = pnand %p4204_p6, %p4198_p3 }
  0x11   :  { %4208 = shalt.err (!%p4205_p7)
}
  0x12   :  { %s4306_s19 = smov 32   ;;  %s4307_s20 = smov 2  }
  0x13   :  { %32 = dma.hbm_to_vmem [thread:$0]  %s5316_s1, 64, %s27_s10, [#allocation3], %s4306_s19, %s4306_s19, %s4307_s20  }
  0x14   :  { %s4308_s23 = smov [#allocation5]   ;;  %s4209_s27 = scalar_lea.hbm %s5318_s3, 1024 }
  0x15   :  { %s40_s24 = sshll.u32 %s4308_s23, 4  ;;  %p4210_p8 = scmp.ne.s32.totalorder %s5318_s3, %s4209_s27  ;;  %s41_s24 = int_to_ptr.vmem [resolvable:$true] %s40_s24 }
  0x16   :  { %p4213_p9 = scmp.lt.u32.totalorder %s4209_s27, %s5318_s3 }
  0x18   :  { %p4215_p10 = pnand %p4213_p9, %p4210_p8 }
  0x1a   :  { %4218 = shalt.err (!%p4215_p10)
}
  0x1b   :  { %s4219_s12 = scalar_lea.vmem %s41_s24, 1024  ;;  %p4224_p12 = scmp.lt.s32.totalorder %s41_s24, %s41_s24 }
  0x1c   :  { %p4220_p11 = scmp.ne.s32.totalorder %s41_s24, %s4219_s12  ;;  %p4225_p13 = scmp.lt.s32.totalorder %s4219_s12, %s4219_s12 }
  0x1e   :  { %p4226_p0 = por %p4225_p13, %p4224_p12 }
  0x20   :  { %p4227_p1 = pnand %p4226_p0, %p4220_p11 }
  0x22   :  { %4230 = shalt.err (!%p4227_p1)
}
  0x23   :  { %s4309_s1 = smov 128   ;;  %s4310_s10 = smov 8  }
  0x24   :  { %46 = dma.hbm_to_vmem [thread:$0]  %s5318_s3, 1024, %s41_s24, [#allocation6], %s4309_s1, %s4309_s1, %s4310_s10  }
  0x25   :  { %4297 = dma.done.wait [#allocation3], 64  }
  0x26   :  { %4298 = vsyncadd [#allocation3], 4294967232 }
  0x27   :  { %4299 = dma.done.wait [#allocation6], 1024  }
  0x28   :  { %4300 = vsyncadd [#allocation6], 4294966272  ;;  %v4311_v0 = vmov 0.0|0.0   ;;  %vm4312_vm0 = vmmov 0   ;;  %v4313_v1 = vmov 0.0   ;;  %vm97_vm1 = vcmask 1041409  }
  0x29   :  { %3755 = vmatprep.subr.bf16.mxu0 %v4311_v0  ;;  %3761 = vmatprep.subr.bf16.mxu1 %v4311_v0  ;;  %v86_v2 = vld [vmem:[%s5315_s0] sm:$0x1]  ;;  %v87_v3 = vld [vmem:[%s5315_s0 + $0x2] sm:$0x1]  ;;  %v60_v6 = vld [vmem:[%s5317_s2 + $0x8] sm:$0xff]  ;;  %v80_v17 = vlaneseq  ;;  %vm102_vm3 = vcmask 56320  }
  0x2a   :  { %3421 = vmatprep.mubr.msk.f32.mxu0 %vm4312_vm0, %v4313_v1  ;;  %3440 = vmatprep.mubr.msk.f32.mxu1 %vm4312_vm0, %v4313_v1  ;;  %v59_v4 = vld [vmem:[%s5317_s2] sm:$0xff]  ;;  %v96_v5 = vrot.slane %v87_v3, 7  ;;  %v61_v7 = vld [vmem:[%s5317_s2 + $0x10] sm:$0xff]  ;;  %v62_v8 = vld [vmem:[%s5317_s2 + $0x18] sm:$0xff]  ;;  %vm104_vm4 = vcmask 64512   ;;  %vm112_vm5 = vcmask 326656  }
  0x2b   :  { %v4425_v9 = vpack.c.bf16 %v60_v6, %v59_v4  ;;  %v90_v10 = vld [vmem:[#allocation2] sm:$0x1]  ;;  %v91_v11 = vld [vmem:[#allocation2 + $0x2] sm:$0x1]  ;;  %v4430_v14 = vpack.c.bf16 %v62_v8, %v61_v7  ;;  %v4445_v18 = vand.u32 127, %v80_v17  ;;  %s4314_s12 = smov 64  }
  0x2c   :  { %v98_v12 = vsel %vm97_vm1, %v96_v5, %v86_v2  ;;  %v195_v13 = vrot.slane %v91_v11, 7  ;;  %v4440_v16 = vld [vmem:[%s5317_s2 + $0x20] sm:$0xff]  ;;  %v65_v39 = vld [vmem:[#allocation5 + $0x8] sm:$0xff]  ;;  %v66_v40 = vld [vmem:[#allocation5 + $0x10] sm:$0xff]  ;;  %vm228_vm6 = vcmask 261120   ;;  %vm236_vm7 = vcmask 523264  }
  0x2d   :  { %99 = vrot.lane.b32.xlu0 %v98_v12, %s4310_s10  ;;  %3757 = vmatpush3.bf16.msra.mxu0 %v4425_v9  ;;  %vm83_vm2 = vcmp.eq.s32.totalorder %v4445_v18, 0  ;;  %v4457_v23 = vld [vmem:[%s5319_s4] ss:$0 sm:$0xff]  ;;  %v64_v38 = vld [vmem:[#allocation5] sm:$0xff]  ;;  %v69_v45 = vld [vmem:[#allocation5 + $0x28] sm:$0xff]  ;;  %vm82_vm8 = vcmp.eq.s32.totalorder %v4445_v18, 7 }
  0x2e   :  { %3758 = vmatprep.subr.bf16.mxu0 %v4311_v0  ;;  %v196_v15 = vsel %vm97_vm1, %v195_v13, %v90_v10  ;;  %v3193_v19 = vsel %vm83_vm2, 1.0, %v4313_v1  ;;  %v4465_v41 = vpack.c.bf16 %v65_v39, %v64_v38  ;;  %v67_v42 = vld [vmem:[#allocation5 + $0x18] sm:$0xff]  ;;  %v68_v44 = vld [vmem:[#allocation5 + $0x20] sm:$0xff]  ;;  %v70_v49 = vld [vmem:[#allocation5 + $0x30] sm:$0xff]  ;;  %vm423_vm9 = vcmask 58368   ;;  %s4315_s28 = smov 40  }
  0x2f   :  { %197 = vrot.lane.b32.xlu1 %v196_v15, %s4306_s19  ;;  %v103_v20 = vsel %vm102_vm3, %v3193_v19, 0.0  ;;  %v4468_v43 = vpack.c.bf16 %v67_v42, %v66_v40  ;;  %v89_v46 = vld [vmem:[%s5315_s0 + $0x3] sm:$0x1]  ;;  %v4475_v47 = vpack.c.bf16 %v69_v45, %v68_v44  ;;  %v88_v51 = vld [vmem:[%s5315_s0 + $0x1] sm:$0x1] }
  0x30   :  { %3763 = vmatpush3.bf16.msra.mxu1 %v4465_v41  ;;  %v223_v48 = vrot.slane %v89_v46, 7  ;;  %v71_v50 = vld [vmem:[#allocation5 + $0x38] sm:$0xff] }
  0x31   :  { %3760 = vmatpush3.bf16.msra.mxu0 %v4430_v14  ;;  %3764 = vmatprep.subr.bf16.mxu1 %v4311_v0  ;;  %v4483_v53 = vpack.c.bf16 %v71_v50, %v70_v49  ;;  %v92_v55 = vld [vmem:[#allocation2 + $0x1] sm:$0x1]  ;;  %v93_v56 = vld [vmem:[#allocation2 + $0x3] sm:$0x1] }
  0x32   :  { %3419 = vmatprep.subr.mxu0 %v4313_v1  ;;  %v224_v54 = vsel %vm97_vm1, %v223_v48, %v88_v51  ;;  %v319_v57 = vrot.slane %v93_v56, 7  ;;  %v4509_v2 = vld [vmem:[%s5319_s4 + $0x1] ss:$0 sm:$0xff] }
  0x34   :  { %3766 = vmatpush3.bf16.msra.mxu1 %v4468_v43  ;;  %v320_v58 = vsel %vm97_vm1, %v319_v57, %v92_v55 }
  0x35   :  { %3420 = vmatpush3.msra.mxu0 %v4440_v16  ;;  %3767 = vmatprep.subr.bf16.mxu1 %v4311_v0 }
  0x36   :  { %3773 = vmatprep.subr.bf16.mxu0 %v4311_v0 }
  0x38   :  { %3769 = vmatpush3.bf16.msra.mxu1 %v4475_v47 }
  0x39   :  { %3770 = vmatprep.subr.bf16.mxu1 %v4311_v0 }
  0x3c   :  { %3772 = vmatpush3.bf16.msra.mxu1 %v4483_v53 }
  0x3d   :  { %3779 = vmatprep.subr.bf16.mxu1 %v4311_v0 }
  0x9f   :  { %v100_v21 = vpop.permute.xlu0 %99 }
  0xa0   :  { %v105_v22 = vsel %vm104_vm4, %v103_v20, %v100_v21 }
  0xa1   :  { %3422 = vmatmul.mubr.msk.f32.vlgmr.msra.gmra.mrb[0].mxu0 %vm112_vm5, %v105_v22  ;;  %v198_v34 = vpop.permute.xlu1 %197  ;;  %v75_v22 = vld [vmem:[%s5320_s5] sm:$0xff] }
  0xa2   :  { %3451 = vmatprep.mubr.msk.f32.mxu0 %vm4312_vm0, %v4313_v1 }
 0x174   :  { %v182_v24 = vpop.f32.mrb[0].mxu0 }
 0x175   :  { %v183_v25 = vadd.f32 %v4457_v23, %v182_v24  ;;  %v3423_v26 = vpop.f32.mrb[1].mxu0  ;;  %v76_v24 = vld [vmem:[%s5320_s5 + $0x8] sm:$0xff] }
 0x176   :  { %v4526_v26 = vpack.c.bf16 %v76_v24, %v75_v22 }
 0x177   :  { %3963 = vtanh.f32 %v183_v25  ;;  %v3196_v28 = vmul.f32 -1.442695, %v183_v25  ;;  %v77_v25 = vld [vmem:[%s5320_s5 + $0x10] sm:$0xff] }
 0x178   :  { %3775 = vmatpush3.bf16.msra.mxu0 %v4526_v26 }
 0x179   :  { %3965 = vpow2.f32 %v3196_v28  ;;  %3776 = vmatprep.subr.bf16.mxu0 %v4311_v0 }
 0x181   :  { %v3964_v27 = vpop.eup %3963 }
 0x182   :  { %202 = vrot.lane.b32.xlu0 %v3964_v27, %s4314_s12  ;;  %v78_v27 = vld [vmem:[%s5320_s5 + $0x18] sm:$0xff] }
 0x183   :  { %v3966_v29 = vpop.eup %3965  ;;  %v4532_v28 = vpack.c.bf16 %v78_v27, %v77_v25 }
 0x184   :  { %v189_v30 = vadd.f32 1.0, %v3966_v29 }
 0x185   :  { %3778 = vmatpush3.bf16.msra.mxu0 %v4532_v28 }
 0x186   :  { %3967 = vrcp.f32 %v189_v30  ;;  %3785 = vmatprep.subr.bf16.mxu0 %v4311_v0 }
 0x190   :  { %v3968_v31 = vpop.eup %3967 }
 0x191   :  { %v200_v35 = vmul.f32 %v3968_v31, %v198_v34 }
 0x1f4   :  { %v203_v32 = vpop.permute.xlu0 %202 }
 0x1f5   :  { %v205_v33 = vmul.f32 %v3968_v31, %v203_v32 }
 0x1f7   :  { %207 = vrot.lane.b32.xlu1 %v205_v33, %s4306_s19  ;;  %v4556_v33 = vld [vmem:[%s5321_s6] ss:$0 sm:$0xff] }
 0x269   :  { %v208_v36 = vpop.permute.xlu1 %207 }
 0x26a   :  { %v4462_v37 = vadd.f32 %v208_v36, %v200_v35 }
 0x26c   :  { %3969 = vtanh.f32 %v4462_v37 }
 0x276   :  { %v3970_v52 = vpop.eup %3969 }
 0x277   :  { %213 = vrot.lane.b32.xlu0 %v3970_v52, %s4314_s12 }
 0x27b   :  { %225 = vrot.lane.b32.xlu0 %v224_v54, %s4306_s19 }
 0x27f   :  { %321 = vrot.lane.b32.xlu0 %v320_v58, %s4306_s19 }
 0x2e9   :  { %v214_v59 = vpop.permute.xlu0 %213 }
 0x2ea   :  { %v4492_v60 = vmul.f32 %v3968_v31, %v214_v59 }
 0x2ec   :  { %218 = vrot.lane.b32.xlu1 %v4492_v60, %s4306_s19 }
 0x2ed   :  { %v226_v61 = vpop.permute.xlu0 %225 }
 0x2f1   :  { %v322_v15 = vpop.permute.xlu0 %321 }
 0x35e   :  { %v219_v62 = vpop.permute.xlu1 %218 }
 0x35f   :  { %v229_v63 = vsel %vm228_vm6, %v219_v62, %v226_v61 }
 0x360   :  { %3441 = vmatmul.mubr.msk.f32.vlgmr.msra.gmra.mrb[0].mxu1 %vm236_vm7, %v229_v63 }
 0x361   :  { %3781 = vmatpush3.bf16.msra.mxu1 %v4425_v9  ;;  %3464 = vmatprep.mubr.msk.f32.mxu1 %vm4312_vm0, %v4313_v1 }
 0x362   :  { %3782 = vmatprep.subr.bf16.mxu1 %v4311_v0 }
 0x365   :  { %3784 = vmatpush3.bf16.msra.mxu1 %v4430_v14 }
 0x366   :  { %3462 = vmatprep.subr.mxu1 %v4313_v1 }
 0x369   :  { %3463 = vmatpush3.msra.mxu1 %v4440_v16 }
 0x36a   :  { %3797 = vmatprep.subr.bf16.mxu1 %v4311_v0 }
 0x433   :  { %v306_v3 = vpop.f32.mrb[0].mxu1 }
 0x434   :  { %v307_v4 = vadd.f32 %v4509_v2, %v306_v3  ;;  %v3442_v5 = vpop.f32.mrb[1].mxu1 }
 0x436   :  { %3971 = vtanh.f32 %v307_v4  ;;  %v3199_v7 = vmul.f32 -1.442695, %v307_v4 }
 0x438   :  { %3973 = vpow2.f32 %v3199_v7 }
 0x440   :  { %v3972_v6 = vpop.eup %3971 }
 0x441   :  { %326 = vrot.lane.b32.xlu1 %v3972_v6, %s4314_s12 }
 0x442   :  { %v3974_v8 = vpop.eup %3973 }
 0x443   :  { %v313_v10 = vadd.f32 1.0, %v3974_v8 }
 0x445   :  { %3975 = vrcp.f32 %v313_v10 }
 0x44f   :  { %v3976_v11 = vpop.eup %3975 }
 0x450   :  { %v324_v19 = vmul.f32 %v3976_v11, %v322_v15 }
 0x4b3   :  { %v327_v12 = vpop.permute.xlu1 %326 }
 0x4b4   :  { %v329_v13 = vmul.f32 %v3976_v11, %v327_v12 }
 0x4b6   :  { %331 = vrot.lane.b32.xlu1 %v329_v13, %s4306_s19 }
 0x528   :  { %v332_v20 = vpop.permute.xlu1 %331 }
 0x529   :  { %v4514_v21 = vadd.f32 %v332_v20, %v324_v19 }
 0x52b   :  { %3977 = vtanh.f32 %v4514_v21 }
 0x535   :  { %v3978_v29 = vpop.eup %3977 }
 0x536   :  { %337 = vrot.lane.b32.xlu0 %v3978_v29, %s4314_s12 }
 0x5a8   :  { %v338_v30 = vpop.permute.xlu0 %337 }
 0x5a9   :  { %v4538_v31 = vmul.f32 %v3976_v11, %v338_v30 }
 0x5ab   :  { %348 = vrot.lane.b32.xlu1 %v4538_v31, %s4306_s19 }
 0x61d   :  { %v349_v32 = vpop.permute.xlu1 %348 }
 0x61e   :  { %3452 = vmatmul.mubr.msk.f32.vlgmr.msra.gmra.mrb[2].mxu0 %vm228_vm6, %v349_v32 }
 0x61f   :  { %3787 = vmatpush3.bf16.msra.mxu0 %v4465_v41  ;;  %3483 = vmatprep.mubr.msk.f32.mxu0 %vm4312_vm0, %v4313_v1 }
 0x620   :  { %3788 = vmatprep.subr.bf16.mxu0 %v4311_v0 }
 0x623   :  { %3790 = vmatpush3.bf16.msra.mxu0 %v4468_v43 }
 0x624   :  { %3791 = vmatprep.subr.bf16.mxu0 %v4311_v0 }
 0x627   :  { %3793 = vmatpush3.bf16.msra.mxu0 %v4475_v47 }
 0x628   :  { %3794 = vmatprep.subr.bf16.mxu0 %v4311_v0 }
 0x62b   :  { %3796 = vmatpush3.bf16.msra.mxu0 %v4483_v53 }
 0x62c   :  { %3803 = vmatprep.subr.bf16.mxu0 %v4311_v0 }
 0x6f1   :  { %v418_v34 = vpop.f32.mrb[2].mxu0 }
 0x6f2   :  { %v4560_v35 = vadd.f32 %v4556_v33, %v418_v34  ;;  %v3453_v36 = vpop.f32.mrb[3].mxu0 }
 0x6f4   :  { %v4565_v38 = vsel %vm82_vm8, -inf, %v4560_v35  ;;  %v3203_v52 = vmul.f32 -1.442695, %v4560_v35 }
 0x6f5   :  { %v424_v39 = vsel %vm423_vm9, %v4565_v38, -inf }
 0x6f6   :  { %425 = vmax.xlane.f32.xlu0 %v424_v39  ;;  %3979 = vpow2.f32 %v3203_v52 }
 0x700   :  { %v3980_v54 = vpop.eup %3979 }
 0x701   :  { %v470_v55 = vadd.f32 1.0, %v3980_v54 }
 0x703   :  { %3981 = vrcp.f32 %v470_v55 }
 0x70d   :  { %v3982_v62 = vpop.eup %3981 }
 0x783   :  { %v4569_v40 = vpop.xlane.xlu0 %425 }
 0x784   :  { %vm447_vm10 = vcmp.eq.f32.partialorder %v4565_v38, %v4569_v40 }
 0x785   :  { %v448_v42 = vsel %vm447_vm10, %v4445_v18, 8 }
 0x786   :  { %v449_v44 = vsel %vm423_vm9, %v448_v42, 2147483647 }
 0x787   :  { %v451_v45 = vshra.s32 %v449_v44, 16  ;;  %v450_v48 = vand.u32 65535, %v449_v44 }
 0x789   :  { %v453_v46 = vcvt.s32.f32 %v451_v45  ;;  %v452_v50 = vcvt.s32.f32 %v450_v48 }
 0x78b   :  { %454 = vmin.xlane.f32.xlu1 %v453_v46 }
 0x818   :  { %v455_v49 = vpop.xlane.xlu1 %454 }
 0x819   :  { %vm456_vm11 = vcmp.eq.f32.partialorder %v453_v46, %v455_v49  ;;  %v461_v56 = vcvt.f32.s32 %v455_v49 }
 0x81a   :  { %v457_v51 = vsel %vm456_vm11, %v452_v50, inf }
 0x81b   :  { %458 = vmin.xlane.f32.xlu0 %v457_v51  ;;  %v462_v58 = vshll.u32 %v461_v56, 16 }
 0x831   :  { %501 = vrot.lane.b32.xlu0 %v4492_v60, %s4315_s28 }
 0x8a8   :  { %v459_v57 = vpop.xlane.xlu0 %458 }
 0x8a9   :  { %v460_v59 = vcvt.f32.s32 %v459_v57 }
 0x8ab   :  { %v463_v61 = vadd.s32 %v462_v58, %v460_v59 }
 0x8ac   :  { %v502_v4 = vpop.permute.xlu0 %501 }
 0x8ad   :  { %vm464_vm12 = vcmp.eq.s32.totalorder %v4445_v18, %v463_v61 }
 0x8ae   :  { %v3202_v63 = vsel %vm464_vm12, 1.0, %v4313_v1 }
 0x8af   :  { %v504_v3 = vsel %vm102_vm3, %v3202_v63, %v3982_v62 }
 0x8b0   :  { %v505_v60 = vsel %vm104_vm4, %v504_v3, %v502_v4 }
 0x8b1   :  { %3465 = vmatmul.mubr.msk.f32.vlgmr.msra.gmra.mrb[2].mxu1 %vm112_vm5, %v505_v60 }
 0x8b2   :  { %3799 = vmatpush3.bf16.msra.mxu1 %v4526_v26  ;;  %3494 = vmatprep.mubr.msk.f32.mxu1 %vm4312_vm0, %v4313_v1 }
 0x8b3   :  { %3800 = vmatprep.subr.bf16.mxu1 %v4311_v0 }
 0x8b6   :  { %3802 = vmatpush3.bf16.msra.mxu1 %v4532_v28 }
 0x8b7   :  { %3809 = vmatprep.subr.bf16.mxu1 %v4311_v0 }
 0x984   :  { %v575_v5 = vpop.f32.mrb[2].mxu1 }
 0x985   :  { %v576_v6 = vadd.f32 %v4457_v23, %v575_v5  ;;  %v3466_v7 = vpop.f32.mrb[3].mxu1 }
 0x987   :  { %3983 = vtanh.f32 %v576_v6  ;;  %v3205_v10 = vmul.f32 -1.442695, %v576_v6 }
 0x989   :  { %3985 = vpow2.f32 %v3205_v10 }
 0x991   :  { %v3984_v8 = vpop.eup %3983 }
 0x992   :  { %588 = vrot.lane.b32.xlu1 %v3984_v8, %s4314_s12 }
 0x993   :  { %v3986_v11 = vpop.eup %3985 }
 0x994   :  { %v582_v12 = vadd.f32 1.0, %v3986_v11 }
 0x996   :  { %3987 = vrcp.f32 %v582_v12 }
 0x9a0   :  { %v3988_v13 = vpop.eup %3987 }
 0x9a1   :  { %v586_v20 = vmul.f32 %v3988_v13, %v4462_v37 }
 0xa04   :  { %v589_v15 = vpop.permute.xlu1 %588 }
 0xa05   :  { %v591_v19 = vmul.f32 %v3988_v13, %v589_v15 }
 0xa07   :  { %593 = vrot.lane.b32.xlu1 %v591_v19, %s4306_s19 }
 0xa79   :  { %v594_v22 = vpop.permute.xlu1 %593 }
 0xa7a   :  { %v4593_v24 = vadd.f32 %v594_v22, %v586_v20 }
 0xa7c   :  { %3989 = vtanh.f32 %v4593_v24 }
 0xa86   :  { %v3990_v25 = vpop.eup %3989 }
 0xa87   :  { %599 = vrot.lane.b32.xlu0 %v3990_v25, %s4314_s12 }
 0xa8b   :  { %607 = vrot.lane.b32.xlu0 %v4538_v31, %s4314_s12 }
 0xaf9   :  { %v600_v27 = vpop.permute.xlu0 %599 }
 0xafa   :  { %v602_v29 = vmul.f32 %v3988_v13, %v600_v27 }
 0xafc   :  { %604 = vrot.lane.b32.xlu1 %v602_v29, %s4306_s19 }
 0xafd   :  { %v608_v30 = vpop.permute.xlu0 %607 }
 0xb6e   :  { %v605_v32 = vpop.permute.xlu1 %604 }
 0xb6f   :  { %v610_v34 = vsel %vm228_vm6, %v605_v32, %v608_v30 }
 0xb70   :  { %3484 = vmatmul.mubr.msk.f32.vlgmr.msra.gmra.mrb[4].mxu0 %vm236_vm7, %v610_v34 }
 0xb71   :  { %3805 = vmatpush3.bf16.msra.mxu0 %v4425_v9  ;;  %3507 = vmatprep.mubr.msk.f32.mxu0 %vm4312_vm0, %v4313_v1 }
 0xb72   :  { %3806 = vmatprep.subr.bf16.mxu0 %v4311_v0 }
 0xb75   :  { %3808 = vmatpush3.bf16.msra.mxu0 %v4430_v14 }
 0xb76   :  { %3505 = vmatprep.subr.mxu0 %v4313_v1 }
 0xb79   :  { %3506 = vmatpush3.msra.mxu0 %v4440_v16 }
 0xb7a   :  { %3821 = vmatprep.subr.bf16.mxu0 %v4311_v0 }
 0xc43   :  { %v680_v37 = vpop.f32.mrb[4].mxu0 }
 0xc44   :  { %v681_v31 = vadd.f32 %v4509_v2, %v680_v37  ;;  %v3485_v36 = vpop.f32.mrb[5].mxu0 }
 0xc46   :  { %3991 = vtanh.f32 %v681_v31  ;;  %v3207_v42 = vmul.f32 -1.442695, %v681_v31 }
 0xc48   :  { %3993 = vpow2.f32 %v3207_v42 }
 0xc50   :  { %v3992_v39 = vpop.eup %3991 }
 0xc51   :  { %693 = vrot.lane.b32.xlu1 %v3992_v39, %s4314_s12 }
 0xc52   :  { %v3994_v44 = vpop.eup %3993 }
 0xc53   :  { %v687_v45 = vadd.f32 1.0, %v3994_v44 }
 0xc55   :  { %3995 = vrcp.f32 %v687_v45 }
 0xc5f   :  { %v3996_v46 = vpop.eup %3995 }
 0xc60   :  { %v691_v50 = vmul.f32 %v3996_v46, %v4514_v21 }
 0xcc3   :  { %v694_v48 = vpop.permute.xlu1 %693 }
 0xcc4   :  { %v696_v49 = vmul.f32 %v3996_v46, %v694_v48 }
 0xcc6   :  { %698 = vrot.lane.b32.xlu0 %v696_v49, %s4306_s19 }
 0xd38   :  { %v699_v51 = vpop.permute.xlu0 %698 }
 0xd39   :  { %v4614_v52 = vadd.f32 %v699_v51, %v691_v50 }
 0xd3b   :  { %3997 = vtanh.f32 %v4614_v52 }
 0xd45   :  { %v3998_v54 = vpop.eup %3997 }
 0xd46   :  { %704 = vrot.lane.b32.xlu1 %v3998_v54, %s4314_s12 }
 0xdb8   :  { %v705_v55 = vpop.permute.xlu1 %704 }
 0xdb9   :  { %v4618_v56 = vmul.f32 %v3996_v46, %v705_v55 }
 0xdbb   :  { %709 = vrot.lane.b32.xlu0 %v4618_v56, %s4306_s19 }
 0xe2d   :  { %v710_v57 = vpop.permute.xlu0 %709 }
 0xe2e   :  { %3495 = vmatmul.mubr.msk.f32.vlgmr.msra.gmra.mrb[4].mxu1 %vm228_vm6, %v710_v57 }
 0xe2f   :  { %3811 = vmatpush3.bf16.msra.mxu1 %v4465_v41  ;;  %3526 = vmatprep.mubr.msk.f32.mxu1 %vm4312_vm0, %v4313_v1 }
 0xe30   :  { %3812 = vmatprep.subr.bf16.mxu1 %v4311_v0 }
 0xe33   :  { %3814 = vmatpush3.bf16.msra.mxu1 %v4468_v43 }
 0xe34   :  { %3815 = vmatprep.subr.bf16.mxu1 %v4311_v0 }
 0xe37   :  { %3817 = vmatpush3.bf16.msra.mxu1 %v4475_v47 }
 0xe38   :  { %3818 = vmatprep.subr.bf16.mxu1 %v4311_v0 }
 0xe3b   :  { %3820 = vmatpush3.bf16.msra.mxu1 %v4483_v53 }
 0xe3c   :  { %3827 = vmatprep.subr.bf16.mxu1 %v4311_v0 }
 0xf01   :  { %v779_v21 = vpop.f32.mrb[4].mxu1 }
 0xf02   :  { %v4634_v58 = vadd.f32 %v4556_v33, %v779_v21  ;;  %v3496_v59 = vpop.f32.mrb[5].mxu1 }
 0xf04   :  { %v4639_v61 = vsel %vm82_vm8, -inf, %v4634_v58  ;;  %v3210_v11 = vmul.f32 -1.442695, %v4634_v58 }
 0xf05   :  { %v784_v62 = vsel %vm423_vm9, %v4639_v61, -inf }
 0xf06   :  { %785 = vmax.xlane.f32.xlu1 %v784_v62  ;;  %3999 = vpow2.f32 %v3210_v11 }
 0xf10   :  { %v4000_v12 = vpop.eup %3999 }
 0xf11   :  { %v830_v13 = vadd.f32 1.0, %v4000_v12 }
 0xf13   :  { %4001 = vrcp.f32 %v830_v13 }
 0xf17   :  { %860 = vrot.lane.b32.xlu1 %v602_v29, %s4315_s28 }
 0xf1d   :  { %v4002_v27 = vpop.eup %4001 }
 0xf93   :  { %v4644_v63 = vpop.xlane.xlu1 %785 }
 0xf94   :  { %vm807_vm13 = vcmp.eq.f32.partialorder %v4639_v61, %v4644_v63 }
 0xf95   :  { %v808_v3 = vsel %vm807_vm13, %v4445_v18, 8 }
 0xf96   :  { %v809_v4 = vsel %vm423_vm9, %v808_v3, 2147483647 }
 0xf97   :  { %v811_v60 = vshra.s32 %v809_v4, 16  ;;  %v810_v6 = vand.u32 65535, %v809_v4  ;;  %v861_v30 = vpop.permute.xlu1 %860 }
 0xf99   :  { %v813_v5 = vcvt.s32.f32 %v811_v60  ;;  %v812_v8 = vcvt.s32.f32 %v810_v6 }
 0xf9b   :  { %814 = vmin.xlane.f32.xlu0 %v813_v5 }
0x1028   :  { %v815_v7 = vpop.xlane.xlu0 %814 }
0x1029   :  { %vm816_vm14 = vcmp.eq.f32.partialorder %v813_v5, %v815_v7  ;;  %v821_v15 = vcvt.f32.s32 %v815_v7 }
0x102a   :  { %v817_v10 = vsel %vm816_vm14, %v812_v8, inf }
0x102b   :  { %818 = vmin.xlane.f32.xlu0 %v817_v10  ;;  %v822_v20 = vshll.u32 %v821_v15, 16 }
0x10b8   :  { %v819_v19 = vpop.xlane.xlu0 %818 }
0x10b9   :  { %v820_v22 = vcvt.f32.s32 %v819_v19 }
0x10bb   :  { %v823_v25 = vadd.s32 %v822_v20, %v820_v22 }
0x10bd   :  { %vm824_vm15 = vcmp.eq.s32.totalorder %v4445_v18, %v823_v25 }
0x10be   :  { %v3209_v29 = vsel %vm824_vm15, 1.0, %v4313_v1 }
0x10bf   :  { %v863_v32 = vsel %vm102_vm3, %v3209_v29, %v4002_v27 }
0x10c0   :  { %v864_v34 = vsel %vm104_vm4, %v863_v32, %v861_v30 }
0x10c1   :  { %3508 = vmatmul.mubr.msk.f32.vlgmr.msra.gmra.mrb[6].mxu0 %vm112_vm5, %v864_v34 }
0x10c2   :  { %3823 = vmatpush3.bf16.msra.mxu0 %v4526_v26  ;;  %3537 = vmatprep.mubr.msk.f32.mxu0 %vm4312_vm0, %v4313_v1 }
0x10c3   :  { %3824 = vmatprep.subr.bf16.mxu0 %v4311_v0 }
0x10c6   :  { %3826 = vmatpush3.bf16.msra.mxu0 %v4532_v28 }
0x10c7   :  { %3833 = vmatprep.subr.bf16.mxu0 %v4311_v0 }
0x1194   :  { %v934_v37 = vpop.f32.mrb[6].mxu0 }
0x1195   :  { %v935_v31 = vadd.f32 %v4457_v23, %v934_v37  ;;  %v3509_v36 = vpop.f32.mrb[7].mxu0 }
0x1197   :  { %4003 = vtanh.f32 %v935_v31  ;;  %v3212_v42 = vmul.f32 -1.442695, %v935_v31 }
0x1199   :  { %4005 = vpow2.f32 %v3212_v42 }
0x11a1   :  { %v4004_v39 = vpop.eup %4003 }
0x11a2   :  { %947 = vrot.lane.b32.xlu0 %v4004_v39, %s4314_s12 }
0x11a3   :  { %v4006_v44 = vpop.eup %4005 }
0x11a4   :  { %v941_v45 = vadd.f32 1.0, %v4006_v44 }
0x11a6   :  { %4007 = vrcp.f32 %v941_v45 }
0x11b0   :  { %v4008_v46 = vpop.eup %4007 }
0x11b1   :  { %v945_v50 = vmul.f32 %v4008_v46, %v4593_v24 }
0x1214   :  { %v948_v48 = vpop.permute.xlu0 %947 }
0x1215   :  { %v950_v49 = vmul.f32 %v4008_v46, %v948_v48 }
0x1217   :  { %952 = vrot.lane.b32.xlu1 %v950_v49, %s4306_s19 }
0x1289   :  { %v953_v51 = vpop.permute.xlu1 %952 }
0x128a   :  { %v4666_v54 = vadd.f32 %v953_v51, %v945_v50 }
0x128c   :  { %4009 = vtanh.f32 %v4666_v54 }
0x1296   :  { %v4010_v55 = vpop.eup %4009 }
0x1297   :  { %958 = vrot.lane.b32.xlu1 %v4010_v55, %s4314_s12 }
0x129b   :  { %966 = vrot.lane.b32.xlu1 %v4618_v56, %s4314_s12 }
0x1309   :  { %v959_v57 = vpop.permute.xlu1 %958 }
0x130a   :  { %v4672_v21 = vmul.f32 %v4008_v46, %v959_v57 }
0x130c   :  { %963 = vrot.lane.b32.xlu0 %v4672_v21, %s4306_s19 }
0x130d   :  { %v967_v59 = vpop.permute.xlu1 %966 }
0x137e   :  { %v964_v62 = vpop.permute.xlu0 %963 }
0x137f   :  { %v969_v24 = vsel %vm228_vm6, %v964_v62, %v967_v59 }
0x1380   :  { %3527 = vmatmul.mubr.msk.f32.vlgmr.msra.gmra.mrb[6].mxu1 %vm236_vm7, %v969_v24 }
0x1381   :  { %3829 = vmatpush3.bf16.msra.mxu1 %v4425_v9  ;;  %3550 = vmatprep.mubr.msk.f32.mxu1 %vm4312_vm0, %v4313_v1 }
0x1382   :  { %3830 = vmatprep.subr.bf16.mxu1 %v4311_v0 }
0x1385   :  { %3832 = vmatpush3.bf16.msra.mxu1 %v4430_v14 }
0x1386   :  { %3548 = vmatprep.subr.mxu1 %v4313_v1 }
0x1389   :  { %3549 = vmatpush3.msra.mxu1 %v4440_v16 }
0x138a   :  { %3845 = vmatprep.subr.bf16.mxu1 %v4311_v0 }
0x1453   :  { %v1039_v56 = vpop.f32.mrb[6].mxu1 }
0x1454   :  { %v1040_v3 = vadd.f32 %v4509_v2, %v1039_v56  ;;  %v3528_v4 = vpop.f32.mrb[7].mxu1 }
0x1456   :  { %4011 = vtanh.f32 %v1040_v3  ;;  %v3214_v5 = vmul.f32 -1.442695, %v1040_v3 }
0x1458   :  { %4013 = vpow2.f32 %v3214_v5 }
0x1460   :  { %v4012_v60 = vpop.eup %4011 }
0x1461   :  { %1052 = vrot.lane.b32.xlu0 %v4012_v60, %s4314_s12 }
0x1462   :  { %v4014_v6 = vpop.eup %4013 }
0x1463   :  { %v1046_v7 = vadd.f32 1.0, %v4014_v6 }
0x1465   :  { %4015 = vrcp.f32 %v1046_v7 }
0x146f   :  { %v4016_v8 = vpop.eup %4015 }
0x1470   :  { %v1050_v12 = vmul.f32 %v4016_v8, %v4614_v52 }
0x14d3   :  { %v1053_v10 = vpop.permute.xlu0 %1052 }
0x14d4   :  { %v1055_v11 = vmul.f32 %v4016_v8, %v1053_v10 }
0x14d6   :  { %1057 = vrot.lane.b32.xlu1 %v1055_v11, %s4306_s19 }
0x1548   :  { %v1058_v13 = vpop.permute.xlu1 %1057 }
0x1549   :  { %v4690_v15 = vadd.f32 %v1058_v13, %v1050_v12 }
0x154b   :  { %4017 = vtanh.f32 %v4690_v15 }
0x1555   :  { %v4018_v19 = vpop.eup %4017 }
0x1556   :  { %1063 = vrot.lane.b32.xlu0 %v4018_v19, %s4314_s12 }
0x15c8   :  { %v1064_v20 = vpop.permute.xlu0 %1063 }
0x15c9   :  { %v4694_v22 = vmul.f32 %v4016_v8, %v1064_v20 }
0x15cb   :  { %1068 = vrot.lane.b32.xlu1 %v4694_v22, %s4306_s19 }
0x163d   :  { %v1069_v25 = vpop.permute.xlu1 %1068 }
0x163e   :  { %3538 = vmatmul.mubr.msk.f32.vlgmr.msra.gmra.mrb[8].mxu0 %vm228_vm6, %v1069_v25 }
0x163f   :  { %3835 = vmatpush3.bf16.msra.mxu0 %v4465_v41  ;;  %3569 = vmatprep.mubr.msk.f32.mxu0 %vm4312_vm0, %v4313_v1 }
0x1640   :  { %3836 = vmatprep.subr.bf16.mxu0 %v4311_v0 }
0x1643   :  { %3838 = vmatpush3.bf16.msra.mxu0 %v4468_v43 }
0x1644   :  { %3839 = vmatprep.subr.bf16.mxu0 %v4311_v0 }
0x1647   :  { %3841 = vmatpush3.bf16.msra.mxu0 %v4475_v47 }
0x1648   :  { %3842 = vmatprep.subr.bf16.mxu0 %v4311_v0 }
0x164b   :  { %3844 = vmatpush3.bf16.msra.mxu0 %v4483_v53 }
0x164c   :  { %3851 = vmatprep.subr.bf16.mxu0 %v4311_v0 }
0x1711   :  { %v1138_v52 = vpop.f32.mrb[8].mxu0 }
0x1712   :  { %v4710_v27 = vadd.f32 %v4556_v33, %v1138_v52  ;;  %v3539_v29 = vpop.f32.mrb[9].mxu0 }
0x1714   :  { %v4715_v30 = vsel %vm82_vm8, -inf, %v4710_v27  ;;  %v3217_v48 = vmul.f32 -1.442695, %v4710_v27 }
0x1715   :  { %v1143_v32 = vsel %vm423_vm9, %v4715_v30, -inf }
0x1716   :  { %1144 = vmax.xlane.f32.xlu0 %v1143_v32  ;;  %4019 = vpow2.f32 %v3217_v48 }
0x1720   :  { %v4020_v49 = vpop.eup %4019 }
0x1721   :  { %v1189_v50 = vadd.f32 1.0, %v4020_v49 }
0x1723   :  { %4021 = vrcp.f32 %v1189_v50 }
0x172d   :  { %v4022_v24 = vpop.eup %4021 }
0x17a3   :  { %v4719_v34 = vpop.xlane.xlu0 %1144 }
0x17a4   :  { %vm1166_vm1 = vcmp.eq.f32.partialorder %v4715_v30, %v4719_v34 }
0x17a5   :  { %v1167_v37 = vsel %vm1166_vm1, %v4445_v18, 8 }
0x17a6   :  { %v1168_v31 = vsel %vm423_vm9, %v1167_v37, 2147483647 }
0x17a7   :  { %v1170_v36 = vshra.s32 %v1168_v31, 16  ;;  %v1169_v42 = vand.u32 65535, %v1168_v31 }
0x17a9   :  { %v1172_v39 = vcvt.s32.f32 %v1170_v36  ;;  %v1171_v45 = vcvt.s32.f32 %v1169_v42 }
0x17ab   :  { %1173 = vmin.xlane.f32.xlu1 %v1172_v39 }
0x1838   :  { %v1174_v44 = vpop.xlane.xlu1 %1173 }
0x1839   :  { %vm1175_vm2 = vcmp.eq.f32.partialorder %v1172_v39, %v1174_v44  ;;  %v1180_v51 = vcvt.f32.s32 %v1174_v44 }
0x183a   :  { %v1176_v46 = vsel %vm1175_vm2, %v1171_v45, inf }
0x183b   :  { %1177 = vmin.xlane.f32.xlu0 %v1176_v46  ;;  %v1181_v57 = vshll.u32 %v1180_v51, 16 }
0x1851   :  { %1219 = vrot.lane.b32.xlu0 %v4672_v21, %s4315_s28 }
0x18c8   :  { %v1178_v55 = vpop.xlane.xlu0 %1177 }
0x18c9   :  { %v1179_v59 = vcvt.f32.s32 %v1178_v55 }
0x18cb   :  { %v1182_v62 = vadd.s32 %v1181_v57, %v1179_v59 }
0x18cc   :  { %v1220_v4 = vpop.permute.xlu0 %1219 }
0x18cd   :  { %vm1183_vm10 = vcmp.eq.s32.totalorder %v4445_v18, %v1182_v62 }
0x18ce   :  { %v3216_v56 = vsel %vm1183_vm10, 1.0, %v4313_v1 }
0x18cf   :  { %v1222_v3 = vsel %vm102_vm3, %v3216_v56, %v4022_v24 }
0x18d0   :  { %v1223_v21 = vsel %vm104_vm4, %v1222_v3, %v1220_v4 }
0x18d1   :  { %3551 = vmatmul.mubr.msk.f32.vlgmr.msra.gmra.mrb[8].mxu1 %vm112_vm5, %v1223_v21 }
0x18d2   :  { %3847 = vmatpush3.bf16.msra.mxu1 %v4526_v26  ;;  %3580 = vmatprep.mubr.msk.f32.mxu1 %vm4312_vm0, %v4313_v1 }
0x18d3   :  { %3848 = vmatprep.subr.bf16.mxu1 %v4311_v0 }
0x18d6   :  { %3850 = vmatpush3.bf16.msra.mxu1 %v4532_v28 }
0x18d7   :  { %3857 = vmatprep.subr.bf16.mxu1 %v4311_v0 }
0x19a4   :  { %v1293_v60 = vpop.f32.mrb[8].mxu1 }
0x19a5   :  { %v1294_v5 = vadd.f32 %v4457_v23, %v1293_v60  ;;  %v3552_v6 = vpop.f32.mrb[9].mxu1 }
0x19a7   :  { %4023 = vtanh.f32 %v1294_v5  ;;  %v3219_v8 = vmul.f32 -1.442695, %v1294_v5 }
0x19a9   :  { %4025 = vpow2.f32 %v3219_v8 }
0x19b1   :  { %v4024_v7 = vpop.eup %4023 }
0x19b2   :  { %1306 = vrot.lane.b32.xlu1 %v4024_v7, %s4314_s12 }
0x19b3   :  { %v4026_v10 = vpop.eup %4025 }
0x19b4   :  { %v1300_v11 = vadd.f32 1.0, %v4026_v10 }
0x19b6   :  { %4027 = vrcp.f32 %v1300_v11 }
0x19c0   :  { %v4028_v12 = vpop.eup %4027 }
0x19c1   :  { %v1304_v20 = vmul.f32 %v4028_v12, %v4666_v54 }
0x1a24   :  { %v1307_v13 = vpop.permute.xlu1 %1306 }
0x1a25   :  { %v1309_v19 = vmul.f32 %v4028_v12, %v1307_v13 }
0x1a27   :  { %1311 = vrot.lane.b32.xlu1 %v1309_v19, %s4306_s19 }
0x1a99   :  { %v1312_v25 = vpop.permute.xlu1 %1311 }
0x1a9a   :  { %v4743_v52 = vadd.f32 %v1312_v25, %v1304_v20 }
0x1a9c   :  { %4029 = vtanh.f32 %v4743_v52 }
0x1aa6   :  { %v4030_v29 = vpop.eup %4029 }
0x1aa7   :  { %1317 = vrot.lane.b32.xlu0 %v4030_v29, %s4314_s12 }
0x1aab   :  { %1325 = vrot.lane.b32.xlu0 %v4694_v22, %s4314_s12 }
0x1b19   :  { %v1318_v32 = vpop.permute.xlu0 %1317 }
0x1b1a   :  { %v1320_v37 = vmul.f32 %v4028_v12, %v1318_v32 }
0x1b1c   :  { %1322 = vrot.lane.b32.xlu1 %v1320_v37, %s4306_s19 }
0x1b1d   :  { %v1326_v31 = vpop.permute.xlu0 %1325 }
0x1b8e   :  { %v1323_v36 = vpop.permute.xlu1 %1322 }
0x1b8f   :  { %v1328_v39 = vsel %vm228_vm6, %v1323_v36, %v1326_v31 }
0x1b90   :  { %3570 = vmatmul.mubr.msk.f32.vlgmr.msra.gmra.mrb[10].mxu0 %vm236_vm7, %v1328_v39 }
0x1b91   :  { %3853 = vmatpush3.bf16.msra.mxu0 %v4425_v9  ;;  %3593 = vmatprep.mubr.msk.f32.mxu0 %vm4312_vm0, %v4313_v1 }
0x1b92   :  { %3854 = vmatprep.subr.bf16.mxu0 %v4311_v0 }
0x1b95   :  { %3856 = vmatpush3.bf16.msra.mxu0 %v4430_v14 }
0x1b96   :  { %3591 = vmatprep.subr.mxu0 %v4313_v1 }
0x1b99   :  { %3592 = vmatpush3.msra.mxu0 %v4440_v16 }
0x1b9a   :  { %3869 = vmatprep.subr.bf16.mxu0 %v4311_v0 }
0x1c63   :  { %v1398_v54 = vpop.f32.mrb[10].mxu0 }
0x1c64   :  { %v1399_v22 = vadd.f32 %v4509_v2, %v1398_v54  ;;  %v3571_v42 = vpop.f32.mrb[11].mxu0 }
0x1c66   :  { %4031 = vtanh.f32 %v1399_v22  ;;  %v3221_v45 = vmul.f32 -1.442695, %v1399_v22 }
0x1c68   :  { %4033 = vpow2.f32 %v3221_v45 }
0x1c70   :  { %v4032_v44 = vpop.eup %4031 }
0x1c71   :  { %1411 = vrot.lane.b32.xlu1 %v4032_v44, %s4314_s12 }
0x1c72   :  { %v4034_v46 = vpop.eup %4033 }
0x1c73   :  { %v1405_v48 = vadd.f32 1.0, %v4034_v46 }
0x1c75   :  { %4035 = vrcp.f32 %v1405_v48 }
0x1c7f   :  { %v4036_v49 = vpop.eup %4035 }
0x1c80   :  { %v1409_v16 = vmul.f32 %v4036_v49, %v4690_v15 }
0x1ce3   :  { %v1412_v50 = vpop.permute.xlu1 %1411 }
0x1ce4   :  { %v1414_v51 = vmul.f32 %v4036_v49, %v1412_v50 }
0x1ce6   :  { %1416 = vrot.lane.b32.xlu0 %v1414_v51, %s4306_s19 }
0x1d58   :  { %v1417_v55 = vpop.permute.xlu0 %1416 }
0x1d59   :  { %v4764_v57 = vadd.f32 %v1417_v55, %v1409_v16 }
0x1d5b   :  { %4037 = vtanh.f32 %v4764_v57 }
0x1d65   :  { %v4038_v59 = vpop.eup %4037 }
0x1d66   :  { %1422 = vrot.lane.b32.xlu1 %v4038_v59, %s4314_s12 }
0x1dd8   :  { %v1423_v62 = vpop.permute.xlu1 %1422 }
0x1dd9   :  { %v4768_v24 = vmul.f32 %v4036_v49, %v1423_v62 }
0x1ddb   :  { %1427 = vrot.lane.b32.xlu0 %v4768_v24, %s4306_s19 }
0x1e4d   :  { %v1428_v56 = vpop.permute.xlu0 %1427 }
0x1e4e   :  { %3581 = vmatmul.mubr.msk.f32.vlgmr.msra.gmra.mrb[10].mxu1 %vm228_vm6, %v1428_v56 }
0x1e4f   :  { %3859 = vmatpush3.bf16.msra.mxu1 %v4465_v41  ;;  %3612 = vmatprep.mubr.msk.f32.mxu1 %vm4312_vm0, %v4313_v1 }
0x1e50   :  { %3860 = vmatprep.subr.bf16.mxu1 %v4311_v0 }
0x1e53   :  { %3862 = vmatpush3.bf16.msra.mxu1 %v4468_v43 }
0x1e54   :  { %3863 = vmatprep.subr.bf16.mxu1 %v4311_v0 }
0x1e57   :  { %3865 = vmatpush3.bf16.msra.mxu1 %v4475_v47 }
0x1e58   :  { %3866 = vmatprep.subr.bf16.mxu1 %v4311_v0 }
0x1e5b   :  { %3868 = vmatpush3.bf16.msra.mxu1 %v4483_v53 }
0x1e5c   :  { %3875 = vmatprep.subr.bf16.mxu1 %v4311_v0 }
0x1f21   :  { %v1497_v15 = vpop.f32.mrb[10].mxu1 }
0x1f22   :  { %v4784_v3 = vadd.f32 %v4556_v33, %v1497_v15  ;;  %v3582_v4 = vpop.f32.mrb[11].mxu1 }
0x1f24   :  { %v4789_v21 = vsel %vm82_vm8, -inf, %v4784_v3  ;;  %v3224_v20 = vmul.f32 -1.442695, %v4784_v3 }
0x1f25   :  { %v1502_v60 = vsel %vm423_vm9, %v4789_v21, -inf }
0x1f26   :  { %1503 = vmax.xlane.f32.xlu1 %v1502_v60  ;;  %4039 = vpow2.f32 %v3224_v20 }
0x1f30   :  { %v4040_v25 = vpop.eup %4039 }
0x1f31   :  { %v1548_v29 = vadd.f32 1.0, %v4040_v25 }
0x1f33   :  { %4041 = vrcp.f32 %v1548_v29 }
0x1f37   :  { %1578 = vrot.lane.b32.xlu1 %v1320_v37, %s4315_s28 }
0x1f3d   :  { %v4042_v54 = vpop.eup %4041 }
0x1fb3   :  { %v4794_v5 = vpop.xlane.xlu1 %1503 }
0x1fb4   :  { %vm1525_vm11 = vcmp.eq.f32.partialorder %v4789_v21, %v4794_v5 }
0x1fb5   :  { %v1526_v6 = vsel %vm1525_vm11, %v4445_v18, 8 }
0x1fb6   :  { %v1527_v7 = vsel %vm423_vm9, %v1526_v6, 2147483647 }
0x1fb7   :  { %v1529_v8 = vshra.s32 %v1527_v7, 16  ;;  %v1528_v11 = vand.u32 65535, %v1527_v7  ;;  %v1579_v42 = vpop.permute.xlu1 %1578 }
0x1fb9   :  { %v1531_v10 = vcvt.s32.f32 %v1529_v8  ;;  %v1530_v13 = vcvt.s32.f32 %v1528_v11 }
0x1fbb   :  { %1532 = vmin.xlane.f32.xlu0 %v1531_v10 }
0x2048   :  { %v1533_v12 = vpop.xlane.xlu0 %1532 }
0x2049   :  { %vm1534_vm12 = vcmp.eq.f32.partialorder %v1531_v10, %v1533_v12  ;;  %v1539_v32 = vcvt.f32.s32 %v1533_v12 }
0x204a   :  { %v1535_v19 = vsel %vm1534_vm12, %v1530_v13, inf }
0x204b   :  { %1536 = vmin.xlane.f32.xlu0 %v1535_v19  ;;  %v1540_v31 = vshll.u32 %v1539_v32, 16 }
0x20d8   :  { %v1537_v37 = vpop.xlane.xlu0 %1536 }
0x20d9   :  { %v1538_v36 = vcvt.f32.s32 %v1537_v37 }
0x20db   :  { %v1541_v39 = vadd.s32 %v1540_v31, %v1538_v36 }
0x20dd   :  { %vm1542_vm13 = vcmp.eq.s32.totalorder %v4445_v18, %v1541_v39 }
0x20de   :  { %v3223_v22 = vsel %vm1542_vm13, 1.0, %v4313_v1 }
0x20df   :  { %v1581_v44 = vsel %vm102_vm3, %v3223_v22, %v4042_v54 }
0x20e0   :  { %v1582_v45 = vsel %vm104_vm4, %v1581_v44, %v1579_v42 }
0x20e1   :  { %3594 = vmatmul.mubr.msk.f32.vlgmr.msra.gmra.mrb[12].mxu0 %vm112_vm5, %v1582_v45 }
0x20e2   :  { %3871 = vmatpush3.bf16.msra.mxu0 %v4526_v26  ;;  %3623 = vmatprep.mubr.msk.f32.mxu0 %vm4312_vm0, %v4313_v1 }
0x20e3   :  { %3872 = vmatprep.subr.bf16.mxu0 %v4311_v0 }
0x20e6   :  { %3874 = vmatpush3.bf16.msra.mxu0 %v4532_v28 }
0x20e7   :  { %3881 = vmatprep.subr.bf16.mxu0 %v4311_v0 }
0x21b4   :  { %v1652_v46 = vpop.f32.mrb[12].mxu0 }
0x21b5   :  { %v1653_v48 = vadd.f32 %v4457_v23, %v1652_v46  ;;  %v3595_v49 = vpop.f32.mrb[13].mxu0 }
0x21b7   :  { %4043 = vtanh.f32 %v1653_v48  ;;  %v3226_v51 = vmul.f32 -1.442695, %v1653_v48 }
0x21b9   :  { %4045 = vpow2.f32 %v3226_v51 }
0x21c1   :  { %v4044_v50 = vpop.eup %4043 }
0x21c2   :  { %1665 = vrot.lane.b32.xlu0 %v4044_v50, %s4314_s12 }
0x21c3   :  { %v4046_v16 = vpop.eup %4045 }
0x21c4   :  { %v1659_v55 = vadd.f32 1.0, %v4046_v16 }
0x21c6   :  { %4047 = vrcp.f32 %v1659_v55 }
0x21d0   :  { %v4048_v59 = vpop.eup %4047 }
0x21d1   :  { %v1663_v15 = vmul.f32 %v4048_v59, %v4743_v52 }
0x2234   :  { %v1666_v62 = vpop.permute.xlu0 %1665 }
0x2235   :  { %v1668_v56 = vmul.f32 %v4048_v59, %v1666_v62 }
0x2237   :  { %1670 = vrot.lane.b32.xlu1 %v1668_v56, %s4306_s19 }
0x22a9   :  { %v1671_v4 = vpop.permute.xlu1 %1670 }
0x22aa   :  { %v4816_v60 = vadd.f32 %v1671_v4, %v1663_v15 }
0x22ac   :  { %4049 = vtanh.f32 %v4816_v60 }
0x22b6   :  { %v4050_v23 = vpop.eup %4049 }
0x22b7   :  { %1676 = vrot.lane.b32.xlu1 %v4050_v23, %s4314_s12 }
0x22bb   :  { %1684 = vrot.lane.b32.xlu1 %v4768_v24, %s4314_s12  ;;  %v4837_v24 = vld [vmem:[%s5317_s2 + $0x20] sm:$0xff] }
0x2329   :  { %v1677_v6 = vpop.permute.xlu1 %1676 }
0x232a   :  { %v4822_v7 = vmul.f32 %v4048_v59, %v1677_v6 }
0x232c   :  { %1681 = vrot.lane.b32.xlu0 %v4822_v7, %s4306_s19 }
0x232d   :  { %v1685_v8 = vpop.permute.xlu1 %1684 }
0x239e   :  { %v1682_v10 = vpop.permute.xlu0 %1681 }
0x239f   :  { %v1687_v52 = vsel %vm228_vm6, %v1682_v10, %v1685_v8 }
0x23a0   :  { %3613 = vmatmul.mubr.msk.f32.vlgmr.msra.gmra.mrb[12].mxu1 %vm236_vm7, %v1687_v52 }
0x23a1   :  { %3877 = vmatpush3.bf16.msra.mxu1 %v4425_v9  ;;  %3636 = vmatprep.mubr.msk.f32.mxu1 %vm4312_vm0, %v4313_v1 }
0x23a2   :  { %3878 = vmatprep.subr.bf16.mxu1 %v4311_v0 }
0x23a5   :  { %3880 = vmatpush3.bf16.msra.mxu1 %v4430_v14 }
0x23a6   :  { %3634 = vmatprep.subr.mxu1 %v4313_v1 }
0x23a9   :  { %3635 = vmatpush3.msra.mxu1 %v4837_v24 }
0x23aa   :  { %3893 = vmatprep.subr.bf16.mxu1 %v4311_v0 }
0x2473   :  { %v1757_v11 = vpop.f32.mrb[12].mxu1 }
0x2474   :  { %v1758_v12 = vadd.f32 %v4509_v2, %v1757_v11  ;;  %v3614_v13 = vpop.f32.mrb[13].mxu1 }
0x2476   :  { %4051 = vtanh.f32 %v1758_v12  ;;  %v3228_v20 = vmul.f32 -1.442695, %v1758_v12 }
0x2478   :  { %4053 = vpow2.f32 %v3228_v20 }
0x2480   :  { %v4052_v19 = vpop.eup %4051 }
0x2481   :  { %1770 = vrot.lane.b32.xlu0 %v4052_v19, %s4314_s12 }
0x2482   :  { %v4054_v25 = vpop.eup %4053 }
0x2483   :  { %v1764_v29 = vadd.f32 1.0, %v4054_v25 }
0x2485   :  { %4055 = vrcp.f32 %v1764_v29 }
0x248f   :  { %v4056_v32 = vpop.eup %4055 }
0x2490   :  { %v1768_v36 = vmul.f32 %v4056_v32, %v4764_v57 }
0x24f3   :  { %v1771_v37 = vpop.permute.xlu0 %1770 }
0x24f4   :  { %v1773_v31 = vmul.f32 %v4056_v32, %v1771_v37 }
0x24f6   :  { %1775 = vrot.lane.b32.xlu1 %v1773_v31, %s4306_s19 }
0x2568   :  { %v1776_v39 = vpop.permute.xlu1 %1775 }
0x2569   :  { %v4845_v54 = vadd.f32 %v1776_v39, %v1768_v36 }
0x256b   :  { %4057 = vtanh.f32 %v4845_v54 }
0x2575   :  { %v4058_v2 = vpop.eup %4057 }
0x2576   :  { %1781 = vrot.lane.b32.xlu0 %v4058_v2, %s4314_s12 }
0x25e8   :  { %v1782_v22 = vpop.permute.xlu0 %1781 }
0x25e9   :  { %v4849_v42 = vmul.f32 %v4056_v32, %v1782_v22  ;;  %v4897_v32 = vld [vmem:[%s5319_s4] ss:$0 sm:$0xff] }
0x25eb   :  { %1786 = vrot.lane.b32.xlu1 %v4849_v42, %s4306_s19 }
0x265d   :  { %v1787_v44 = vpop.permute.xlu1 %1786 }
0x265e   :  { %3624 = vmatmul.mubr.msk.f32.vlgmr.msra.gmra.mrb[14].mxu0 %vm228_vm6, %v1787_v44 }
0x265f   :  { %3883 = vmatpush3.bf16.msra.mxu0 %v4465_v41  ;;  %3655 = vmatprep.mubr.msk.f32.mxu0 %vm4312_vm0, %v4313_v1 }
0x2660   :  { %3884 = vmatprep.subr.bf16.mxu0 %v4311_v0 }
0x2663   :  { %3886 = vmatpush3.bf16.msra.mxu0 %v4468_v43 }
0x2664   :  { %3887 = vmatprep.subr.bf16.mxu0 %v4311_v0 }
0x2667   :  { %3889 = vmatpush3.bf16.msra.mxu0 %v4475_v47 }
0x2668   :  { %3890 = vmatprep.subr.bf16.mxu0 %v4311_v0 }
0x266b   :  { %3892 = vmatpush3.bf16.msra.mxu0 %v4483_v53 }
0x266c   :  { %3899 = vmatprep.subr.bf16.mxu0 %v4311_v0 }
0x2731   :  { %v1856_v57 = vpop.f32.mrb[14].mxu0 }
0x2732   :  { %v4865_v45 = vadd.f32 %v4556_v33, %v1856_v57  ;;  %v3625_v46 = vpop.f32.mrb[15].mxu0 }
0x2734   :  { %v4870_v48 = vsel %vm82_vm8, -inf, %v4865_v45  ;;  %v3231_v4 = vmul.f32 -1.442695, %v4865_v45 }
0x2735   :  { %v1861_v49 = vsel %vm423_vm9, %v4870_v48, -inf }
0x2736   :  { %1862 = vmax.xlane.f32.xlu0 %v1861_v49  ;;  %4059 = vpow2.f32 %v3231_v4 }
0x2740   :  { %v4060_v23 = vpop.eup %4059 }
0x2741   :  { %v1907_v6 = vadd.f32 1.0, %v4060_v23 }
0x2743   :  { %4061 = vrcp.f32 %v1907_v6 }
0x274d   :  { %v4062_v13 = vpop.eup %4061 }
0x27c3   :  { %v4874_v50 = vpop.xlane.xlu0 %1862 }
0x27c4   :  { %vm1884_vm14 = vcmp.eq.f32.partialorder %v4870_v48, %v4874_v50 }
0x27c5   :  { %v1885_v51 = vsel %vm1884_vm14, %v4445_v18, 8 }
0x27c6   :  { %v1886_v33 = vsel %vm423_vm9, %v1885_v51, 2147483647 }
0x27c7   :  { %v1888_v16 = vshra.s32 %v1886_v33, 16  ;;  %v1887_v59 = vand.u32 65535, %v1886_v33 }
0x27c9   :  { %v1890_v55 = vcvt.s32.f32 %v1888_v16  ;;  %v1889_v56 = vcvt.s32.f32 %v1887_v59 }
0x27cb   :  { %1891 = vmin.xlane.f32.xlu1 %v1890_v55 }
0x2858   :  { %v1892_v62 = vpop.xlane.xlu1 %1891 }
0x2859   :  { %vm1893_vm15 = vcmp.eq.f32.partialorder %v1890_v55, %v1892_v62  ;;  %v1898_v8 = vcvt.f32.s32 %v1892_v62 }
0x285a   :  { %v1894_v15 = vsel %vm1893_vm15, %v1889_v56, inf }
0x285b   :  { %1895 = vmin.xlane.f32.xlu0 %v1894_v15  ;;  %v1899_v52 = vshll.u32 %v1898_v8, 16 }
0x2871   :  { %1937 = vrot.lane.b32.xlu0 %v4822_v7, %s4315_s28 }
0x28e8   :  { %v1896_v10 = vpop.xlane.xlu0 %1895 }
0x28e9   :  { %v1897_v11 = vcvt.f32.s32 %v1896_v10 }
0x28eb   :  { %v1900_v12 = vadd.s32 %v1899_v52, %v1897_v11 }
0x28ec   :  { %v1938_v25 = vpop.permute.xlu0 %1937 }
0x28ed   :  { %vm1901_vm1 = vcmp.eq.s32.totalorder %v4445_v18, %v1900_v12 }
0x28ee   :  { %v3230_v19 = vsel %vm1901_vm1, 1.0, %v4313_v1 }
0x28ef   :  { %v1940_v20 = vsel %vm102_vm3, %v3230_v19, %v4062_v13 }
0x28f0   :  { %v1941_v7 = vsel %vm104_vm4, %v1940_v20, %v1938_v25 }
0x28f1   :  { %3637 = vmatmul.mubr.msk.f32.vlgmr.msra.gmra.mrb[14].mxu1 %vm112_vm5, %v1941_v7 }
0x28f2   :  { %3895 = vmatpush3.bf16.msra.mxu1 %v4526_v26  ;;  %3666 = vmatprep.mubr.msk.f32.mxu1 %vm4312_vm0, %v4313_v1 }
0x28f3   :  { %3896 = vmatprep.subr.bf16.mxu1 %v4311_v0 }
0x28f6   :  { %3898 = vmatpush3.bf16.msra.mxu1 %v4532_v28 }
0x28f7   :  { %3905 = vmatprep.subr.bf16.mxu1 %v4311_v0 }
0x29c4   :  { %v2011_v29 = vpop.f32.mrb[14].mxu1 }
0x29c5   :  { %v2012_v37 = vadd.f32 %v4897_v32, %v2011_v29  ;;  %v3638_v31 = vpop.f32.mrb[15].mxu1 }
0x29c7   :  { %4063 = vtanh.f32 %v2012_v37  ;;  %v3233_v39 = vmul.f32 -1.442695, %v2012_v37 }
0x29c9   :  { %4065 = vpow2.f32 %v3233_v39 }
0x29d1   :  { %v4064_v36 = vpop.eup %4063 }
0x29d2   :  { %2024 = vrot.lane.b32.xlu1 %v4064_v36, %s4314_s12  ;;  %v4951_v36 = vld [vmem:[%s5321_s6] ss:$0 sm:$0xff]  ;;  %s4317_s6 = smov 96  }
0x29d3   :  { %v4066_v2 = vpop.eup %4065 }
0x29d4   :  { %v2018_v22 = vadd.f32 1.0, %v4066_v2 }
0x29d6   :  { %4067 = vrcp.f32 %v2018_v22 }
0x29e0   :  { %v4068_v44 = vpop.eup %4067 }
0x29e1   :  { %v2022_v49 = vmul.f32 %v4068_v44, %v4816_v60 }
0x2a44   :  { %v2025_v57 = vpop.permute.xlu1 %2024 }
0x2a45   :  { %v2027_v46 = vmul.f32 %v4068_v44, %v2025_v57 }
0x2a47   :  { %2029 = vrot.lane.b32.xlu1 %v2027_v46, %s4306_s19 }
0x2ab9   :  { %v2030_v51 = vpop.permute.xlu1 %2029 }
0x2aba   :  { %v4903_v33 = vadd.f32 %v2030_v51, %v2022_v49 }
0x2abc   :  { %4069 = vtanh.f32 %v4903_v33 }
0x2ac6   :  { %v4070_v16 = vpop.eup %4069 }
0x2ac7   :  { %2035 = vrot.lane.b32.xlu0 %v4070_v16, %s4314_s12 }
0x2acb   :  { %2043 = vrot.lane.b32.xlu0 %v4849_v42, %s4314_s12  ;;  %v4923_v42 = vld [vmem:[%s5319_s4 + $0x1] ss:$0 sm:$0xff] }
0x2b39   :  { %v2036_v55 = vpop.permute.xlu0 %2035 }
0x2b3a   :  { %v2038_v59 = vmul.f32 %v4068_v44, %v2036_v55 }
0x2b3c   :  { %2040 = vrot.lane.b32.xlu1 %v2038_v59, %s4306_s19 }
0x2b3d   :  { %v2044_v62 = vpop.permute.xlu0 %2043 }
0x2bae   :  { %v2041_v56 = vpop.permute.xlu1 %2040 }
0x2baf   :  { %v2046_v15 = vsel %vm228_vm6, %v2041_v56, %v2044_v62 }
0x2bb0   :  { %3656 = vmatmul.mubr.msk.f32.vlgmr.msra.gmra.mrb[16].mxu0 %vm236_vm7, %v2046_v15 }
0x2bb1   :  { %3901 = vmatpush3.bf16.msra.mxu0 %v4425_v9  ;;  %3679 = vmatprep.mubr.msk.f32.mxu0 %vm4312_vm0, %v4313_v1 }
0x2bb2   :  { %3902 = vmatprep.subr.bf16.mxu0 %v4311_v0 }
0x2bb5   :  { %3904 = vmatpush3.bf16.msra.mxu0 %v4430_v14 }
0x2bb6   :  { %3677 = vmatprep.subr.mxu0 %v4313_v1 }
0x2bb9   :  { %3678 = vmatpush3.msra.mxu0 %v4837_v24 }
0x2bba   :  { %3917 = vmatprep.subr.bf16.mxu0 %v4311_v0 }
0x2c83   :  { %v2116_v60 = vpop.f32.mrb[16].mxu0 }
0x2c84   :  { %v2117_v4 = vadd.f32 %v4923_v42, %v2116_v60  ;;  %v3657_v23 = vpop.f32.mrb[17].mxu0 }
0x2c86   :  { %4071 = vtanh.f32 %v2117_v4  ;;  %v3235_v8 = vmul.f32 -1.442695, %v2117_v4 }
0x2c88   :  { %4073 = vpow2.f32 %v3235_v8 }
0x2c90   :  { %v4072_v6 = vpop.eup %4071 }
0x2c91   :  { %2129 = vrot.lane.b32.xlu1 %v4072_v6, %s4314_s12 }
0x2c92   :  { %v4074_v10 = vpop.eup %4073 }
0x2c93   :  { %v2123_v52 = vadd.f32 1.0, %v4074_v10 }
0x2c95   :  { %4075 = vrcp.f32 %v2123_v52 }
0x2c9f   :  { %v4076_v11 = vpop.eup %4075 }
0x2ca0   :  { %v2127_v19 = vmul.f32 %v4076_v11, %v4845_v54 }
0x2d03   :  { %v2130_v12 = vpop.permute.xlu1 %2129 }
0x2d04   :  { %v2132_v13 = vmul.f32 %v4076_v11, %v2130_v12 }
0x2d06   :  { %2134 = vrot.lane.b32.xlu0 %v2132_v13, %s4306_s19 }
0x2d78   :  { %v2135_v20 = vpop.permute.xlu0 %2134 }
0x2d79   :  { %v4929_v25 = vadd.f32 %v2135_v20, %v2127_v19 }
0x2d7b   :  { %4077 = vtanh.f32 %v4929_v25 }
0x2d85   :  { %v4078_v7 = vpop.eup %4077 }
0x2d86   :  { %2140 = vrot.lane.b32.xlu1 %v4078_v7, %s4314_s12 }
0x2df8   :  { %v2141_v29 = vpop.permute.xlu1 %2140 }
0x2df9   :  { %v4933_v37 = vmul.f32 %v4076_v11, %v2141_v29 }
0x2dfb   :  { %2145 = vrot.lane.b32.xlu0 %v4933_v37, %s4306_s19 }
0x2e6d   :  { %v2146_v31 = vpop.permute.xlu0 %2145 }
0x2e6e   :  { %3667 = vmatmul.mubr.msk.f32.vlgmr.msra.gmra.mrb[16].mxu1 %vm228_vm6, %v2146_v31 }
0x2e6f   :  { %3907 = vmatpush3.bf16.msra.mxu1 %v4465_v41  ;;  %3698 = vmatprep.mubr.msk.f32.mxu1 %vm4312_vm0, %v4313_v1 }
0x2e70   :  { %3908 = vmatprep.subr.bf16.mxu1 %v4311_v0 }
0x2e73   :  { %3910 = vmatpush3.bf16.msra.mxu1 %v4468_v43 }
0x2e74   :  { %3911 = vmatprep.subr.bf16.mxu1 %v4311_v0 }
0x2e77   :  { %3913 = vmatpush3.bf16.msra.mxu1 %v4475_v47 }
0x2e78   :  { %3914 = vmatprep.subr.bf16.mxu1 %v4311_v0 }
0x2e7b   :  { %3916 = vmatpush3.bf16.msra.mxu1 %v4483_v53 }
0x2e7c   :  { %3923 = vmatprep.subr.bf16.mxu1 %v4311_v0 }
0x2f41   :  { %v2215_v54 = vpop.f32.mrb[16].mxu1 }
0x2f42   :  { %v4954_v39 = vadd.f32 %v4951_v36, %v2215_v54  ;;  %v3668_v2 = vpop.f32.mrb[17].mxu1 }
0x2f44   :  { %v4959_v22 = vsel %vm82_vm8, -inf, %v4954_v39 }
0x2f45   :  { %v2220_v44 = vsel %vm423_vm9, %v4959_v22, -inf }
0x2f46   :  { %2221 = vmax.xlane.f32.xlu1 %v2220_v44 }
0x2f57   :  { %2296 = vrot.lane.b32.xlu1 %v2038_v59, %s4315_s28  ;;  %v3238_v59 = vmul.f32 -1.442695, %v4954_v39 }
0x2f59   :  { %4079 = vpow2.f32 %v3238_v59 }
0x2f63   :  { %v4080_v60 = vpop.eup %4079 }
0x2f64   :  { %v2266_v4 = vadd.f32 1.0, %v4080_v60 }
0x2f66   :  { %4081 = vrcp.f32 %v2266_v4 }
0x2f70   :  { %v4082_v11 = vpop.eup %4081 }
0x2fd3   :  { %v4964_v57 = vpop.xlane.xlu1 %2221 }
0x2fd4   :  { %vm2243_vm2 = vcmp.eq.f32.partialorder %v4959_v22, %v4964_v57 }
0x2fd5   :  { %v2244_v46 = vsel %vm2243_vm2, %v4445_v18, 8 }
0x2fd6   :  { %v2245_v49 = vsel %vm423_vm9, %v2244_v46, 2147483647 }
0x2fd7   :  { %v2247_v51 = vshra.s32 %v2245_v49, 16  ;;  %v2246_v55 = vand.u32 65535, %v2245_v49  ;;  %v2297_v13 = vpop.permute.xlu1 %2296 }
0x2fd9   :  { %v2249_v16 = vcvt.s32.f32 %v2247_v51  ;;  %v2248_v56 = vcvt.s32.f32 %v2246_v55 }
0x2fdb   :  { %2250 = vmin.xlane.f32.xlu0 %v2249_v16 }
0x3068   :  { %v2251_v62 = vpop.xlane.xlu0 %2250 }
0x3069   :  { %vm2252_vm10 = vcmp.eq.f32.partialorder %v2249_v16, %v2251_v62  ;;  %v2257_v23 = vcvt.f32.s32 %v2251_v62 }
0x306a   :  { %v2253_v15 = vsel %vm2252_vm10, %v2248_v56, inf }
0x306b   :  { %2254 = vmin.xlane.f32.xlu0 %v2253_v15  ;;  %v2258_v8 = vshll.u32 %v2257_v23, 16 }
0x30f8   :  { %v2255_v6 = vpop.xlane.xlu0 %2254 }
0x30f9   :  { %v2256_v10 = vcvt.f32.s32 %v2255_v6 }
0x30fb   :  { %v2259_v52 = vadd.s32 %v2258_v8, %v2256_v10 }
0x30fd   :  { %vm2260_vm11 = vcmp.eq.s32.totalorder %v4445_v18, %v2259_v52 }
0x30fe   :  { %v3237_v12 = vsel %vm2260_vm11, 1.0, %v4313_v1 }
0x30ff   :  { %v2299_v19 = vsel %vm102_vm3, %v3237_v12, %v4082_v11 }
0x3100   :  { %v2300_v20 = vsel %vm104_vm4, %v2299_v19, %v2297_v13 }
0x3101   :  { %3680 = vmatmul.mubr.msk.f32.vlgmr.msra.gmra.mrb[18].mxu0 %vm112_vm5, %v2300_v20 }
0x3102   :  { %3919 = vmatpush3.bf16.msra.mxu0 %v4526_v26  ;;  %3709 = vmatprep.mubr.msk.f32.mxu0 %vm4312_vm0, %v4313_v1 }
0x3103   :  { %3920 = vmatprep.subr.bf16.mxu0 %v4311_v0 }
0x3106   :  { %3922 = vmatpush3.bf16.msra.mxu0 %v4532_v28 }
0x3107   :  { %3929 = vmatprep.subr.bf16.mxu0 %v4311_v0 }
0x31d4   :  { %v2370_v7 = vpop.f32.mrb[18].mxu0 }
0x31d5   :  { %v2371_v29 = vadd.f32 %v4897_v32, %v2370_v7  ;;  %v3681_v31 = vpop.f32.mrb[19].mxu0 }
0x31d7   :  { %4083 = vtanh.f32 %v2371_v29  ;;  %v3240_v2 = vmul.f32 -1.442695, %v2371_v29 }
0x31d9   :  { %4085 = vpow2.f32 %v3240_v2 }
0x31e1   :  { %v4084_v54 = vpop.eup %4083 }
0x31e2   :  { %2383 = vrot.lane.b32.xlu0 %v4084_v54, %s4314_s12 }
0x31e3   :  { %v4086_v44 = vpop.eup %4085 }
0x31e4   :  { %v2377_v46 = vadd.f32 1.0, %v4086_v44 }
0x31e6   :  { %4087 = vrcp.f32 %v2377_v46 }
0x31f0   :  { %v4088_v49 = vpop.eup %4087 }
0x31f1   :  { %v2381_v55 = vmul.f32 %v4088_v49, %v4903_v33 }
0x3254   :  { %v2384_v51 = vpop.permute.xlu0 %2383 }
0x3255   :  { %v2386_v16 = vmul.f32 %v4088_v49, %v2384_v51 }
0x3257   :  { %2388 = vrot.lane.b32.xlu1 %v2386_v16, %s4306_s19 }
0x32c9   :  { %v2389_v62 = vpop.permute.xlu1 %2388 }
0x32ca   :  { %v4986_v56 = vadd.f32 %v2389_v62, %v2381_v55 }
0x32cc   :  { %4089 = vtanh.f32 %v4986_v56 }
0x32d6   :  { %v4090_v15 = vpop.eup %4089 }
0x32d7   :  { %2394 = vrot.lane.b32.xlu1 %v4090_v15, %s4314_s12 }
0x32db   :  { %2402 = vrot.lane.b32.xlu1 %v4933_v37, %s4314_s12 }
0x3349   :  { %v2395_v59 = vpop.permute.xlu1 %2394 }
0x334a   :  { %v4992_v60 = vmul.f32 %v4088_v49, %v2395_v59 }
0x334c   :  { %2399 = vrot.lane.b32.xlu0 %v4992_v60, %s4306_s19 }
0x334d   :  { %v2403_v4 = vpop.permute.xlu1 %2402 }
0x33be   :  { %v2400_v23 = vpop.permute.xlu0 %2399 }
0x33bf   :  { %v2405_v33 = vsel %vm228_vm6, %v2400_v23, %v2403_v4 }
0x33c0   :  { %3699 = vmatmul.mubr.msk.f32.vlgmr.msra.gmra.mrb[18].mxu1 %vm236_vm7, %v2405_v33 }
0x33c1   :  { %3925 = vmatpush3.bf16.msra.mxu1 %v4425_v9  ;;  %3722 = vmatprep.mubr.msk.f32.mxu1 %vm4312_vm0, %v4313_v1 }
0x33c2   :  { %3926 = vmatprep.subr.bf16.mxu1 %v4311_v0 }
0x33c5   :  { %3928 = vmatpush3.bf16.msra.mxu1 %v4430_v14 }
0x33c6   :  { %3720 = vmatprep.subr.mxu1 %v4313_v1 }
0x33c9   :  { %3721 = vmatpush3.msra.mxu1 %v4837_v24 }
0x33ca   :  { %3941 = vmatprep.subr.bf16.mxu1 %v4311_v0 }
0x3493   :  { %v2475_v37 = vpop.f32.mrb[18].mxu1 }
0x3494   :  { %v2476_v6 = vadd.f32 %v4923_v42, %v2475_v37  ;;  %v3700_v8 = vpop.f32.mrb[19].mxu1 }
0x3496   :  { %4091 = vtanh.f32 %v2476_v6  ;;  %v3242_v9 = vmul.f32 -1.442695, %v2476_v6 }
0x3498   :  { %4093 = vpow2.f32 %v3242_v9 }
0x34a0   :  { %v4092_v10 = vpop.eup %4091 }
0x34a1   :  { %2488 = vrot.lane.b32.xlu0 %v4092_v10, %s4314_s12 }
0x34a2   :  { %v4094_v52 = vpop.eup %4093 }
0x34a3   :  { %v2482_v11 = vadd.f32 1.0, %v4094_v52 }
0x34a5   :  { %4095 = vrcp.f32 %v2482_v11 }
0x34af   :  { %v4096_v14 = vpop.eup %4095 }
0x34b0   :  { %v2486_v24 = vmul.f32 %v4096_v14, %v4929_v25 }
0x3513   :  { %v2489_v12 = vpop.permute.xlu0 %2488 }
0x3514   :  { %v2491_v13 = vmul.f32 %v4096_v14, %v2489_v12 }
0x3516   :  { %2493 = vrot.lane.b32.xlu1 %v2491_v13, %s4306_s19 }
0x3588   :  { %v2494_v19 = vpop.permute.xlu1 %2493 }
0x3589   :  { %v5010_v20 = vadd.f32 %v2494_v19, %v2486_v24 }
0x358b   :  { %4097 = vtanh.f32 %v5010_v20 }
0x3595   :  { %v4098_v7 = vpop.eup %4097 }
0x3596   :  { %2499 = vrot.lane.b32.xlu0 %v4098_v7, %s4314_s12 }
0x3608   :  { %v2500_v29 = vpop.permute.xlu0 %2499 }
0x3609   :  { %v5014_v31 = vmul.f32 %v4096_v14, %v2500_v29 }
0x360b   :  { %2504 = vrot.lane.b32.xlu1 %v5014_v31, %s4306_s19 }
0x367d   :  { %v2505_v54 = vpop.permute.xlu1 %2504 }
0x367e   :  { %3710 = vmatmul.mubr.msk.f32.vlgmr.msra.gmra.mrb[20].mxu0 %vm228_vm6, %v2505_v54 }
0x367f   :  { %3931 = vmatpush3.bf16.msra.mxu0 %v4465_v41  ;;  %3741 = vmatprep.mubr.msk.f32.mxu0 %vm4312_vm0, %v4313_v1 }
0x3680   :  { %3932 = vmatprep.subr.bf16.mxu0 %v4311_v0 }
0x3683   :  { %3934 = vmatpush3.bf16.msra.mxu0 %v4468_v43 }
0x3684   :  { %3935 = vmatprep.subr.bf16.mxu0 %v4311_v0 }
0x3687   :  { %3937 = vmatpush3.bf16.msra.mxu0 %v4475_v47 }
0x3688   :  { %3938 = vmatprep.subr.bf16.mxu0 %v4311_v0 }
0x368b   :  { %3940 = vmatpush3.bf16.msra.mxu0 %v4483_v53 }
0x3751   :  { %v2574_v25 = vpop.f32.mrb[20].mxu0 }
0x3752   :  { %v5029_v2 = vadd.f32 %v4951_v36, %v2574_v25  ;;  %v3711_v41 = vpop.f32.mrb[21].mxu0 }
0x3754   :  { %v5034_v44 = vsel %vm82_vm8, -inf, %v5029_v2  ;;  %v3245_v59 = vmul.f32 -1.442695, %v5029_v2 }
0x3755   :  { %v2579_v43 = vsel %vm423_vm9, %v5034_v44, -inf }
0x3756   :  { %2580 = vmax.xlane.f32.xlu0 %v2579_v43  ;;  %4099 = vpow2.f32 %v3245_v59 }
0x3760   :  { %v4100_v4 = vpop.eup %4099 }
0x3761   :  { %v2625_v23 = vadd.f32 1.0, %v4100_v4 }
0x3763   :  { %4101 = vrcp.f32 %v2625_v23 }
0x376d   :  { %v4102_v9 = vpop.eup %4101 }
0x37e3   :  { %v5038_v46 = vpop.xlane.xlu0 %2580 }
0x37e4   :  { %vm2602_vm12 = vcmp.eq.f32.partialorder %v5034_v44, %v5038_v46 }
0x37e5   :  { %v2603_v47 = vsel %vm2602_vm12, %v4445_v18, 8 }
0x37e6   :  { %v2604_v53 = vsel %vm423_vm9, %v2603_v47, 2147483647 }
0x37e7   :  { %v2606_v49 = vshra.s32 %v2604_v53, 16  ;;  %v2605_v16 = vand.u32 65535, %v2604_v53 }
0x37e9   :  { %v2608_v51 = vcvt.s32.f32 %v2606_v49  ;;  %v2607_v62 = vcvt.s32.f32 %v2605_v16 }
0x37eb   :  { %2609 = vmin.xlane.f32.xlu1 %v2608_v51 }
0x3878   :  { %v2610_v55 = vpop.xlane.xlu1 %2609 }
0x3879   :  { %vm2611_vm13 = vcmp.eq.f32.partialorder %v2608_v51, %v2610_v55  ;;  %v2616_v33 = vcvt.f32.s32 %v2610_v55 }
0x387a   :  { %v2612_v15 = vsel %vm2611_vm13, %v2607_v62, inf }
0x387b   :  { %2613 = vmin.xlane.f32.xlu0 %v2612_v15  ;;  %v2617_v6 = vshll.u32 %v2616_v33, 16 }
0x3891   :  { %2655 = vrot.lane.b32.xlu0 %v4992_v60, %s4315_s28 }
0x3908   :  { %v2614_v37 = vpop.xlane.xlu0 %2613 }
0x3909   :  { %v2615_v8 = vcvt.f32.s32 %v2614_v37 }
0x390b   :  { %v2618_v10 = vadd.s32 %v2617_v6, %v2615_v8 }
0x390c   :  { %v2656_v14 = vpop.permute.xlu0 %2655 }
0x390d   :  { %vm2619_vm14 = vcmp.eq.s32.totalorder %v4445_v18, %v2618_v10 }
0x390e   :  { %v3244_v52 = vsel %vm2619_vm14, 1.0, %v4313_v1 }
0x390f   :  { %v2658_v11 = vsel %vm102_vm3, %v3244_v52, %v4102_v9  ;;  %v427_v52 = vsub.f32 %v4565_v38, %v4569_v40  ;;  %vm3024_vm3 = vcmask 253952  }
0x3910   :  { %v2659_v60 = vsel %vm104_vm4, %v2658_v11, %v2656_v14 }
0x3911   :  { %3723 = vmatmul.mubr.msk.f32.vlgmr.msra.gmra.mrb[20].mxu1 %vm112_vm5, %v2659_v60  ;;  %v428_v11 = vmul.f32 1.442695, %v427_v52  ;;  %v1505_v60 = vsub.f32 %v4789_v21, %v4794_v5 }
0x3912   :  { %3943 = vmatpush3.bf16.msra.mxu1 %v4526_v26  ;;  %3752 = vmatprep.mubr.msk.f32.mxu1 %vm4312_vm0, %v4313_v1  ;;  %vm498_vm0 = vcmask 57344  }
0x3913   :  { %3944 = vmatprep.subr.bf16.mxu1 %v4311_v0 }
0x3916   :  { %3946 = vmatpush3.bf16.msra.mxu1 %v4532_v28 }
0x39e4   :  { %v2729_v12 = vpop.f32.mrb[20].mxu1 }
0x39e5   :  { %v2730_v13 = vadd.f32 %v4897_v32, %v2729_v12  ;;  %v3724_v24 = vpop.f32.mrb[21].mxu1  ;;  %v1506_v12 = vmul.f32 1.442695, %v1505_v60 }
0x39e7   :  { %4103 = vtanh.f32 %v2730_v13  ;;  %v3247_v7 = vmul.f32 -1.442695, %v2730_v13  ;;  %v2223_v13 = vsub.f32 %v4959_v22, %v4964_v57 }
0x39e9   :  { %4105 = vpow2.f32 %v3247_v7  ;;  %v2224_v24 = vmul.f32 1.442695, %v2223_v13 }
0x39f1   :  { %v4104_v19 = vpop.eup %4103 }
0x39f2   :  { %2742 = vrot.lane.b32.xlu1 %v4104_v19, %s4314_s12 }
0x39f3   :  { %v4106_v29 = vpop.eup %4105 }
0x39f4   :  { %v2736_v54 = vadd.f32 1.0, %v4106_v29 }
0x39f6   :  { %4107 = vrcp.f32 %v2736_v54 }
0x3a00   :  { %v4108_v26 = vpop.eup %4107 }
0x3a01   :  { %v2740_v0 = vmul.f32 %v4108_v26, %v4986_v56 }
0x3a64   :  { %v2743_v25 = vpop.permute.xlu1 %2742 }
0x3a65   :  { %v2745_v1 = vmul.f32 %v4108_v26, %v2743_v25  ;;  %v437_v25 = vand.u32 2147483647, %v4560_v35 }
0x3a67   :  { %2747 = vrot.lane.b32.xlu1 %v2745_v1, %s4306_s19  ;;  %v797_v1 = vand.u32 2147483647, %v4634_v58 }
0x3ad9   :  { %v2748_v28 = vpop.permute.xlu1 %2747 }
0x3ada   :  { %v5061_v41 = vadd.f32 %v2748_v28, %v2740_v0  ;;  %v438_v0 = vsub.f32 0.0, %v437_v25  ;;  %v798_v28 = vsub.f32 0.0, %v797_v1  ;;  %v796_v1 = vmin.f32 %v4634_v58, 0.0 }
0x3adc   :  { %4109 = vtanh.f32 %v5061_v41 }
0x3ae6   :  { %v4110_v32 = vpop.eup %4109 }
0x3ae7   :  { %2753 = vrot.lane.b32.xlu0 %v4110_v32, %s4314_s12  ;;  %v439_v32 = vmul.f32 1.442695, %v438_v0 }
0x3aeb   :  { %2761 = vrot.lane.b32.xlu0 %v5014_v31, %s4314_s12 }
0x3b59   :  { %v2754_v43 = vpop.permute.xlu0 %2753 }
0x3b5a   :  { %v5067_v47 = vmul.f32 %v4108_v26, %v2754_v43  ;;  %v1515_v43 = vand.u32 2147483647, %v4784_v3 }
0x3b5c   :  { %2758 = vrot.lane.b32.xlu1 %v5067_v47, %s4306_s19 }
0x3b5d   :  { %v2762_v53 = vpop.permute.xlu0 %2761 }
0x3bce   :  { %v2759_v49 = vpop.permute.xlu1 %2758 }
0x3bcf   :  { %v2764_v56 = vsel %vm228_vm6, %v2759_v49, %v2762_v53  ;;  %v799_v53 = vmul.f32 1.442695, %v798_v28  ;;  %v1516_v49 = vsub.f32 0.0, %v1515_v43 }
0x3bd0   :  { %3742 = vmatmul.mubr.msk.f32.vlgmr.msra.gmra.mrb[22].mxu0 %vm236_vm7, %v2764_v56  ;;  %v2233_v56 = vand.u32 2147483647, %v4954_v39 }
0x3ca3   :  { %v2834_v51 = vpop.f32.mrb[22].mxu0 }
0x3ca4   :  { %v2835_v16 = vadd.f32 %v4923_v42, %v2834_v51  ;;  %v3743_v55 = vpop.f32.mrb[23].mxu0  ;;  %v1517_v51 = vmul.f32 1.442695, %v1516_v49 }
0x3ca6   :  { %4111 = vtanh.f32 %v2835_v16  ;;  %v3249_v31 = vmul.f32 -1.442695, %v2835_v16  ;;  %v2234_v16 = vsub.f32 0.0, %v2233_v56 }
0x3ca8   :  { %4113 = vpow2.f32 %v3249_v31  ;;  %v2235_v55 = vmul.f32 1.442695, %v2234_v16 }
0x3cb0   :  { %v4112_v62 = vpop.eup %4111 }
0x3cb1   :  { %2847 = vrot.lane.b32.xlu1 %v4112_v62, %s4314_s12 }
0x3cb2   :  { %v4114_v15 = vpop.eup %4113 }
0x3cb3   :  { %v2841_v59 = vadd.f32 1.0, %v4114_v15 }
0x3cb5   :  { %4115 = vrcp.f32 %v2841_v59 }
0x3cbf   :  { %v4116_v4 = vpop.eup %4115 }
0x3cc0   :  { %v2845_v37 = vmul.f32 %v4116_v4, %v5010_v20  ;;  %v787_v20 = vsub.f32 %v4639_v61, %v4644_v63 }
0x3cc2   :  { %v788_v14 = vmul.f32 1.442695, %v787_v20 }
0x3d23   :  { %v2848_v23 = vpop.permute.xlu1 %2847 }
0x3d24   :  { %v2850_v33 = vmul.f32 %v4116_v4, %v2848_v23 }
0x3d26   :  { %2852 = vrot.lane.b32.xlu0 %v2850_v33, %s4306_s19 }
0x3d98   :  { %v2853_v6 = vpop.permute.xlu0 %2852 }
0x3d99   :  { %v5077_v8 = vadd.f32 %v2853_v6, %v2845_v37 }
0x3d9b   :  { %4117 = vtanh.f32 %v5077_v8 }
0x3d9c   :  { %4119 = vpow2.f32 %v428_v11  ;;  %v4316_v11 = vmov 1966171168  }
0x3d9d   :  { %4121 = vpow2.f32 %v788_v14  ;;  %v475_v20 = vunpack.c.l.s4 %v4316_v11 }
0x3d9e   :  { %4123 = vpow2.f32 %v1506_v12 }
0x3d9f   :  { %4125 = vpow2.f32 %v2224_v24 }
0x3da0   :  { %4127 = vpow2.f32 %v439_v32 }
0x3da1   :  { %4129 = vpow2.f32 %v799_v53 }
0x3da2   :  { %4131 = vpow2.f32 %v1517_v51 }
0x3da3   :  { %4133 = vpow2.f32 %v2235_v55  ;;  %v1514_v55 = vmin.f32 %v4784_v3, 0.0 }
0x3da5   :  { %v4118_v42 = vpop.eup %4117 }
0x3da6   :  { %2858 = vrot.lane.b32.xlu1 %v4118_v42, %s4314_s12  ;;  %v4120_v19 = vpop.eup %4119  ;;  %s4318_s12 = smov [#allocation8]  }
0x3da7   :  { %v430_v38 = vsel %vm423_vm9, %v4120_v19, 0.0  ;;  %v4122_v7 = vpop.eup %4121  ;;  %v476_v19 = vunpack.c.0.s8 %v475_v20  ;;  %s3160_s16 = sshll.u32 %s4318_s12, 4  ;;  %s3161_s16 = int_to_ptr.vmem [resolvable:$true] %s3160_s16 }
0x3da8   :  { %v790_v61 = vsel %vm423_vm9, %v4122_v7, 0.0  ;;  %v4124_v29 = vpop.eup %4123  ;;  %v436_v7 = vmin.f32 %v4560_v35, 0.0  ;;  %s4231_s0 = scalar_lea.vmem %s3161_s16, 64  ;;  %p4236_p3 = scmp.lt.s32.totalorder %s3161_s16, %s3161_s16 }
0x3da9   :  { %v1508_v54 = vsel %vm423_vm9, %v4124_v29, 0.0  ;;  %v4126_v21 = vpop.eup %4125  ;;  %p4232_p2 = scmp.ne.s32.totalorder %s3161_s16, %s4231_s0  ;;  %p4237_p4 = scmp.lt.s32.totalorder %s4231_s0, %s4231_s0 }
0x3daa   :  { %v2226_v26 = vsel %vm423_vm9, %v4126_v21, 0.0  ;;  %v4128_v62 = vpop.eup %4127 }
0x3dab   :  { %v4130_v31 = vpop.eup %4129  ;;  %v441_v15 = vadd.f32 1.0, %v4128_v62  ;;  %p4238_p5 = por %p4237_p4, %p4236_p3 }
0x3dac   :  { %v801_v59 = vadd.f32 1.0, %v4130_v31 }
0x3dad   :  { %4135 = vlog2.f32 %v441_v15  ;;  %p4239_p6 = pnand %p4238_p5, %p4232_p2 }
0x3e18   :  { %v2859_v10 = vpop.permute.xlu1 %2858 }
0x3e19   :  { %v5081_v9 = vmul.f32 %v4116_v4, %v2859_v10  ;;  %v4132_v4 = vpop.eup %4131 }
0x3e1a   :  { %v1519_v33 = vadd.f32 1.0, %v4132_v4  ;;  %v4134_v37 = vpop.eup %4133 }
0x3e1b   :  { %2863 = vrot.lane.b32.xlu0 %v5081_v9, %s4306_s19  ;;  %v2237_v42 = vadd.f32 1.0, %v4134_v37  ;;  %v4136_v52 = vpop.eup %4135 }
0x3e1c   :  { %v443_v12 = vmul.f32 0.6931472, %v4136_v52 }
0x3e1e   :  { %v444_v21 = vsub.f32 %v436_v7, %v443_v12  ;;  %v1146_v7 = vsub.f32 %v4715_v30, %v4719_v34 }
0x3e3a   :  { %431 = vadd.xlane.f32.xlu0 %v430_v38  ;;  %v5103_v38 = vshrl.u32 %v80_v17, 7 }
0x3e3c   :  { %v5110_v0 = vsub.s32 %v476_v19, %v5103_v38 }
0x3e3e   :  { %791 = vadd.xlane.f32.xlu0 %v790_v61 }
0x3e42   :  { %1509 = vadd.xlane.f32.xlu0 %v1508_v54 }
0x3e46   :  { %2227 = vadd.xlane.f32.xlu0 %v2226_v26 }
0x3e8d   :  { %v2864_v22 = vpop.permute.xlu0 %2863 }
0x3e8e   :  { %3753 = vmatmul.mubr.msk.f32.vlgmr.msra.gmra.mrb[22].mxu1 %vm228_vm6, %v2864_v22 }
0x3ec7   :  { %v432_v23 = vpop.xlane.xlu0 %431 }
0x3ec8   :  { %4137 = vlog2.f32 %v432_v23 }
0x3ec9   :  { %4139 = vlog2.f32 %v801_v59 }
0x3ecb   :  { %v792_v6 = vpop.xlane.xlu0 %791 }
0x3ecc   :  { %4141 = vlog2.f32 %v792_v6 }
0x3ecd   :  { %4143 = vlog2.f32 %v1519_v33 }
0x3ecf   :  { %v1510_v10 = vpop.xlane.xlu0 %1509 }
0x3ed0   :  { %4145 = vlog2.f32 %v1510_v10 }
0x3ed1   :  { %4147 = vlog2.f32 %v2237_v42  ;;  %v2232_v42 = vmin.f32 %v4954_v39, 0.0 }
0x3ed2   :  { %v4138_v14 = vpop.eup %4137 }
0x3ed3   :  { %v4140_v60 = vpop.eup %4139  ;;  %v434_v13 = vmul.f32 0.6931472, %v4138_v14  ;;  %v2228_v24 = vpop.xlane.xlu0 %2227 }
0x3ed4   :  { %4149 = vlog2.f32 %v2228_v24  ;;  %v803_v54 = vmul.f32 0.6931472, %v4140_v60 }
0x3ed5   :  { %v435_v61 = vadd.f32 %v434_v13, %v4569_v40 }
0x3ed6   :  { %v4142_v29 = vpop.eup %4141  ;;  %v804_v43 = vsub.f32 %v796_v1, %v803_v54 }
0x3ed7   :  { %v445_v26 = vsub.f32 %v4560_v35, %v435_v61  ;;  %v794_v22 = vmul.f32 0.6931472, %v4142_v29  ;;  %v4144_v25 = vpop.eup %4143  ;;  %v1147_v61 = vmul.f32 1.442695, %v1146_v7  ;;  %v1864_v29 = vsub.f32 %v4870_v48, %v4874_v50 }
0x3ed8   :  { %v1521_v53 = vmul.f32 0.6931472, %v4144_v25 }
0x3ed9   :  { %v446_v17 = vsel %vm82_vm8, %v444_v21, %v445_v26  ;;  %v795_v28 = vadd.f32 %v794_v22, %v4644_v63  ;;  %4151 = vpow2.f32 %v1147_v61  ;;  %v1865_v54 = vmul.f32 1.442695, %v1864_v29 }
0x3eda   :  { %v4146_v32 = vpop.eup %4145  ;;  %v480_v40 = vrot.slane %v446_v17, %v5110_v0  ;;  %v2582_v21 = vsub.f32 %v5034_v44, %v5038_v46 }
0x3edb   :  { %v805_v35 = vsub.f32 %v4634_v58, %v795_v28  ;;  %v1512_v49 = vmul.f32 0.6931472, %v4146_v32  ;;  %v4148_v56 = vpop.eup %4147  ;;  %v1522_v58 = vsub.f32 %v1514_v55, %v1521_v53  ;;  %4153 = vpow2.f32 %v1865_v54 }
0x3edc   :  { %v481_v51 = vcombine.high %v480_v40, %v480_v40  ;;  %v488_v16 = vrot.slane %v480_v40, %v5110_v0  ;;  %v2239_v4 = vmul.f32 0.6931472, %v4148_v56  ;;  %v2583_v26 = vmul.f32 1.442695, %v2582_v21 }
0x3edd   :  { %v806_v62 = vsel %vm82_vm8, %v804_v43, %v805_v35  ;;  %v1513_v63 = vadd.f32 %v1512_v49, %v4794_v5  ;;  %v5166_v40 = vrot.slane %v5067_v47, %v5110_v0  ;;  %v3072_v35 = vrot.slane %v5081_v9, %v5110_v0 }
0x3ede   :  { %v4150_v31 = vpop.eup %4149  ;;  %v495_v15 = vrot.slane %v481_v51, %v5110_v0  ;;  %499 = vst.msk [vmem:[#allocation7] sm:$0x1] %vm498_vm0, %v488_v16  ;;  %v840_v59 = vrot.slane %v806_v62, %v5110_v0  ;;  %4155 = vpow2.f32 %v2583_v26  ;;  %v5173_v49 = vsub.s32 0, %v5103_v38 }
0x3edf   :  { %v1523_v23 = vsub.f32 %v4784_v3, %v1513_v63  ;;  %v2230_v33 = vmul.f32 0.6931472, %v4150_v31  ;;  %v2240_v3 = vsub.f32 %v2232_v42, %v2239_v4  ;;  %v3002_v53 = vrot.slane %v5166_v40, %v5110_v0 }
0x3ee0   :  { %500 = vst.msk [vmem:[#allocation7 + $0x8] sm:$0x1] %vm498_vm0, %v495_v15  ;;  %v841_v37 = vcombine.high %v840_v59, %v840_v59  ;;  %v848_v6 = vrot.slane %v840_v59, %v5110_v0  ;;  %v5177_v56 = vrot.slane %v5061_v41, %v5110_v0  ;;  %v3073_v51 = vcombine.high %v3072_v35, %v3072_v35 }
0x3ee1   :  { %v1524_v5 = vsel %vm82_vm8, %v1522_v58, %v1523_v23  ;;  %v2231_v10 = vadd.f32 %v2230_v33, %v4964_v57  ;;  %v3080_v16 = vrot.slane %v3072_v35, %v5110_v0  ;;  %v3013_v55 = vrot.slane %v3002_v53, %v5173_v49 }
0x3ee2   :  { %v855_v52 = vrot.slane %v841_v37, %v5110_v0  ;;  %858 = vst.msk [vmem:[#allocation7 + $0x1] sm:$0x1] %vm498_vm0, %v848_v6  ;;  %v1558_v11 = vrot.slane %v1524_v5, %v5110_v0  ;;  %v3035_v47 = vcombine.high %v5177_v56, %v5177_v56  ;;  %v5186_v9 = vrot.slane %v5077_v8, %v5110_v0 }
0x3ee3   :  { %v2241_v20 = vsub.f32 %v4954_v39, %v2231_v10  ;;  %v4152_v48 = vpop.eup %4151  ;;  %v3091_v38 = vrot.slane %v3080_v16, %v5173_v49  ;;  %v3087_v62 = vrot.slane %v3073_v51, %v5110_v0  ;;  %v1156_v58 = vand.u32 2147483647, %v4710_v27 }
0x3ee4   :  { %859 = vst.msk [vmem:[#allocation7 + $0x9] sm:$0x1] %vm498_vm0, %v855_v52  ;;  %v1559_v14 = vcombine.high %v1558_v11, %v1558_v11  ;;  %v1566_v60 = vrot.slane %v1558_v11, %v5110_v0  ;;  %v1149_v28 = vsel %vm423_vm9, %v4152_v48, 0.0  ;;  %v3049_v41 = vrot.slane %v3035_v47, %v5110_v0 }
0x3ee5   :  { %v2242_v12 = vsel %vm82_vm8, %v2240_v3, %v2241_v20  ;;  %v4154_v32 = vpop.eup %4153  ;;  %v3112_v63 = vcombine.high %v5186_v9, %v5186_v9  ;;  %v3095_v31 = vrot.slane %v3087_v62, %v5173_v49  ;;  %v1874_v4 = vand.u32 2147483647, %v4865_v45 }
0x3ee6   :  { %v1573_v13 = vrot.slane %v1559_v14, %v5110_v0  ;;  %1576 = vst.msk [vmem:[#allocation7 + $0x3] sm:$0x1] %vm498_vm0, %v1566_v60  ;;  %v2276_v57 = vrot.slane %v2242_v12, %v5110_v0  ;;  %v1867_v44 = vsel %vm423_vm9, %v4154_v32, 0.0  ;;  %v3057_v8 = vrot.slane %v3049_v41, %v5173_v49 }
0x3ee7   :  { %v3126_v15 = vrot.slane %v3112_v63, %v5110_v0  ;;  %v1157_v23 = vsub.f32 0.0, %v1156_v58  ;;  %v1875_v33 = vsub.f32 0.0, %v1874_v4  ;;  %v2592_v6 = vand.u32 2147483647, %v5029_v2 }
0x3ee8   :  { %1577 = vst.msk [vmem:[#allocation7 + $0xb] sm:$0x1] %vm498_vm0, %v1573_v13  ;;  %v2277_v24 = vcombine.high %v2276_v57, %v2276_v57  ;;  %v2284_v19 = vrot.slane %v2276_v57, %v5110_v0  ;;  %v4156_v43 = vpop.eup %4155  ;;  %v1873_v53 = vmin.f32 %v4865_v45, 0.0 }
0x3ee9   :  { %v3134_v59 = vrot.slane %v3126_v15, %v5173_v49  ;;  %v1158_v37 = vmul.f32 1.442695, %v1157_v23  ;;  %v1876_v42 = vmul.f32 1.442695, %v1875_v33  ;;  %v2593_v5 = vsub.f32 0.0, %v2592_v6 }
0x3eea   :  { %v2291_v39 = vrot.slane %v2277_v24, %v5110_v0  ;;  %2294 = vst.msk [vmem:[#allocation7 + $0x5] sm:$0x1] %vm498_vm0, %v2284_v19  ;;  %v2995_v33 = vcombine.high %v5166_v40, %v5166_v40 }
0x3eeb   :  { %4157 = vpow2.f32 %v1158_v37  ;;  %v2594_v10 = vmul.f32 1.442695, %v2593_v5 }
0x3eec   :  { %2295 = vst.msk [vmem:[#allocation7 + $0xd] sm:$0x1] %vm498_vm0, %v2291_v39  ;;  %4159 = vpow2.f32 %v1876_v42 }
0x3eed   :  { %4161 = vpow2.f32 %v2594_v10 }
0x3ef5   :  { %v4158_v52 = vpop.eup %4157 }
0x3ef6   :  { %v4160_v11 = vpop.eup %4159  ;;  %v1160_v3 = vadd.f32 1.0, %v4158_v52  ;;  %v3009_v52 = vrot.slane %v2995_v33, %v5110_v0 }
0x3ef7   :  { %v1878_v20 = vadd.f32 1.0, %v4160_v11  ;;  %v4162_v13 = vpop.eup %4161 }
0x3ef8   :  { %4163 = vlog2.f32 %v1160_v3  ;;  %v2596_v24 = vadd.f32 1.0, %v4162_v13  ;;  %v3042_v3 = vrot.slane %v5177_v56, %v5110_v0 }
0x3ef9   :  { %4165 = vlog2.f32 %v1878_v20  ;;  %v3017_v20 = vrot.slane %v3009_v52, %v5173_v49 }
0x3f02   :  { %v4164_v7 = vpop.eup %4163 }
0x3f03   :  { %v4166_v61 = vpop.eup %4165 }
0x3f04   :  { %v1880_v48 = vmul.f32 0.6931472, %v4166_v61 }
0x3f61   :  { %v2933_v22 = vpop.f32.mrb[22].mxu1 }
0x3f62   :  { %v5155_v25 = vadd.f32 %v4951_v36, %v2933_v22  ;;  %v3754_v1 = vpop.f32.mrb[23].mxu1  ;;  %v2585_v36 = vsel %vm423_vm9, %v4156_v43, 0.0  ;;  %v1162_v22 = vmul.f32 0.6931472, %v4164_v7 }
0x3f64   :  { %v2937_v30 = vsel %vm82_vm8, -inf, %v5155_v25 }
0x3f65   :  { %v2938_v17 = vsel %vm423_vm9, %v2937_v30, -inf }
0x3f66   :  { %2939 = vmax.xlane.f32.xlu1 %v2938_v17  ;;  %v1155_v17 = vmin.f32 %v4710_v27, 0.0 }
0x3f6a   :  { %1150 = vadd.xlane.f32.xlu1 %v1149_v28 }
0x3f6e   :  { %1868 = vadd.xlane.f32.xlu1 %v1867_v44 }
0x3f72   :  { %2586 = vadd.xlane.f32.xlu1 %v2585_v36  ;;  %v1163_v36 = vsub.f32 %v1155_v17, %v1162_v22 }
0x3f83   :  { %3018 = vrot.lane.b32.xlu1 %v3013_v55, %s4306_s19  ;;  %v1881_v55 = vsub.f32 %v1873_v53, %v1880_v48 }
0x3f87   :  { %3096 = vrot.lane.b32.xlu1 %v3091_v38, %s4306_s19 }
0x3f8b   :  { %3098 = vrot.lane.b32.xlu1 %v3095_v31, %s4306_s19  ;;  %v2591_v31 = vmin.f32 %v5029_v2, 0.0 }
0x3f8f   :  { %3060 = vrot.lane.b32.xlu1 %v3057_v8, %s4317_s6 }
0x3f93   :  { %3137 = vrot.lane.b32.xlu1 %v3134_v59, %s4317_s6 }
0x3ff3   :  { %v5204_v14 = vpop.xlane.xlu1 %2939 }
0x3ff4   :  { %v2941_v60 = vsub.f32 %v2937_v30, %v5204_v14 }
0x3ff6   :  { %v2942_v12 = vmul.f32 1.442695, %v2941_v60  ;;  %v3053_v60 = vrot.slane %v3042_v3, %v5173_v49 }
0x3ff7   :  { %v1151_v57 = vpop.xlane.xlu1 %1150 }
0x3ff8   :  { %4167 = vpow2.f32 %v2942_v12  ;;  %v3119_v12 = vrot.slane %v5186_v9, %v5110_v0 }
0x3ff9   :  { %4169 = vlog2.f32 %v1151_v57  ;;  %v2951_v57 = vand.u32 2147483647, %v5155_v25 }
0x3ffa   :  { %v3130_v13 = vrot.slane %v3119_v12, %v5173_v49 }
0x3ffb   :  { %v1869_v19 = vpop.xlane.xlu1 %1868  ;;  %v2952_v56 = vsub.f32 0.0, %v2951_v57 }
0x3ffc   :  { %4171 = vlog2.f32 %v1869_v19 }
0x3ffd   :  { %4173 = vlog2.f32 %v2596_v24  ;;  %v2953_v24 = vmul.f32 1.442695, %v2952_v56 }
0x3fff   :  { %v2587_v39 = vpop.xlane.xlu1 %2586 }
0x4000   :  { %4175 = vlog2.f32 %v2587_v39 }
0x4001   :  { %4177 = vpow2.f32 %v2953_v24 }
0x4002   :  { %v4168_v29 = vpop.eup %4167 }
0x4003   :  { %v4170_v54 = vpop.eup %4169  ;;  %v3019_v21 = vpop.permute.xlu1 %3018  ;;  %v2944_v26 = vsel %vm423_vm9, %v4168_v29, 0.0 }
0x4004   :  { %v1153_v1 = vmul.f32 0.6931472, %v4170_v54  ;;  %3025 = vst.msk [vmem:[#allocation8] sm:$0x1] %vm3024_vm3, %v3019_v21  ;;  %2945 = vadd.xlane.f32.xlu0 %v2944_v26 }
0x4006   :  { %v4172_v30 = vpop.eup %4171  ;;  %v1154_v28 = vadd.f32 %v1153_v1, %v4719_v34 }
0x4007   :  { %v1871_v32 = vmul.f32 0.6931472, %v4172_v30  ;;  %v3097_v44 = vpop.permute.xlu1 %3096  ;;  %v4174_v43 = vpop.eup %4173 }
0x4008   :  { %v1164_v35 = vsub.f32 %v4710_v27, %v1154_v28  ;;  %3102 = vst.msk [vmem:[#allocation8 + $0x1] sm:$0x1] %vm3024_vm3, %v3097_v44  ;;  %v2598_v38 = vmul.f32 0.6931472, %v4174_v43 }
0x4009   :  { %v1872_v51 = vadd.f32 %v1871_v32, %v4874_v50 }
0x400a   :  { %v4176_v16 = vpop.eup %4175  ;;  %v1165_v47 = vsel %vm82_vm8, %v1163_v36, %v1164_v35  ;;  %v2599_v58 = vsub.f32 %v2591_v31, %v2598_v38 }
0x400b   :  { %v1199_v34 = vrot.slane %v1165_v47, %v5110_v0  ;;  %v1882_v62 = vsub.f32 %v4865_v45, %v1872_v51  ;;  %v2589_v41 = vmul.f32 0.6931472, %v4176_v16  ;;  %v3099_v63 = vpop.permute.xlu1 %3098  ;;  %v4178_v19 = vpop.eup %4177 }
0x400c   :  { %3103 = vst.msk [vmem:[#allocation8 + $0x3] sm:$0x1] %vm3024_vm3, %v3099_v63  ;;  %v2955_v39 = vadd.f32 1.0, %v4178_v19 }
0x400d   :  { %v1200_v27 = vcombine.high %v1199_v34, %v1199_v34  ;;  %v1207_v15 = vrot.slane %v1199_v34, %v5110_v0  ;;  %v1883_v50 = vsel %vm82_vm8, %v1881_v55, %v1882_v62  ;;  %v2590_v8 = vadd.f32 %v2589_v41, %v5038_v46 }
0x400e   :  { %v1917_v59 = vrot.slane %v1883_v50, %v5110_v0  ;;  %4179 = vlog2.f32 %v2955_v39 }
0x400f   :  { %v1214_v4 = vrot.slane %v1200_v27, %v5110_v0  ;;  %1217 = vst.msk [vmem:[#allocation7 + $0x2] sm:$0x1] %vm498_vm0, %v1207_v15  ;;  %v2600_v45 = vsub.f32 %v5029_v2, %v2590_v8  ;;  %v3061_v23 = vpop.permute.xlu1 %3060 }
0x4010   :  { %v1918_v37 = vcombine.high %v1917_v59, %v1917_v59  ;;  %v1925_v6 = vrot.slane %v1917_v59, %v5110_v0  ;;  %3065 = vst.msk [vmem:[#allocation10 + $0x2] sm:$0x1] %vm3024_vm3, %v3061_v23 }
0x4011   :  { %1218 = vst.msk [vmem:[#allocation7 + $0xa] sm:$0x1] %vm498_vm0, %v1214_v4  ;;  %v2601_v46 = vsel %vm82_vm8, %v2599_v58, %v2600_v45 }
0x4012   :  { %v1932_v42 = vrot.slane %v1918_v37, %v5110_v0  ;;  %1935 = vst.msk [vmem:[#allocation7 + $0x4] sm:$0x1] %vm498_vm0, %v1925_v6  ;;  %v2635_v2 = vrot.slane %v2601_v46, %v5110_v0 }
0x4013   :  { %v3138_v5 = vpop.permute.xlu1 %3137 }
0x4014   :  { %1936 = vst.msk [vmem:[#allocation7 + $0xc] sm:$0x1] %vm498_vm0, %v1932_v42  ;;  %v2636_v40 = vcombine.high %v2635_v2, %v2635_v2  ;;  %v2643_v10 = vrot.slane %v2635_v2, %v5110_v0 }
0x4015   :  { %3142 = vst.msk [vmem:[#allocation10 + $0x3] sm:$0x1] %vm3024_vm3, %v3138_v5 }
0x4016   :  { %v2650_v11 = vrot.slane %v2636_v40, %v5110_v0  ;;  %2653 = vst.msk [vmem:[#allocation7 + $0x6] sm:$0x1] %vm498_vm0, %v2643_v10 }
0x4018   :  { %2654 = vst.msk [vmem:[#allocation7 + $0xe] sm:$0x1] %vm498_vm0, %v2650_v11 }
0x401a   :  { %3020 = vrot.lane.b32.xlu0 %v3017_v20, %s4306_s19 }
0x401e   :  { %3058 = vrot.lane.b32.xlu0 %v3053_v60, %s4317_s6 }
0x4022   :  { %3135 = vrot.lane.b32.xlu0 %v3130_v13, %s4317_s6 }
0x4091   :  { %v2946_v7 = vpop.xlane.xlu0 %2945 }
0x4092   :  { %4181 = vlog2.f32 %v2946_v7 }
0x4095   :  { %v3021_v9 = vpop.permute.xlu0 %3020 }
0x4096   :  { %3026 = vst.msk [vmem:[#allocation8 + $0x2] sm:$0x1] %vm3024_vm3, %v3021_v9 }
0x4097   :  { %4242 = shalt.err (!%p4239_p6)
}
0x4098   :  { %s4243_s18 = scalar_lea.hbm %s5323_s8, 64 }
0x4099   :  { %p4244_p7 = scmp.ne.s32.totalorder %s5323_s8, %s4243_s18  ;;  %p4247_p8 = scmp.lt.u32.totalorder %s4243_s18, %s5323_s8 }
0x409b   :  { %p4249_p9 = pnand %p4247_p8, %p4244_p7 }
0x409d   :  { %4252 = shalt.err (!%p4249_p9)
}
0x409e   :  { %3166 = dma.vmem_to_hbm [thread:$0]  %s3161_s16, 64, %s5323_s8, [#allocation9], %s4306_s19, %s4306_s19, %s4307_s20   ;;  %v3059_v49 = vpop.permute.xlu0 %3058  ;;  %v4180_v61 = vpop.eup %4179  ;;  %v2950_v22 = vmin.f32 %v5155_v25, 0.0 }
0x409f   :  { %s4319_s5 = smov [#allocation10]   ;;  %3064 = vst.msk [vmem:[#allocation10] sm:$0x1] %vm3024_vm3, %v3059_v49  ;;  %v4182_v29 = vpop.eup %4181  ;;  %v2957_v54 = vmul.f32 0.6931472, %v4180_v61 }
0x40a0   :  { %s3172_s27 = sshll.u32 %s4319_s5, 4  ;;  %v2948_v21 = vmul.f32 0.6931472, %v4182_v29  ;;  %s3173_s27 = int_to_ptr.vmem [resolvable:$true] %s3172_s27 }
0x40a1   :  { %s4253_s28 = scalar_lea.vmem %s3173_s27, 64  ;;  %p4258_p11 = scmp.lt.s32.totalorder %s3173_s27, %s3173_s27 }
0x40a2   :  { %v3136_v26 = vpop.permute.xlu0 %3135  ;;  %v2949_v1 = vadd.f32 %v2948_v21, %v5204_v14  ;;  %p4254_p10 = scmp.ne.s32.totalorder %s3173_s27, %s4253_s28  ;;  %p4259_p12 = scmp.lt.s32.totalorder %s4253_s28, %s4253_s28 }
0x40a3   :  { %3141 = vst.msk [vmem:[#allocation10 + $0x1] sm:$0x1] %vm3024_vm3, %v3136_v26 }
0x40a4   :  { %p4260_p13 = por %p4259_p12, %p4258_p11 }
0x40a6   :  { %p4261_p0 = pnand %p4260_p13, %p4254_p10 }
0x40a8   :  { %4264 = shalt.err (!%p4261_p0)
}
0x40a9   :  { %s4265_s30 = scalar_lea.hbm %s5324_s9, 64 }
0x40aa   :  { %p4266_p1 = scmp.ne.s32.totalorder %s5324_s9, %s4265_s30  ;;  %p4269_p2 = scmp.lt.u32.totalorder %s4265_s30, %s5324_s9 }
0x40ac   :  { %p4271_p3 = pnand %p4269_p2, %p4266_p1 }
0x40ae   :  { %4274 = shalt.err (!%p4271_p3)
}
0x40af   :  { %3178 = dma.vmem_to_hbm [thread:$0]  %s3173_s27, 64, %s5324_s9, [#allocation9], %s4306_s19, %s4306_s19, %s4307_s20   ;;  %v2958_v14 = vsub.f32 %v2950_v22, %v2957_v54  ;;  %v2959_v30 = vsub.f32 %v5155_v25, %v2949_v1 }
0x40b0   :  { %s4320_s6 = smov [#allocation7]  }
0x40b1   :  { %v2960_v17 = vsel %vm82_vm8, %v2958_v14, %v2959_v30  ;;  %s3148_s12 = sshll.u32 %s4320_s6, 4  ;;  %s3149_s12 = int_to_ptr.vmem [resolvable:$true] %s3148_s12 }
0x40b2   :  { %v2968_v48 = vrot.slane %v2960_v17, %v5110_v0  ;;  %s4275_s9 = scalar_lea.vmem %s3149_s12, 256  ;;  %p4280_p5 = scmp.lt.s32.totalorder %s3149_s12, %s3149_s12 }
0x40b3   :  { %p4276_p4 = scmp.ne.s32.totalorder %s3149_s12, %s4275_s9  ;;  %p4281_p6 = scmp.lt.s32.totalorder %s4275_s9, %s4275_s9 }
0x40b4   :  { %v2969_v28 = vcombine.high %v2968_v48, %v2968_v48  ;;  %v2976_v32 = vrot.slane %v2968_v48, %v5110_v0 }
0x40b5   :  { %p4282_p7 = por %p4281_p6, %p4280_p5 }
0x40b6   :  { %v2983_v44 = vrot.slane %v2969_v28, %v5110_v0  ;;  %2986 = vst.msk [vmem:[#allocation7 + $0x7] sm:$0x1] %vm498_vm0, %v2976_v32 }
0x40b7   :  { %p4283_p8 = pnand %p4282_p7, %p4276_p4 }
0x40b8   :  { %2987 = vst.msk [vmem:[#allocation7 + $0xf] sm:$0x1] %vm498_vm0, %v2983_v44 }
0x40b9   :  { %4286 = shalt.err (!%p4283_p8)
}
0x40ba   :  { %s4287_s16 = scalar_lea.hbm %s5322_s7, 256 }
0x40bb   :  { %p4288_p9 = scmp.ne.s32.totalorder %s5322_s7, %s4287_s16  ;;  %p4291_p10 = scmp.lt.u32.totalorder %s4287_s16, %s5322_s7 }
0x40bd   :  { %p4293_p11 = pnand %p4291_p10, %p4288_p9 }
0x40bf   :  { %4296 = shalt.err (!%p4293_p11)
}
0x40c0   :  { %3154 = dma.vmem_to_hbm [thread:$0]  %s3149_s12, 256, %s5322_s7, [#allocation4], %s4309_s1, %s4309_s1, %s4310_s10  }
0x40c1   :  { %4301 = dma.done.wait [#allocation4], 256  }
0x40c2   :  { %4302 = vsyncadd [#allocation4], 4294967040 }
0x40c3   :  { %4303 = dma.done.wait [#allocation9], 128  }
0x40c4   :  { %4304 = vsyncadd [#allocation9], 4294967168 }
0x40c5   :  { %3188 = vsyncpa [#allocation3], 1 }
0x40c6   :  { %3189 = vsyncpa [#allocation6], 1 }
0x40c7   :  { %3190 = vsyncpa [#allocation4], 1 }
0x40c8   :  { %3191 = vsyncpa [#allocation9], 1 }

</bundles_post_ra>
